<compile_context>
chip_gen: v7x
topology: tpu7x:2x2x1
jax: 0.10.0
libtpu: 0.0.40
codegen_flags: <defaults>
</compile_context>

<pallas_src>
import functools

import jax
import jax.numpy as jnp
from jax.experimental import pallas as pl
from jax.experimental.pallas import tpu as pltpu


def _roi_align_kernel(rois_ref, hlo_ref, hhi_ref, lanec_ref, feat_ref,
                      out_ref, acc_ref, *,
                      spatial_scale, pooled, sampling_ratio, H, W,
                      h_tile, W_pad, rb, r_img_pad, nblocks, compute_dtype):
    P = pooled
    PP = P * P
    S = sampling_ratio
    rbpp = rb * PP

    n = pl.program_id(0)               # image
    b = pl.program_id(2)               # ROI block within the image
    hw = pl.program_id(3)              # H-row chunk (contraction axis)

    @pl.when(hw == 0)
    def _init():
        acc_ref[...] = jnp.zeros_like(acc_ref)

    blk = n * nblocks + b
    c_lo = hw * h_tile                 # first feature row of this chunk
    intersect = jnp.logical_and(hhi_ref[blk] >= c_lo,
                                hlo_ref[blk] < c_lo + h_tile)

    @pl.when(intersect)
    def _compute():
        base = n * r_img_pad + b * rb  # first (padded, global) ROI of block

        # Per-output-row (lane) constants: local roi id, bin row, bin col.
        r_row = lanec_ref[0:1, :]      # (1, rbpp)
        py = lanec_ref[1:2, :]
        px = lanec_ref[2:3, :]

        # Expand per-ROI scalars (flat SMEM table) to per-lane rows via
        # independent masked adds (no long select chain).
        zrow = jnp.zeros((1, rbpp), jnp.float32)
        y0, x0, bh, bw = zrow, zrow, zrow, zrow
        for r in range(rb):            # rb is small & static (default 8)
            g5 = (base + r) * 5
            x1 = rois_ref[g5 + 1] * spatial_scale
            y1 = rois_ref[g5 + 2] * spatial_scale
            x2 = rois_ref[g5 + 3] * spatial_scale
            y2 = rois_ref[g5 + 4] * spatial_scale
            bwr = jnp.maximum(x2 - x1, 1.0) * (1.0 / P)
            bhr = jnp.maximum(y2 - y1, 1.0) * (1.0 / P)
            m = r_row == float(r)
            y0 = y0 + jnp.where(m, y1, 0.0)
            x0 = x0 + jnp.where(m, x1, 0.0)
            bh = bh + jnp.where(m, bhr, 0.0)
            bw = bw + jnp.where(m, bwr, 0.0)

        ys = y0 + py * bh              # (1, rbpp) bin start y per output row
        xs = x0 + px * bw

        # Feature-row / feature-col index columns for this chunk (iota, no
        # constant DMAs needed).
        h_col = (jax.lax.broadcasted_iota(jnp.int32, (h_tile, 1), 0)
                 + c_lo).astype(jnp.float32)
        w_col = jax.lax.broadcasted_iota(
            jnp.int32, (W_pad, 1), 0).astype(jnp.float32)

        # Separable averaged bilinear ("hat") weights — all S-loop work at
        # narrow widths (h_tile and W_pad columns, not h_tile*W_pad).
        # aligned=False semantics: samples outside [-1, size] contribute 0,
        # otherwise clamp into [0, size-1].
        wy = jnp.zeros((h_tile, rbpp), jnp.float32)
        wx = jnp.zeros((W_pad, rbpp), jnp.float32)
        for s in range(S):             # static tiny loop (e.g. S = 2)
            frac = (s + 0.5) / S
            cy = ys + frac * bh
            vy = jnp.logical_and(cy >= -1.0, cy <= float(H))
            cyc = jnp.clip(cy, 0.0, float(H - 1))
            wy = wy + jnp.where(
                vy, jnp.maximum(0.0, 1.0 - jnp.abs(cyc - h_col)), 0.0)
            cx = xs + frac * bw
            vx = jnp.logical_and(cx >= -1.0, cx <= float(W))
            cxc = jnp.clip(cx, 0.0, float(W - 1))
            wx = wx + jnp.where(
                vx, jnp.maximum(0.0, 1.0 - jnp.abs(cxc - w_col)), 0.0)

        # Fold 1/S^2 and the compute-dtype cast into the narrow factors so the
        # outer product is the single full-width elementwise pass.
        wy_cd = (wy * (1.0 / float(S * S))).astype(compute_dtype)
        wx_cd = wx.astype(compute_dtype)
        kT = (wy_cd[:, None, :] * wx_cd[None, :, :]).reshape(
            h_tile * W_pad, rbpp)      # leading-dim collapse (layout-cheap)

        feat = feat_ref[0]             # (h_tile*W_pad, cb), already bf16/f32
        acc_ref[...] += jax.lax.dot_general(
            kT, feat, (((0,), (0,)), ((), ())),
            preferred_element_type=jnp.float32)        # (rbpp, cb)

    @pl.when(hw == pl.num_programs(3) - 1)
    def _store():
        out_ref[...] = acc_ref[...].astype(out_ref.dtype)   # lane-dense store


def roi_align_single_level(feature, rois, num_images, *, output_size,
                           spatial_scale, sampling_ratio, roi_block=8,
                           channel_block=None, hw_tile_target=2048,
                           compute_dtype=jnp.bfloat16):
    """feature: (N, C, H, W) f32; rois: (R, 5) f32 [batch, x1, y1, x2, y2]
    image-major with equal counts per image -> (R, C, P, P) f32."""
    N, C, H, W = feature.shape
    assert N == num_images
    R = rois.shape[0]
    assert R % num_images == 0
    P = int(output_size)
    PP = P * P
    S = int(sampling_ratio)
    assert S > 0
    rb = int(roi_block)
    assert rb % 8 == 0                 # keeps (rb*P*P, cb) out block sublane-aligned
    rbpp = rb * PP

    r_img = R // num_images
    nblocks = -(-r_img // rb)
    r_img_pad = nblocks * rb

    # Lane-dense channel padding (>=128) and per-generation channel blocking.
    C_pad = max(128, -(-C // 128) * 128)
    if channel_block is None:
        cb = 256 if (C_pad % 256 == 0) else 128   # v6e/v7x MXU is 256 wide in N
    else:
        cb = int(channel_block)
    assert C_pad % cb == 0 and cb % 128 == 0
    ncb = C_pad // cb

    # Spatial padding: W -> multiple of 16 (sublane/packing aligned), then pick
    # an H-chunk size bounding per-step VMEM, pad H to a multiple of it.
    W_pad = -(-W // 16) * 16
    h_tile = max(1, min(H, hw_tile_target // W_pad))
    H_pad = -(-H // h_tile) * h_tile
    n_hw = H_pad // h_tile

    # ROI table: pad per image to a multiple of rb, flatten to 1D for SMEM.
    rois_pad = jnp.pad(rois.astype(jnp.float32).reshape(num_images, r_img, 5),
                       ((0, 0), (0, r_img_pad - r_img), (0, 0)))
    rois_flat = rois_pad.reshape(-1)

    # Conservative per-(image, ROI-block) feature-row windows for pl.when skip
    # of non-intersecting H-chunks (pure perf; padded ROIs fall in [0, 2]).
    y1s = rois_pad[..., 2] * float(spatial_scale)
    y2s = rois_pad[..., 4] * float(spatial_scale)
    ext = jnp.maximum(y2s - y1s, 1.0)
    lo = jnp.clip(jnp.floor(y1s) - 1.0, 0.0, float(H - 1))
    hi = jnp.clip(jnp.floor(y1s + ext) + 2.0, 0.0, float(H - 1))
    hlo_blk = lo.reshape(num_images, nblocks, rb).min(-1).astype(jnp.int32).reshape(-1)
    hhi_blk = hi.reshape(num_images, nblocks, rb).max(-1).astype(jnp.int32).reshape(-1)

    # Per-output-row (lane) constants: [local_roi, py, px].
    ridx = jnp.arange(rbpp, dtype=jnp.int32)
    lanec = jnp.stack([ridx // PP, (ridx // P) % P, ridx % P],
                      axis=0).astype(jnp.float32)            # (3, rbpp)

    # Channels-last, spatially padded + flattened feature, cast once in XLA.
    feat = jnp.transpose(feature, (0, 2, 3, 1))               # (N, H, W, C)
    feat = jnp.pad(feat, ((0, 0), (0, H_pad - H), (0, W_pad - W), (0, C_pad - C)))
    feat_cl = feat.reshape(N, H_pad * W_pad, C_pad).astype(compute_dtype)

    kernel = functools.partial(
        _roi_align_kernel, spatial_scale=float(spatial_scale), pooled=P,
        sampling_ratio=S, H=H, W=W, h_tile=h_tile, W_pad=W_pad, rb=rb,
        r_img_pad=r_img_pad, nblocks=nblocks, compute_dtype=compute_dtype)

    grid_spec = pltpu.PrefetchScalarGridSpec(
        num_scalar_prefetch=0,
        grid=(num_images, ncb, nblocks, n_hw),
        in_specs=[
            pl.BlockSpec(memory_space=pltpu.MemorySpace.SMEM),      # rois (1D)
            pl.BlockSpec(memory_space=pltpu.MemorySpace.SMEM),      # row-window lo
            pl.BlockSpec(memory_space=pltpu.MemorySpace.SMEM),      # row-window hi
            pl.BlockSpec((3, rbpp), lambda n, c, b, hw: (0, 0)),    # lane consts
            pl.BlockSpec((1, h_tile * W_pad, cb),
                         lambda n, c, b, hw: (n, hw, c)),           # feature chunk
        ],
        out_specs=pl.BlockSpec((rbpp, cb),
                               lambda n, c, b, hw: (n * nblocks + b, c)),
        scratch_shapes=[pltpu.VMEM((rbpp, cb), jnp.float32)],       # accumulator
    )

    out_flat = pl.pallas_call(
        kernel,
        out_shape=jax.ShapeDtypeStruct((num_images * nblocks * rbpp, C_pad),
                                       jnp.float32),
        grid_spec=grid_spec,
        compiler_params=pltpu.CompilerParams(
            dimension_semantics=("parallel", "parallel", "parallel",
                                 "arbitrary")),
    )(rois_flat, hlo_blk, hhi_blk, lanec, feat_cl)

    # (N*r_pad*PP, C_pad) -> drop ROI/channel padding -> (R, C, P, P).
    out = out_flat.reshape(num_images, r_img_pad, P, P, C_pad)[:, :r_img, :, :, :C]
    return out.reshape(R, P, P, C).transpose(0, 3, 1, 2)


class SuppAlignLayer:
    """JAX/Pallas port of maskrcnn_benchmark SuppAlignLayer (no learnable params)."""

    def __init__(self, scales, output_size, sampling_ratio):
        self.scales = tuple(scales)
        self.output_size = (output_size if isinstance(output_size, int)
                            else int(output_size[0]))
        self.sampling_ratio = int(sampling_ratio)

    def convert_to_roi_format(self, boxes):
        # boxes: list (one per image) of (num_boxes, 4) arrays [x1, y1, x2, y2]
        box_nums_per_img = [b.shape[0] for b in boxes]
        assert len(set(box_nums_per_img)) == 1, box_nums_per_img
        concat_boxes = jnp.concatenate(boxes, axis=0)
        ids = jnp.concatenate(
            [jnp.full((b.shape[0], 1), i, dtype=concat_boxes.dtype)
             for i, b in enumerate(boxes)], axis=0)
        rois = jnp.concatenate([ids, concat_boxes], axis=1)  # (R, 5)
        return rois

    def __call__(self, x, boxes):
        rois = self.convert_to_roi_format(boxes)
        num_images = len(boxes)
        result = []
        for per_level_feature, scale in zip(x, self.scales):
            result.append(
                roi_align_single_level(
                    per_level_feature, rois, num_images,
                    output_size=self.output_size,
                    spatial_scale=scale,
                    sampling_ratio=self.sampling_ratio))
        return result


if __name__ == "__main__":
    key = jax.random.PRNGKey(0)
    kf0, kf1, kb = jax.random.split(key, 3)

    # Two feature levels (NCHW), batch=2, C=4; virtual image size 64x64.
    feats = [
        jax.random.normal(kf0, (2, 4, 16, 16), dtype=jnp.float32),  # scale 1/4
        jax.random.normal(kf1, (2, 4, 8, 8), dtype=jnp.float32),    # scale 1/8
    ]

    def make_boxes(k, n, img_size=64.0):
        k1, k2 = jax.random.split(k)
        xy1 = jax.random.uniform(k1, (n, 2), minval=0.0, maxval=img_size * 0.6)
        wh = jax.random.uniform(k2, (n, 2), minval=4.0, maxval=img_size * 0.4)
        xy2 = jnp.minimum(xy1 + wh, img_size - 1.0)
        return jnp.concatenate([xy1, xy2], axis=1).astype(jnp.float32)  # (n, 4)

    kb0, kb1 = jax.random.split(kb)
    boxes = [make_boxes(kb0, 3), make_boxes(kb1, 3)]  # 3 boxes per image

    layer = SuppAlignLayer(scales=(0.25, 0.125), output_size=7, sampling_ratio=2)
    outs = layer(feats, boxes)
    for o in outs:
        jax.block_until_ready(o)
        assert o.shape == (6, 4, 7, 7)
        assert bool(jnp.isfinite(o).all())
    print("KERNEL_OK")
</pallas_src>

<mosaic_0001>
module attributes {stable_mosaic.version = 11 : i64} {
  func.func @_roi_align_kernel(%arg0: i32, %arg1: i32, %arg2: i32, %arg3: i32, %arg4: memref<80xf32, #tpu.memory_space<smem>>, %arg5: memref<2xi32, #tpu.memory_space<smem>>, %arg6: memref<2xi32, #tpu.memory_space<smem>>, %arg7: memref<3x392xf32, #tpu.memory_space<vmem>>, %arg8: memref<1x256x128xbf16, #tpu.memory_space<vmem>>, %arg9: memref<392x128xf32, #tpu.memory_space<vmem>>, %arg10: memref<392x128xf32, #tpu.memory_space<vmem>>) attributes {dimension_semantics = [#tpu.dimension_semantics<parallel>, #tpu.dimension_semantics<parallel>, #tpu.dimension_semantics<parallel>, #tpu.dimension_semantics<arbitrary>], iteration_bounds = array<i64: 2, 1, 1, 1>, scalar_prefetch = 0 : i64, scratch_operands = 1 : i64, tpu.core_type = #tpu.core_type<tc>, window_params = [{transform_indices = @transform_0, window_bounds = array<i64: 80>}, {transform_indices = @transform_1, window_bounds = array<i64: 2>}, {transform_indices = @transform_2, window_bounds = array<i64: 2>}, {pipeline_mode = #tpu.pipeline_mode<synchronous>, transform_indices = @transform_3, window_bounds = array<i64: 3, 392>}, {transform_indices = @transform_4, window_bounds = array<i64: 1, 256, 128>}, {transform_indices = @transform_5, window_bounds = array<i64: 392, 128>}]} {
    %c0_i32 = arith.constant 0 : i32
    %0 = arith.cmpi eq, %arg3, %c0_i32 : i32
    %1 = arith.extui %0 : i1 to i32
    %c0_i32_0 = arith.constant 0 : i32
    %2 = arith.cmpi ne, %1, %c0_i32_0 : i32
    scf.if %2 {
      %cst = arith.constant 0.000000e+00 : f32
      %19 = vector.broadcast %cst : f32 to vector<392x128xf32>
      %c0 = arith.constant 0 : index
      %c0_5 = arith.constant 0 : index
      %20 = vector.load %arg10[%c0, %c0_5] : memref<392x128xf32, #tpu.memory_space<vmem>>, vector<392x128xf32>
      tpu.vector_store %arg10[%c0, %c0_5], %19 {strides = array<i32>} : memref<392x128xf32, #tpu.memory_space<vmem>>, vector<392x128xf32>,
    } else {
    }
    %c1_i32 = arith.constant 1 : i32
    %3 = arith.muli %arg0, %c1_i32 : i32
    %4 = arith.addi %3, %arg2 : i32
    %c16_i32 = arith.constant 16 : i32
    %5 = arith.muli %arg3, %c16_i32 : i32
    %6 = arith.index_cast %4 : i32 to index
    %7 = memref.load %arg6[%6] : memref<2xi32, #tpu.memory_space<smem>>
    %8 = arith.cmpi sge, %7, %5 : i32
    %9 = arith.index_cast %4 : i32 to index
    %10 = memref.load %arg5[%9] : memref<2xi32, #tpu.memory_space<smem>>
    %c16_i32_1 = arith.constant 16 : i32
    %11 = arith.addi %5, %c16_i32_1 : i32
    %12 = arith.cmpi slt, %10, %11 : i32
    %13 = arith.andi %8, %12 : i1
    %14 = arith.extui %13 : i1 to i32
    %c0_i32_2 = arith.constant 0 : i32
    %15 = arith.cmpi ne, %14, %c0_i32_2 : i32
    scf.if %15 {
      %c8_i32 = arith.constant 8 : i32
      %19 = arith.muli %arg0, %c8_i32 : i32
      %c8_i32_5 = arith.constant 8 : i32
      %20 = arith.muli %arg2, %c8_i32_5 : i32
      %21 = arith.addi %19, %20 : i32
      %c0 = arith.constant 0 : index
      %c0_6 = arith.constant 0 : index
      %22 = vector.load %arg7[%c0, %c0_6] : memref<3x392xf32, #tpu.memory_space<vmem>>, vector<1x392xf32>
      %c1 = arith.constant 1 : index
      %c0_7 = arith.constant 0 : index
      %23 = vector.load %arg7[%c1, %c0_7] : memref<3x392xf32, #tpu.memory_space<vmem>>, vector<1x392xf32>
      %c2 = arith.constant 2 : index
      %c0_8 = arith.constant 0 : index
      %24 = vector.load %arg7[%c2, %c0_8] : memref<3x392xf32, #tpu.memory_space<vmem>>, vector<1x392xf32>
      %cst = arith.constant 0.000000e+00 : f32
      %25 = vector.broadcast %cst : f32 to vector<1x392xf32>
      %c0_i32_9 = arith.constant 0 : i32
      %26 = arith.addi %21, %c0_i32_9 : i32
      %c5_i32 = arith.constant 5 : i32
      %27 = arith.muli %26, %c5_i32 : i32
      %c1_i32_10 = arith.constant 1 : i32
      %28 = arith.addi %27, %c1_i32_10 : i32
      %29 = arith.index_cast %28 : i32 to index
      %30 = memref.load %arg4[%29] : memref<80xf32, #tpu.memory_space<smem>>
      %cst_11 = arith.constant 2.500000e-01 : f32
      %31 = arith.mulf %30, %cst_11 : f32
      %c2_i32 = arith.constant 2 : i32
      %32 = arith.addi %27, %c2_i32 : i32
      %33 = arith.index_cast %32 : i32 to index
      %34 = memref.load %arg4[%33] : memref<80xf32, #tpu.memory_space<smem>>
      %cst_12 = arith.constant 2.500000e-01 : f32
      %35 = arith.mulf %34, %cst_12 : f32
      %c3_i32 = arith.constant 3 : i32
      %36 = arith.addi %27, %c3_i32 : i32
      %37 = arith.index_cast %36 : i32 to index
      %38 = memref.load %arg4[%37] : memref<80xf32, #tpu.memory_space<smem>>
      %cst_13 = arith.constant 2.500000e-01 : f32
      %39 = arith.mulf %38, %cst_13 : f32
      %c4_i32 = arith.constant 4 : i32
      %40 = arith.addi %27, %c4_i32 : i32
      %41 = arith.index_cast %40 : i32 to index
      %42 = memref.load %arg4[%41] : memref<80xf32, #tpu.memory_space<smem>>
      %cst_14 = arith.constant 2.500000e-01 : f32
      %43 = arith.mulf %42, %cst_14 : f32
      %44 = arith.subf %39, %31 : f32
      %cst_15 = arith.constant 1.000000e+00 : f32
      %45 = arith.maximumf %44, %cst_15 : f32
      %cst_16 = arith.constant 0.142857149 : f32
      %46 = arith.mulf %45, %cst_16 : f32
      %47 = arith.subf %43, %35 : f32
      %cst_17 = arith.constant 1.000000e+00 : f32
      %48 = arith.maximumf %47, %cst_17 : f32
      %cst_18 = arith.constant 0.142857149 : f32
      %49 = arith.mulf %48, %cst_18 : f32
      %cst_19 = arith.constant 0.000000e+00 : f32
      %50 = vector.broadcast %cst_19 : f32 to vector<1x392xf32>
      %51 = arith.cmpf oeq, %22, %50 : vector<1x392xf32>
      %cst_20 = arith.constant 0.000000e+00 : f32
      %52 = vector.broadcast %35 : f32 to vector<1x392xf32>
      %53 = vector.broadcast %cst_20 : f32 to vector<1x392xf32>
      %54 = arith.select %51, %52, %53 : vector<1x392xi1>, vector<1x392xf32>
      %55 = arith.addf %25, %54 : vector<1x392xf32>
      %cst_21 = arith.constant 0.000000e+00 : f32
      %56 = vector.broadcast %31 : f32 to vector<1x392xf32>
      %57 = vector.broadcast %cst_21 : f32 to vector<1x392xf32>
      %58 = arith.select %51, %56, %57 : vector<1x392xi1>, vector<1x392xf32>
      %59 = arith.addf %25, %58 : vector<1x392xf32>
      %cst_22 = arith.constant 0.000000e+00 : f32
      %60 = vector.broadcast %49 : f32 to vector<1x392xf32>
      %61 = vector.broadcast %cst_22 : f32 to vector<1x392xf32>
      %62 = arith.select %51, %60, %61 : vector<1x392xi1>, vector<1x392xf32>
      %63 = arith.addf %25, %62 : vector<1x392xf32>
      %cst_23 = arith.constant 0.000000e+00 : f32
      %64 = vector.broadcast %46 : f32 to vector<1x392xf32>
      %65 = vector.broadcast %cst_23 : f32 to vector<1x392xf32>
      %66 = arith.select %51, %64, %65 : vector<1x392xi1>, vector<1x392xf32>
      %67 = arith.addf %25, %66 : vector<1x392xf32>
      %c1_i32_24 = arith.constant 1 : i32
      %68 = arith.addi %21, %c1_i32_24 : i32
      %c5_i32_25 = arith.constant 5 : i32
      %69 = arith.muli %68, %c5_i32_25 : i32
      %c1_i32_26 = arith.constant 1 : i32
      %70 = arith.addi %69, %c1_i32_26 : i32
      %71 = arith.index_cast %70 : i32 to index
      %72 = memref.load %arg4[%71] : memref<80xf32, #tpu.memory_space<smem>>
      %cst_27 = arith.constant 2.500000e-01 : f32
      %73 = arith.mulf %72, %cst_27 : f32
      %c2_i32_28 = arith.constant 2 : i32
      %74 = arith.addi %69, %c2_i32_28 : i32
      %75 = arith.index_cast %74 : i32 to index
      %76 = memref.load %arg4[%75] : memref<80xf32, #tpu.memory_space<smem>>
      %cst_29 = arith.constant 2.500000e-01 : f32
      %77 = arith.mulf %76, %cst_29 : f32
      %c3_i32_30 = arith.constant 3 : i32
      %78 = arith.addi %69, %c3_i32_30 : i32
      %79 = arith.index_cast %78 : i32 to index
      %80 = memref.load %arg4[%79] : memref<80xf32, #tpu.memory_space<smem>>
      %cst_31 = arith.constant 2.500000e-01 : f32
      %81 = arith.mulf %80, %cst_31 : f32
      %c4_i32_32 = arith.constant 4 : i32
      %82 = arith.addi %69, %c4_i32_32 : i32
      %83 = arith.index_cast %82 : i32 to index
      %84 = memref.load %arg4[%83] : memref<80xf32, #tpu.memory_space<smem>>
      %cst_33 = arith.constant 2.500000e-01 : f32
      %85 = arith.mulf %84, %cst_33 : f32
      %86 = arith.subf %81, %73 : f32
      %cst_34 = arith.constant 1.000000e+00 : f32
      %87 = arith.maximumf %86, %cst_34 : f32
      %cst_35 = arith.constant 0.142857149 : f32
      %88 = arith.mulf %87, %cst_35 : f32
      %89 = arith.subf %85, %77 : f32
      %cst_36 = arith.constant 1.000000e+00 : f32
      %90 = arith.maximumf %89, %cst_36 : f32
      %cst_37 = arith.constant 0.142857149 : f32
      %91 = arith.mulf %90, %cst_37 : f32
      %cst_38 = arith.constant 1.000000e+00 : f32
      %92 = vector.broadcast %cst_38 : f32 to vector<1x392xf32>
      %93 = arith.cmpf oeq, %22, %92 : vector<1x392xf32>
      %cst_39 = arith.constant 0.000000e+00 : f32
      %94 = vector.broadcast %77 : f32 to vector<1x392xf32>
      %95 = vector.broadcast %cst_39 : f32 to vector<1x392xf32>
      %96 = arith.select %93, %94, %95 : vector<1x392xi1>, vector<1x392xf32>
      %97 = arith.addf %55, %96 : vector<1x392xf32>
      %cst_40 = arith.constant 0.000000e+00 : f32
      %98 = vector.broadcast %73 : f32 to vector<1x392xf32>
      %99 = vector.broadcast %cst_40 : f32 to vector<1x392xf32>
      %100 = arith.select %93, %98, %99 : vector<1x392xi1>, vector<1x392xf32>
      %101 = arith.addf %59, %100 : vector<1x392xf32>
      %cst_41 = arith.constant 0.000000e+00 : f32
      %102 = vector.broadcast %91 : f32 to vector<1x392xf32>
      %103 = vector.broadcast %cst_41 : f32 to vector<1x392xf32>
      %104 = arith.select %93, %102, %103 : vector<1x392xi1>, vector<1x392xf32>
      %105 = arith.addf %63, %104 : vector<1x392xf32>
      %cst_42 = arith.constant 0.000000e+00 : f32
      %106 = vector.broadcast %88 : f32 to vector<1x392xf32>
      %107 = vector.broadcast %cst_42 : f32 to vector<1x392xf32>
      %108 = arith.select %93, %106, %107 : vector<1x392xi1>, vector<1x392xf32>
      %109 = arith.addf %67, %108 : vector<1x392xf32>
      %c2_i32_43 = arith.constant 2 : i32
      %110 = arith.addi %21, %c2_i32_43 : i32
      %c5_i32_44 = arith.constant 5 : i32
      %111 = arith.muli %110, %c5_i32_44 : i32
      %c1_i32_45 = arith.constant 1 : i32
      %112 = arith.addi %111, %c1_i32_45 : i32
      %113 = arith.index_cast %112 : i32 to index
      %114 = memref.load %arg4[%113] : memref<80xf32, #tpu.memory_space<smem>>
      %cst_46 = arith.constant 2.500000e-01 : f32
      %115 = arith.mulf %114, %cst_46 : f32
      %c2_i32_47 = arith.constant 2 : i32
      %116 = arith.addi %111, %c2_i32_47 : i32
      %117 = arith.index_cast %116 : i32 to index
      %118 = memref.load %arg4[%117] : memref<80xf32, #tpu.memory_space<smem>>
      %cst_48 = arith.constant 2.500000e-01 : f32
      %119 = arith.mulf %118, %cst_48 : f32
      %c3_i32_49 = arith.constant 3 : i32
      %120 = arith.addi %111, %c3_i32_49 : i32
      %121 = arith.index_cast %120 : i32 to index
      %122 = memref.load %arg4[%121] : memref<80xf32, #tpu.memory_space<smem>>
      %cst_50 = arith.constant 2.500000e-01 : f32
      %123 = arith.mulf %122, %cst_50 : f32
      %c4_i32_51 = arith.constant 4 : i32
      %124 = arith.addi %111, %c4_i32_51 : i32
      %125 = arith.index_cast %124 : i32 to index
      %126 = memref.load %arg4[%125] : memref<80xf32, #tpu.memory_space<smem>>
      %cst_52 = arith.constant 2.500000e-01 : f32
      %127 = arith.mulf %126, %cst_52 : f32
      %128 = arith.subf %123, %115 : f32
      %cst_53 = arith.constant 1.000000e+00 : f32
      %129 = arith.maximumf %128, %cst_53 : f32
      %cst_54 = arith.constant 0.142857149 : f32
      %130 = arith.mulf %129, %cst_54 : f32
      %131 = arith.subf %127, %119 : f32
      %cst_55 = arith.constant 1.000000e+00 : f32
      %132 = arith.maximumf %131, %cst_55 : f32
      %cst_56 = arith.constant 0.142857149 : f32
      %133 = arith.mulf %132, %cst_56 : f32
      %cst_57 = arith.constant 2.000000e+00 : f32
      %134 = vector.broadcast %cst_57 : f32 to vector<1x392xf32>
      %135 = arith.cmpf oeq, %22, %134 : vector<1x392xf32>
      %cst_58 = arith.constant 0.000000e+00 : f32
      %136 = vector.broadcast %119 : f32 to vector<1x392xf32>
      %137 = vector.broadcast %cst_58 : f32 to vector<1x392xf32>
      %138 = arith.select %135, %136, %137 : vector<1x392xi1>, vector<1x392xf32>
      %139 = arith.addf %97, %138 : vector<1x392xf32>
      %cst_59 = arith.constant 0.000000e+00 : f32
      %140 = vector.broadcast %115 : f32 to vector<1x392xf32>
      %141 = vector.broadcast %cst_59 : f32 to vector<1x392xf32>
      %142 = arith.select %135, %140, %141 : vector<1x392xi1>, vector<1x392xf32>
      %143 = arith.addf %101, %142 : vector<1x392xf32>
      %cst_60 = arith.constant 0.000000e+00 : f32
      %144 = vector.broadcast %133 : f32 to vector<1x392xf32>
      %145 = vector.broadcast %cst_60 : f32 to vector<1x392xf32>
      %146 = arith.select %135, %144, %145 : vector<1x392xi1>, vector<1x392xf32>
      %147 = arith.addf %105, %146 : vector<1x392xf32>
      %cst_61 = arith.constant 0.000000e+00 : f32
      %148 = vector.broadcast %130 : f32 to vector<1x392xf32>
      %149 = vector.broadcast %cst_61 : f32 to vector<1x392xf32>
      %150 = arith.select %135, %148, %149 : vector<1x392xi1>, vector<1x392xf32>
      %151 = arith.addf %109, %150 : vector<1x392xf32>
      %c3_i32_62 = arith.constant 3 : i32
      %152 = arith.addi %21, %c3_i32_62 : i32
      %c5_i32_63 = arith.constant 5 : i32
      %153 = arith.muli %152, %c5_i32_63 : i32
      %c1_i32_64 = arith.constant 1 : i32
      %154 = arith.addi %153, %c1_i32_64 : i32
      %155 = arith.index_cast %154 : i32 to index
      %156 = memref.load %arg4[%155] : memref<80xf32, #tpu.memory_space<smem>>
      %cst_65 = arith.constant 2.500000e-01 : f32
      %157 = arith.mulf %156, %cst_65 : f32
      %c2_i32_66 = arith.constant 2 : i32
      %158 = arith.addi %153, %c2_i32_66 : i32
      %159 = arith.index_cast %158 : i32 to index
      %160 = memref.load %arg4[%159] : memref<80xf32, #tpu.memory_space<smem>>
      %cst_67 = arith.constant 2.500000e-01 : f32
      %161 = arith.mulf %160, %cst_67 : f32
      %c3_i32_68 = arith.constant 3 : i32
      %162 = arith.addi %153, %c3_i32_68 : i32
      %163 = arith.index_cast %162 : i32 to index
      %164 = memref.load %arg4[%163] : memref<80xf32, #tpu.memory_space<smem>>
      %cst_69 = arith.constant 2.500000e-01 : f32
      %165 = arith.mulf %164, %cst_69 : f32
      %c4_i32_70 = arith.constant 4 : i32
      %166 = arith.addi %153, %c4_i32_70 : i32
      %167 = arith.index_cast %166 : i32 to index
      %168 = memref.load %arg4[%167] : memref<80xf32, #tpu.memory_space<smem>>
      %cst_71 = arith.constant 2.500000e-01 : f32
      %169 = arith.mulf %168, %cst_71 : f32
      %170 = arith.subf %165, %157 : f32
      %cst_72 = arith.constant 1.000000e+00 : f32
      %171 = arith.maximumf %170, %cst_72 : f32
      %cst_73 = arith.constant 0.142857149 : f32
      %172 = arith.mulf %171, %cst_73 : f32
      %173 = arith.subf %169, %161 : f32
      %cst_74 = arith.constant 1.000000e+00 : f32
      %174 = arith.maximumf %173, %cst_74 : f32
      %cst_75 = arith.constant 0.142857149 : f32
      %175 = arith.mulf %174, %cst_75 : f32
      %cst_76 = arith.constant 3.000000e+00 : f32
      %176 = vector.broadcast %cst_76 : f32 to vector<1x392xf32>
      %177 = arith.cmpf oeq, %22, %176 : vector<1x392xf32>
      %cst_77 = arith.constant 0.000000e+00 : f32
      %178 = vector.broadcast %161 : f32 to vector<1x392xf32>
      %179 = vector.broadcast %cst_77 : f32 to vector<1x392xf32>
      %180 = arith.select %177, %178, %179 : vector<1x392xi1>, vector<1x392xf32>
      %181 = arith.addf %139, %180 : vector<1x392xf32>
      %cst_78 = arith.constant 0.000000e+00 : f32
      %182 = vector.broadcast %157 : f32 to vector<1x392xf32>
      %183 = vector.broadcast %cst_78 : f32 to vector<1x392xf32>
      %184 = arith.select %177, %182, %183 : vector<1x392xi1>, vector<1x392xf32>
      %185 = arith.addf %143, %184 : vector<1x392xf32>
      %cst_79 = arith.constant 0.000000e+00 : f32
      %186 = vector.broadcast %175 : f32 to vector<1x392xf32>
      %187 = vector.broadcast %cst_79 : f32 to vector<1x392xf32>
      %188 = arith.select %177, %186, %187 : vector<1x392xi1>, vector<1x392xf32>
      %189 = arith.addf %147, %188 : vector<1x392xf32>
      %cst_80 = arith.constant 0.000000e+00 : f32
      %190 = vector.broadcast %172 : f32 to vector<1x392xf32>
      %191 = vector.broadcast %cst_80 : f32 to vector<1x392xf32>
      %192 = arith.select %177, %190, %191 : vector<1x392xi1>, vector<1x392xf32>
      %193 = arith.addf %151, %192 : vector<1x392xf32>
      %c4_i32_81 = arith.constant 4 : i32
      %194 = arith.addi %21, %c4_i32_81 : i32
      %c5_i32_82 = arith.constant 5 : i32
      %195 = arith.muli %194, %c5_i32_82 : i32
      %c1_i32_83 = arith.constant 1 : i32
      %196 = arith.addi %195, %c1_i32_83 : i32
      %197 = arith.index_cast %196 : i32 to index
      %198 = memref.load %arg4[%197] : memref<80xf32, #tpu.memory_space<smem>>
      %cst_84 = arith.constant 2.500000e-01 : f32
      %199 = arith.mulf %198, %cst_84 : f32
      %c2_i32_85 = arith.constant 2 : i32
      %200 = arith.addi %195, %c2_i32_85 : i32
      %201 = arith.index_cast %200 : i32 to index
      %202 = memref.load %arg4[%201] : memref<80xf32, #tpu.memory_space<smem>>
      %cst_86 = arith.constant 2.500000e-01 : f32
      %203 = arith.mulf %202, %cst_86 : f32
      %c3_i32_87 = arith.constant 3 : i32
      %204 = arith.addi %195, %c3_i32_87 : i32
      %205 = arith.index_cast %204 : i32 to index
      %206 = memref.load %arg4[%205] : memref<80xf32, #tpu.memory_space<smem>>
      %cst_88 = arith.constant 2.500000e-01 : f32
      %207 = arith.mulf %206, %cst_88 : f32
      %c4_i32_89 = arith.constant 4 : i32
      %208 = arith.addi %195, %c4_i32_89 : i32
      %209 = arith.index_cast %208 : i32 to index
      %210 = memref.load %arg4[%209] : memref<80xf32, #tpu.memory_space<smem>>
      %cst_90 = arith.constant 2.500000e-01 : f32
      %211 = arith.mulf %210, %cst_90 : f32
      %212 = arith.subf %207, %199 : f32
      %cst_91 = arith.constant 1.000000e+00 : f32
      %213 = arith.maximumf %212, %cst_91 : f32
      %cst_92 = arith.constant 0.142857149 : f32
      %214 = arith.mulf %213, %cst_92 : f32
      %215 = arith.subf %211, %203 : f32
      %cst_93 = arith.constant 1.000000e+00 : f32
      %216 = arith.maximumf %215, %cst_93 : f32
      %cst_94 = arith.constant 0.142857149 : f32
      %217 = arith.mulf %216, %cst_94 : f32
      %cst_95 = arith.constant 4.000000e+00 : f32
      %218 = vector.broadcast %cst_95 : f32 to vector<1x392xf32>
      %219 = arith.cmpf oeq, %22, %218 : vector<1x392xf32>
      %cst_96 = arith.constant 0.000000e+00 : f32
      %220 = vector.broadcast %203 : f32 to vector<1x392xf32>
      %221 = vector.broadcast %cst_96 : f32 to vector<1x392xf32>
      %222 = arith.select %219, %220, %221 : vector<1x392xi1>, vector<1x392xf32>
      %223 = arith.addf %181, %222 : vector<1x392xf32>
      %cst_97 = arith.constant 0.000000e+00 : f32
      %224 = vector.broadcast %199 : f32 to vector<1x392xf32>
      %225 = vector.broadcast %cst_97 : f32 to vector<1x392xf32>
      %226 = arith.select %219, %224, %225 : vector<1x392xi1>, vector<1x392xf32>
      %227 = arith.addf %185, %226 : vector<1x392xf32>
      %cst_98 = arith.constant 0.000000e+00 : f32
      %228 = vector.broadcast %217 : f32 to vector<1x392xf32>
      %229 = vector.broadcast %cst_98 : f32 to vector<1x392xf32>
      %230 = arith.select %219, %228, %229 : vector<1x392xi1>, vector<1x392xf32>
      %231 = arith.addf %189, %230 : vector<1x392xf32>
      %cst_99 = arith.constant 0.000000e+00 : f32
      %232 = vector.broadcast %214 : f32 to vector<1x392xf32>
      %233 = vector.broadcast %cst_99 : f32 to vector<1x392xf32>
      %234 = arith.select %219, %232, %233 : vector<1x392xi1>, vector<1x392xf32>
      %235 = arith.addf %193, %234 : vector<1x392xf32>
      %c5_i32_100 = arith.constant 5 : i32
      %236 = arith.addi %21, %c5_i32_100 : i32
      %c5_i32_101 = arith.constant 5 : i32
      %237 = arith.muli %236, %c5_i32_101 : i32
      %c1_i32_102 = arith.constant 1 : i32
      %238 = arith.addi %237, %c1_i32_102 : i32
      %239 = arith.index_cast %238 : i32 to index
      %240 = memref.load %arg4[%239] : memref<80xf32, #tpu.memory_space<smem>>
      %cst_103 = arith.constant 2.500000e-01 : f32
      %241 = arith.mulf %240, %cst_103 : f32
      %c2_i32_104 = arith.constant 2 : i32
      %242 = arith.addi %237, %c2_i32_104 : i32
      %243 = arith.index_cast %242 : i32 to index
      %244 = memref.load %arg4[%243] : memref<80xf32, #tpu.memory_space<smem>>
      %cst_105 = arith.constant 2.500000e-01 : f32
      %245 = arith.mulf %244, %cst_105 : f32
      %c3_i32_106 = arith.constant 3 : i32
      %246 = arith.addi %237, %c3_i32_106 : i32
      %247 = arith.index_cast %246 : i32 to index
      %248 = memref.load %arg4[%247] : memref<80xf32, #tpu.memory_space<smem>>
      %cst_107 = arith.constant 2.500000e-01 : f32
      %249 = arith.mulf %248, %cst_107 : f32
      %c4_i32_108 = arith.constant 4 : i32
      %250 = arith.addi %237, %c4_i32_108 : i32
      %251 = arith.index_cast %250 : i32 to index
      %252 = memref.load %arg4[%251] : memref<80xf32, #tpu.memory_space<smem>>
      %cst_109 = arith.constant 2.500000e-01 : f32
      %253 = arith.mulf %252, %cst_109 : f32
      %254 = arith.subf %249, %241 : f32
      %cst_110 = arith.constant 1.000000e+00 : f32
      %255 = arith.maximumf %254, %cst_110 : f32
      %cst_111 = arith.constant 0.142857149 : f32
      %256 = arith.mulf %255, %cst_111 : f32
      %257 = arith.subf %253, %245 : f32
      %cst_112 = arith.constant 1.000000e+00 : f32
      %258 = arith.maximumf %257, %cst_112 : f32
      %cst_113 = arith.constant 0.142857149 : f32
      %259 = arith.mulf %258, %cst_113 : f32
      %cst_114 = arith.constant 5.000000e+00 : f32
      %260 = vector.broadcast %cst_114 : f32 to vector<1x392xf32>
      %261 = arith.cmpf oeq, %22, %260 : vector<1x392xf32>
      %cst_115 = arith.constant 0.000000e+00 : f32
      %262 = vector.broadcast %245 : f32 to vector<1x392xf32>
      %263 = vector.broadcast %cst_115 : f32 to vector<1x392xf32>
      %264 = arith.select %261, %262, %263 : vector<1x392xi1>, vector<1x392xf32>
      %265 = arith.addf %223, %264 : vector<1x392xf32>
      %cst_116 = arith.constant 0.000000e+00 : f32
      %266 = vector.broadcast %241 : f32 to vector<1x392xf32>
      %267 = vector.broadcast %cst_116 : f32 to vector<1x392xf32>
      %268 = arith.select %261, %266, %267 : vector<1x392xi1>, vector<1x392xf32>
      %269 = arith.addf %227, %268 : vector<1x392xf32>
      %cst_117 = arith.constant 0.000000e+00 : f32
      %270 = vector.broadcast %259 : f32 to vector<1x392xf32>
      %271 = vector.broadcast %cst_117 : f32 to vector<1x392xf32>
      %272 = arith.select %261, %270, %271 : vector<1x392xi1>, vector<1x392xf32>
      %273 = arith.addf %231, %272 : vector<1x392xf32>
      %cst_118 = arith.constant 0.000000e+00 : f32
      %274 = vector.broadcast %256 : f32 to vector<1x392xf32>
      %275 = vector.broadcast %cst_118 : f32 to vector<1x392xf32>
      %276 = arith.select %261, %274, %275 : vector<1x392xi1>, vector<1x392xf32>
      %277 = arith.addf %235, %276 : vector<1x392xf32>
      %c6_i32 = arith.constant 6 : i32
      %278 = arith.addi %21, %c6_i32 : i32
      %c5_i32_119 = arith.constant 5 : i32
      %279 = arith.muli %278, %c5_i32_119 : i32
      %c1_i32_120 = arith.constant 1 : i32
      %280 = arith.addi %279, %c1_i32_120 : i32
      %281 = arith.index_cast %280 : i32 to index
      %282 = memref.load %arg4[%281] : memref<80xf32, #tpu.memory_space<smem>>
      %cst_121 = arith.constant 2.500000e-01 : f32
      %283 = arith.mulf %282, %cst_121 : f32
      %c2_i32_122 = arith.constant 2 : i32
      %284 = arith.addi %279, %c2_i32_122 : i32
      %285 = arith.index_cast %284 : i32 to index
      %286 = memref.load %arg4[%285] : memref<80xf32, #tpu.memory_space<smem>>
      %cst_123 = arith.constant 2.500000e-01 : f32
      %287 = arith.mulf %286, %cst_123 : f32
      %c3_i32_124 = arith.constant 3 : i32
      %288 = arith.addi %279, %c3_i32_124 : i32
      %289 = arith.index_cast %288 : i32 to index
      %290 = memref.load %arg4[%289] : memref<80xf32, #tpu.memory_space<smem>>
      %cst_125 = arith.constant 2.500000e-01 : f32
      %291 = arith.mulf %290, %cst_125 : f32
      %c4_i32_126 = arith.constant 4 : i32
      %292 = arith.addi %279, %c4_i32_126 : i32
      %293 = arith.index_cast %292 : i32 to index
      %294 = memref.load %arg4[%293] : memref<80xf32, #tpu.memory_space<smem>>
      %cst_127 = arith.constant 2.500000e-01 : f32
      %295 = arith.mulf %294, %cst_127 : f32
      %296 = arith.subf %291, %283 : f32
      %cst_128 = arith.constant 1.000000e+00 : f32
      %297 = arith.maximumf %296, %cst_128 : f32
      %cst_129 = arith.constant 0.142857149 : f32
      %298 = arith.mulf %297, %cst_129 : f32
      %299 = arith.subf %295, %287 : f32
      %cst_130 = arith.constant 1.000000e+00 : f32
      %300 = arith.maximumf %299, %cst_130 : f32
      %cst_131 = arith.constant 0.142857149 : f32
      %301 = arith.mulf %300, %cst_131 : f32
      %cst_132 = arith.constant 6.000000e+00 : f32
      %302 = vector.broadcast %cst_132 : f32 to vector<1x392xf32>
      %303 = arith.cmpf oeq, %22, %302 : vector<1x392xf32>
      %cst_133 = arith.constant 0.000000e+00 : f32
      %304 = vector.broadcast %287 : f32 to vector<1x392xf32>
      %305 = vector.broadcast %cst_133 : f32 to vector<1x392xf32>
      %306 = arith.select %303, %304, %305 : vector<1x392xi1>, vector<1x392xf32>
      %307 = arith.addf %265, %306 : vector<1x392xf32>
      %cst_134 = arith.constant 0.000000e+00 : f32
      %308 = vector.broadcast %283 : f32 to vector<1x392xf32>
      %309 = vector.broadcast %cst_134 : f32 to vector<1x392xf32>
      %310 = arith.select %303, %308, %309 : vector<1x392xi1>, vector<1x392xf32>
      %311 = arith.addf %269, %310 : vector<1x392xf32>
      %cst_135 = arith.constant 0.000000e+00 : f32
      %312 = vector.broadcast %301 : f32 to vector<1x392xf32>
      %313 = vector.broadcast %cst_135 : f32 to vector<1x392xf32>
      %314 = arith.select %303, %312, %313 : vector<1x392xi1>, vector<1x392xf32>
      %315 = arith.addf %273, %314 : vector<1x392xf32>
      %cst_136 = arith.constant 0.000000e+00 : f32
      %316 = vector.broadcast %298 : f32 to vector<1x392xf32>
      %317 = vector.broadcast %cst_136 : f32 to vector<1x392xf32>
      %318 = arith.select %303, %316, %317 : vector<1x392xi1>, vector<1x392xf32>
      %319 = arith.addf %277, %318 : vector<1x392xf32>
      %c7_i32 = arith.constant 7 : i32
      %320 = arith.addi %21, %c7_i32 : i32
      %c5_i32_137 = arith.constant 5 : i32
      %321 = arith.muli %320, %c5_i32_137 : i32
      %c1_i32_138 = arith.constant 1 : i32
      %322 = arith.addi %321, %c1_i32_138 : i32
      %323 = arith.index_cast %322 : i32 to index
      %324 = memref.load %arg4[%323] : memref<80xf32, #tpu.memory_space<smem>>
      %cst_139 = arith.constant 2.500000e-01 : f32
      %325 = arith.mulf %324, %cst_139 : f32
      %c2_i32_140 = arith.constant 2 : i32
      %326 = arith.addi %321, %c2_i32_140 : i32
      %327 = arith.index_cast %326 : i32 to index
      %328 = memref.load %arg4[%327] : memref<80xf32, #tpu.memory_space<smem>>
      %cst_141 = arith.constant 2.500000e-01 : f32
      %329 = arith.mulf %328, %cst_141 : f32
      %c3_i32_142 = arith.constant 3 : i32
      %330 = arith.addi %321, %c3_i32_142 : i32
      %331 = arith.index_cast %330 : i32 to index
      %332 = memref.load %arg4[%331] : memref<80xf32, #tpu.memory_space<smem>>
      %cst_143 = arith.constant 2.500000e-01 : f32
      %333 = arith.mulf %332, %cst_143 : f32
      %c4_i32_144 = arith.constant 4 : i32
      %334 = arith.addi %321, %c4_i32_144 : i32
      %335 = arith.index_cast %334 : i32 to index
      %336 = memref.load %arg4[%335] : memref<80xf32, #tpu.memory_space<smem>>
      %cst_145 = arith.constant 2.500000e-01 : f32
      %337 = arith.mulf %336, %cst_145 : f32
      %338 = arith.subf %333, %325 : f32
      %cst_146 = arith.constant 1.000000e+00 : f32
      %339 = arith.maximumf %338, %cst_146 : f32
      %cst_147 = arith.constant 0.142857149 : f32
      %340 = arith.mulf %339, %cst_147 : f32
      %341 = arith.subf %337, %329 : f32
      %cst_148 = arith.constant 1.000000e+00 : f32
      %342 = arith.maximumf %341, %cst_148 : f32
      %cst_149 = arith.constant 0.142857149 : f32
      %343 = arith.mulf %342, %cst_149 : f32
      %cst_150 = arith.constant 7.000000e+00 : f32
      %344 = vector.broadcast %cst_150 : f32 to vector<1x392xf32>
      %345 = arith.cmpf oeq, %22, %344 : vector<1x392xf32>
      %cst_151 = arith.constant 0.000000e+00 : f32
      %346 = vector.broadcast %329 : f32 to vector<1x392xf32>
      %347 = vector.broadcast %cst_151 : f32 to vector<1x392xf32>
      %348 = arith.select %345, %346, %347 : vector<1x392xi1>, vector<1x392xf32>
      %349 = arith.addf %307, %348 : vector<1x392xf32>
      %cst_152 = arith.constant 0.000000e+00 : f32
      %350 = vector.broadcast %325 : f32 to vector<1x392xf32>
      %351 = vector.broadcast %cst_152 : f32 to vector<1x392xf32>
      %352 = arith.select %345, %350, %351 : vector<1x392xi1>, vector<1x392xf32>
      %353 = arith.addf %311, %352 : vector<1x392xf32>
      %cst_153 = arith.constant 0.000000e+00 : f32
      %354 = vector.broadcast %343 : f32 to vector<1x392xf32>
      %355 = vector.broadcast %cst_153 : f32 to vector<1x392xf32>
      %356 = arith.select %345, %354, %355 : vector<1x392xi1>, vector<1x392xf32>
      %357 = arith.addf %315, %356 : vector<1x392xf32>
      %cst_154 = arith.constant 0.000000e+00 : f32
      %358 = vector.broadcast %340 : f32 to vector<1x392xf32>
      %359 = vector.broadcast %cst_154 : f32 to vector<1x392xf32>
      %360 = arith.select %345, %358, %359 : vector<1x392xi1>, vector<1x392xf32>
      %361 = arith.addf %319, %360 : vector<1x392xf32>
      %362 = arith.mulf %23, %357 : vector<1x392xf32>
      %363 = arith.addf %349, %362 : vector<1x392xf32>
      %364 = arith.mulf %24, %361 : vector<1x392xf32>
      %365 = arith.addf %353, %364 : vector<1x392xf32>
      %366 = tpu.iota {dimensions = array<i32: 0>} : vector<16x1xi32>
      %367 = vector.broadcast %5 : i32 to vector<16x1xi32>
      %368 = arith.addi %366, %367 : vector<16x1xi32>
      %369 = arith.sitofp %368 : vector<16x1xi32> to vector<16x1xf32>
      %370 = tpu.iota {dimensions = array<i32: 0>} : vector<16x1xi32>
      %371 = arith.sitofp %370 : vector<16x1xi32> to vector<16x1xf32>
      %cst_155 = arith.constant 0.000000e+00 : f32
      %372 = vector.broadcast %cst_155 : f32 to vector<16x392xf32>
      %cst_156 = arith.constant 0.000000e+00 : f32
      %373 = vector.broadcast %cst_156 : f32 to vector<16x392xf32>
      %cst_157 = arith.constant 2.500000e-01 : f32
      %374 = vector.broadcast %cst_157 : f32 to vector<1x392xf32>
      %375 = arith.mulf %374, %357 : vector<1x392xf32>
      %376 = arith.addf %363, %375 : vector<1x392xf32>
      %cst_158 = arith.constant -1.000000e+00 : f32
      %377 = vector.broadcast %cst_158 : f32 to vector<1x392xf32>
      %378 = arith.cmpf oge, %376, %377 : vector<1x392xf32>
      %cst_159 = arith.constant 1.600000e+01 : f32
      %379 = vector.broadcast %cst_159 : f32 to vector<1x392xf32>
      %380 = arith.cmpf ole, %376, %379 : vector<1x392xf32>
      %381 = arith.andi %378, %380 : vector<1x392xi1>
      %cst_160 = arith.constant 0.000000e+00 : f32
      %cst_161 = arith.constant 1.500000e+01 : f32
      %382 = vector.broadcast %cst_160 : f32 to vector<1x392xf32>
      %383 = arith.maximumf %382, %376 : vector<1x392xf32>
      %384 = vector.broadcast %cst_161 : f32 to vector<1x392xf32>
      %385 = arith.minimumf %384, %383 : vector<1x392xf32>
      %386 = vector.broadcast %385 : vector<1x392xf32> to vector<16x392xf32>
      %387 = vector.broadcast %369 : vector<16x1xf32> to vector<16x392xf32>
      %388 = arith.subf %386, %387 : vector<16x392xf32>
      %389 = math.absf %388 : vector<16x392xf32>
      %cst_162 = arith.constant 1.000000e+00 : f32
      %390 = vector.broadcast %cst_162 : f32 to vector<16x392xf32>
      %391 = arith.subf %390, %389 : vector<16x392xf32>
      %cst_163 = arith.constant 0.000000e+00 : f32
      %392 = vector.broadcast %cst_163 : f32 to vector<16x392xf32>
      %393 = arith.maximumf %392, %391 : vector<16x392xf32>
      %cst_164 = arith.constant 0.000000e+00 : f32
      %394 = vector.shape_cast %381 : vector<1x392xi1> to vector<1x392xi1>
      %395 = vector.broadcast %394 : vector<1x392xi1> to vector<16x392xi1>
      %396 = vector.broadcast %cst_164 : f32 to vector<16x392xf32>
      %397 = arith.select %395, %393, %396 : vector<16x392xi1>, vector<16x392xf32>
      %398 = arith.addf %372, %397 : vector<16x392xf32>
      %cst_165 = arith.constant 2.500000e-01 : f32
      %399 = vector.broadcast %cst_165 : f32 to vector<1x392xf32>
      %400 = arith.mulf %399, %361 : vector<1x392xf32>
      %401 = arith.addf %365, %400 : vector<1x392xf32>
      %cst_166 = arith.constant -1.000000e+00 : f32
      %402 = vector.broadcast %cst_166 : f32 to vector<1x392xf32>
      %403 = arith.cmpf oge, %401, %402 : vector<1x392xf32>
      %cst_167 = arith.constant 1.600000e+01 : f32
      %404 = vector.broadcast %cst_167 : f32 to vector<1x392xf32>
      %405 = arith.cmpf ole, %401, %404 : vector<1x392xf32>
      %406 = arith.andi %403, %405 : vector<1x392xi1>
      %cst_168 = arith.constant 0.000000e+00 : f32
      %cst_169 = arith.constant 1.500000e+01 : f32
      %407 = vector.broadcast %cst_168 : f32 to vector<1x392xf32>
      %408 = arith.maximumf %407, %401 : vector<1x392xf32>
      %409 = vector.broadcast %cst_169 : f32 to vector<1x392xf32>
      %410 = arith.minimumf %409, %408 : vector<1x392xf32>
      %411 = vector.broadcast %410 : vector<1x392xf32> to vector<16x392xf32>
      %412 = vector.broadcast %371 : vector<16x1xf32> to vector<16x392xf32>
      %413 = arith.subf %411, %412 : vector<16x392xf32>
      %414 = math.absf %413 : vector<16x392xf32>
      %cst_170 = arith.constant 1.000000e+00 : f32
      %415 = vector.broadcast %cst_170 : f32 to vector<16x392xf32>
      %416 = arith.subf %415, %414 : vector<16x392xf32>
      %cst_171 = arith.constant 0.000000e+00 : f32
      %417 = vector.broadcast %cst_171 : f32 to vector<16x392xf32>
      %418 = arith.maximumf %417, %416 : vector<16x392xf32>
      %cst_172 = arith.constant 0.000000e+00 : f32
      %419 = vector.shape_cast %406 : vector<1x392xi1> to vector<1x392xi1>
      %420 = vector.broadcast %419 : vector<1x392xi1> to vector<16x392xi1>
      %421 = vector.broadcast %cst_172 : f32 to vector<16x392xf32>
      %422 = arith.select %420, %418, %421 : vector<16x392xi1>, vector<16x392xf32>
      %423 = arith.addf %373, %422 : vector<16x392xf32>
      %cst_173 = arith.constant 7.500000e-01 : f32
      %424 = vector.broadcast %cst_173 : f32 to vector<1x392xf32>
      %425 = arith.mulf %424, %357 : vector<1x392xf32>
      %426 = arith.addf %363, %425 : vector<1x392xf32>
      %cst_174 = arith.constant -1.000000e+00 : f32
      %427 = vector.broadcast %cst_174 : f32 to vector<1x392xf32>
      %428 = arith.cmpf oge, %426, %427 : vector<1x392xf32>
      %cst_175 = arith.constant 1.600000e+01 : f32
      %429 = vector.broadcast %cst_175 : f32 to vector<1x392xf32>
      %430 = arith.cmpf ole, %426, %429 : vector<1x392xf32>
      %431 = arith.andi %428, %430 : vector<1x392xi1>
      %cst_176 = arith.constant 0.000000e+00 : f32
      %cst_177 = arith.constant 1.500000e+01 : f32
      %432 = vector.broadcast %cst_176 : f32 to vector<1x392xf32>
      %433 = arith.maximumf %432, %426 : vector<1x392xf32>
      %434 = vector.broadcast %cst_177 : f32 to vector<1x392xf32>
      %435 = arith.minimumf %434, %433 : vector<1x392xf32>
      %436 = vector.broadcast %435 : vector<1x392xf32> to vector<16x392xf32>
      %437 = vector.broadcast %369 : vector<16x1xf32> to vector<16x392xf32>
      %438 = arith.subf %436, %437 : vector<16x392xf32>
      %439 = math.absf %438 : vector<16x392xf32>
      %cst_178 = arith.constant 1.000000e+00 : f32
      %440 = vector.broadcast %cst_178 : f32 to vector<16x392xf32>
      %441 = arith.subf %440, %439 : vector<16x392xf32>
      %cst_179 = arith.constant 0.000000e+00 : f32
      %442 = vector.broadcast %cst_179 : f32 to vector<16x392xf32>
      %443 = arith.maximumf %442, %441 : vector<16x392xf32>
      %cst_180 = arith.constant 0.000000e+00 : f32
      %444 = vector.shape_cast %431 : vector<1x392xi1> to vector<1x392xi1>
      %445 = vector.broadcast %444 : vector<1x392xi1> to vector<16x392xi1>
      %446 = vector.broadcast %cst_180 : f32 to vector<16x392xf32>
      %447 = arith.select %445, %443, %446 : vector<16x392xi1>, vector<16x392xf32>
      %448 = arith.addf %398, %447 : vector<16x392xf32>
      %cst_181 = arith.constant 7.500000e-01 : f32
      %449 = vector.broadcast %cst_181 : f32 to vector<1x392xf32>
      %450 = arith.mulf %449, %361 : vector<1x392xf32>
      %451 = arith.addf %365, %450 : vector<1x392xf32>
      %cst_182 = arith.constant -1.000000e+00 : f32
      %452 = vector.broadcast %cst_182 : f32 to vector<1x392xf32>
      %453 = arith.cmpf oge, %451, %452 : vector<1x392xf32>
      %cst_183 = arith.constant 1.600000e+01 : f32
      %454 = vector.broadcast %cst_183 : f32 to vector<1x392xf32>
      %455 = arith.cmpf ole, %451, %454 : vector<1x392xf32>
      %456 = arith.andi %453, %455 : vector<1x392xi1>
      %cst_184 = arith.constant 0.000000e+00 : f32
      %cst_185 = arith.constant 1.500000e+01 : f32
      %457 = vector.broadcast %cst_184 : f32 to vector<1x392xf32>
      %458 = arith.maximumf %457, %451 : vector<1x392xf32>
      %459 = vector.broadcast %cst_185 : f32 to vector<1x392xf32>
      %460 = arith.minimumf %459, %458 : vector<1x392xf32>
      %461 = vector.broadcast %460 : vector<1x392xf32> to vector<16x392xf32>
      %462 = vector.broadcast %371 : vector<16x1xf32> to vector<16x392xf32>
      %463 = arith.subf %461, %462 : vector<16x392xf32>
      %464 = math.absf %463 : vector<16x392xf32>
      %cst_186 = arith.constant 1.000000e+00 : f32
      %465 = vector.broadcast %cst_186 : f32 to vector<16x392xf32>
      %466 = arith.subf %465, %464 : vector<16x392xf32>
      %cst_187 = arith.constant 0.000000e+00 : f32
      %467 = vector.broadcast %cst_187 : f32 to vector<16x392xf32>
      %468 = arith.maximumf %467, %466 : vector<16x392xf32>
      %cst_188 = arith.constant 0.000000e+00 : f32
      %469 = vector.shape_cast %456 : vector<1x392xi1> to vector<1x392xi1>
      %470 = vector.broadcast %469 : vector<1x392xi1> to vector<16x392xi1>
      %471 = vector.broadcast %cst_188 : f32 to vector<16x392xf32>
      %472 = arith.select %470, %468, %471 : vector<16x392xi1>, vector<16x392xf32>
      %473 = arith.addf %423, %472 : vector<16x392xf32>
      %cst_189 = arith.constant 2.500000e-01 : f32
      %474 = vector.broadcast %cst_189 : f32 to vector<16x392xf32>
      %475 = arith.mulf %448, %474 : vector<16x392xf32>
      %476 = arith.truncf %475 : vector<16x392xf32> to vector<16x392xbf16>
      %477 = arith.truncf %473 : vector<16x392xf32> to vector<16x392xbf16>
      %478 = vector.shape_cast %476 : vector<16x392xbf16> to vector<16x1x392xbf16>
      %479 = vector.shape_cast %477 : vector<16x392xbf16> to vector<1x16x392xbf16>
      %480 = vector.broadcast %478 : vector<16x1x392xbf16> to vector<16x16x392xbf16>
      %481 = vector.broadcast %479 : vector<1x16x392xbf16> to vector<16x16x392xbf16>
      %482 = arith.mulf %480, %481 : vector<16x16x392xbf16>
      %483 = vector.shape_cast %482 : vector<16x16x392xbf16> to vector<256x392xbf16>
      %c0_190 = arith.constant 0 : index
      %c0_191 = arith.constant 0 : index
      %c0_192 = arith.constant 0 : index
      %484 = vector.load %arg8[%c0_190, %c0_191, %c0_192] : memref<1x256x128xbf16, #tpu.memory_space<vmem>>, vector<1x256x128xbf16>
      %485 = vector.shape_cast %484 : vector<1x256x128xbf16> to vector<256x128xbf16>
      %c0_193 = arith.constant 0 : index
      %c0_194 = arith.constant 0 : index
      %486 = vector.load %arg10[%c0_193, %c0_194] : memref<392x128xf32, #tpu.memory_space<vmem>>, vector<392x128xf32>
      %cst_195 = arith.constant dense<0.000000e+00> : vector<392x128xf32>
      %487 = tpu.matmul %483, %485, %cst_195 {dimension_numbers = #tpu.dot_dimension_numbers<[0], [0], [1], [1], [0, 1, 1, 1], [], []>} : vector<256x392xbf16>, vector<256x128xbf16>, vector<392x128xf32> -> vector<392x128xf32>
      %488 = arith.addf %486, %487 : vector<392x128xf32>
      %c0_196 = arith.constant 0 : index
      %c0_197 = arith.constant 0 : index
      %489 = vector.load %arg10[%c0_196, %c0_197] : memref<392x128xf32, #tpu.memory_space<vmem>>, vector<392x128xf32>
      tpu.vector_store %arg10[%c0_196, %c0_197], %488 {strides = array<i32>} : memref<392x128xf32, #tpu.memory_space<vmem>>, vector<392x128xf32>,
    } else {
    }
    %c0_i32_3 = arith.constant 0 : i32
    %16 = arith.cmpi eq, %arg3, %c0_i32_3 : i32
    %17 = arith.extui %16 : i1 to i32
    %c0_i32_4 = arith.constant 0 : i32
    %18 = arith.cmpi ne, %17, %c0_i32_4 : i32
    scf.if %18 {
      %c0 = arith.constant 0 : index
      %c0_5 = arith.constant 0 : index
      %19 = vector.load %arg10[%c0, %c0_5] : memref<392x128xf32, #tpu.memory_space<vmem>>, vector<392x128xf32>
      %c0_6 = arith.constant 0 : index
      %c0_7 = arith.constant 0 : index
      %20 = vector.load %arg9[%c0_6, %c0_7] : memref<392x128xf32, #tpu.memory_space<vmem>>, vector<392x128xf32>
      tpu.vector_store %arg9[%c0_6, %c0_7], %19 {strides = array<i32>} : memref<392x128xf32, #tpu.memory_space<vmem>>, vector<392x128xf32>,
    } else {
    }
    return
  }
  func.func @transform_0(%arg0: i32, %arg1: i32, %arg2: i32, %arg3: i32) -> i32 {
    %c0_i32 = arith.constant 0 : i32
    %c0_i32_0 = arith.constant 0 : i32
    return %c0_i32 : i32
  }
  func.func @transform_1(%arg0: i32, %arg1: i32, %arg2: i32, %arg3: i32) -> i32 {
    %c0_i32 = arith.constant 0 : i32
    %c0_i32_0 = arith.constant 0 : i32
    return %c0_i32 : i32
  }
  func.func @transform_2(%arg0: i32, %arg1: i32, %arg2: i32, %arg3: i32) -> i32 {
    %c0_i32 = arith.constant 0 : i32
    %c0_i32_0 = arith.constant 0 : i32
    return %c0_i32 : i32
  }
  func.func @transform_3(%arg0: i32, %arg1: i32, %arg2: i32, %arg3: i32) -> (i32, i32) {
    %c0_i32 = arith.constant 0 : i32
    %c0_i32_0 = arith.constant 0 : i32
    %c0_i32_1 = arith.constant 0 : i32
    return %c0_i32, %c0_i32_0 : i32, i32
  }
  func.func @transform_4(%arg0: i32, %arg1: i32, %arg2: i32, %arg3: i32) -> (i32, i32, i32) {
    %c0_i32 = arith.constant 0 : i32
    return %arg0, %arg3, %arg1 : i32, i32, i32
  }
  func.func @transform_5(%arg0: i32, %arg1: i32, %arg2: i32, %arg3: i32) -> (i32, i32) {
    %c1_i32 = arith.constant 1 : i32
    %0 = arith.muli %arg0, %c1_i32 : i32
    %1 = arith.addi %0, %arg2 : i32
    %c0_i32 = arith.constant 0 : i32
    return %1, %arg1 : i32, i32
  }
}

</mosaic_0001>

<bundles_post_ra>
// kernel: tpu_custom_call.1
= control target key start
LH: loop header
LB: loop body
LE: loop exit
PB: predicated region body
PF: predicated region fallthrough
CT: control target
= control target key end

     0   :  { %s4857_s0 = inlined_call_operand.hbm [shape: f32[80], index: 0, kind: input, shape index: {}]   ;;  %s4858_s1 = inlined_call_operand.vmem [shape: s32[2], index: 1, kind: input, shape index: {}]   ;;  %s4859_s2 = inlined_call_operand.vmem [shape: s32[2], index: 2, kind: input, shape index: {}]   ;;  %s4860_s3 = inlined_call_operand.hbm [shape: f32[3,392], index: 3, kind: input, shape index: {}]   ;;  %s4861_s4 = inlined_call_operand.hbm [shape: bf16[2,256,128], index: 4, kind: input, shape index: {}]   ;;  %s4862_s5 = inlined_call_operand.hbm [shape: f32[784,128], index: 5, kind: output, shape index: {}]  }
   0x1   :  { %4905 = sst [smem:[#allocation44_spill]] %s4857_s0 }
   0x2   :  { %4906 = sst [smem:[#allocation45_spill]] %s4858_s1 }
   0x3   :  { %4907 = sst [smem:[#allocation46_spill]] %s4859_s2 }
   0x4   :  { %4908 = sst [smem:[#allocation47_spill]] %s4860_s3 }
   0x5   :  { %4909 = sst [smem:[#allocation48_spill]] %s4861_s4 }
   0x6   :  { %4910 = sst [smem:[#allocation49_spill]] %s4862_s5 }
   0x7   :  { %10 = vsyncpa [#allocation6], 0 }
   0x8   :  { %11 = vsyncpa [#allocation7], 0 }
   0x9   :  { %12 = vsyncpa [#allocation10], 0 }
   0xa   :  { %13 = vsyncpa [#allocation4], 0 }
   0xb   :  { %14 = vsyncpa [#allocation13], 0 }
   0xc   :  { %16 = vsyncpa [#allocation13 + $0x1], 0 }
   0xd   :  { %17 = vsyncpa [#allocation5], 0 }
   0xe   :  { %19 = vsyncpa [#allocation5 + $0x1], 0  ;;  %s3309_s18 = smov 0   ;;  %s3311_s19 = smov 0  }
   0xf   :  { %s3313_s20 = smov 0   ;;  %s3315_s21 = smov 0  }
  0x10   :  { %s3317_s22 = smov 0   ;;  %s3319_s23 = smov 0  }
  0x11 LB: > { %4911 = sst [smem:[#allocation21_spill]] %s3243_s18  ;;  %s2852_s24 = sadd.s32 4294967295, %s3263_s23   ;;  %s3263_s23 = sphi %s3319_s23, %s25_s23   ;;  %s3259_s22 = sphi %s3317_s22, %s5045_s22   ;;  %s3255_s21 = sphi %s3315_s21, %s5044_s21   ;;  %s3251_s20 = sphi %s3313_s20, %s5043_s20   ;;  %s3247_s19 = sphi %s3311_s19, %s5042_s19   ;;  %s3243_s18 = sphi %s3309_s18, %s5041_s18  }
  0x12   : > { %4912 = sst [smem:[#allocation22_spill]] %s3247_s19  ;;  %s2853_s25 = sadd.s32 4294967294, %s3263_s23  }
  0x13   : > { %4913 = sst [smem:[#allocation23_spill]] %s3251_s20  ;;  %p159_p0 = scmp.ne.s32.totalorder %s3247_s19, %s3243_s18 }
  0x14   : > { %4914 = sst [smem:[#allocation24_spill]] %s3255_s21  ;;  %p3343_p1 = scmp.eq.s32.totalorder %s2852_s24, 0 }
  0x15   : > { %4915 = sst [smem:[#allocation25_spill]] %s3259_s22  ;;  %p3347_p2 = scmp.eq.s32.totalorder %s2852_s24, 1 }
  0x16   : > { %4916 = sst [smem:[#allocation26_spill]] %s3263_s23  ;;  %p193_p3 = scmp.eq.s32.totalorder %s2853_s25, 1 }
  0x17   : > { %s4917_s26 = scalar_select %p3343_p1, 1, 0 }
  0x18   : > { %s4918_s27 = scalar_select %p3347_p2, 1, 0 }
  0x19   : > { %p3353_p4 = por %p3343_p1, %p159_p0  ;;  %p2854_p5 = scmp.ge.s32.totalorder %s3263_s23, 1 }
  0x1a   : > { %p3358_p6 = por %p193_p3, %p159_p0  ;;  %p200_p7 = scmp.lt.s32.totalorder %s3263_s23, 3 }
  0x1b   : > { %s4919_s28 = scalar_select %p3353_p4, 1, 0 }
  0x1c   : > { %s4920_s29 = scalar_select %p3358_p6, 1, 0 }
  0x1d   : > { %p3363_p8 = pnand %p2854_p5, %p200_p7  ;;  %s4923_s1 = sld [smem:[#allocation45_spill]] }
  0x1e   : > { %4921 = sst [smem:[#allocation27_spill]] %s4920_s29  ;;  %s4924_s2 = sld [smem:[#allocation46_spill]] }
  0x1f   : > { %s4922_s30 = scalar_select %p3363_p8, 1, 0 }
  0x20   : > { %p2957_p10 = pneg %p3363_p8  ;;  %s3265_s13 = smov [#allocation11]  }
  0x21   : > { %s3384_s14 = sshll.u32 %s3265_s13, 4  ;;  %s4926_s0 = sld [smem:[#allocation44_spill]]  ;;  %s245_s14 = int_to_ptr.vmem [resolvable:$true] %s3384_s14 }
  0x22   : > { %p3378_p11 = pnand %p2957_p10, %p3343_p1 }
  0x23   : > { %s222_s8 = sshll.u32 %s4923_s1, 4  ;;  %s223_s8 = int_to_ptr.vmem [resolvable:$true] %s222_s8 }
  0x24   : > { %s233_s11 = sshll.u32 %s4924_s2, 4  ;;  %p3394_p13 = pneg %p3378_p11  ;;  %s3382_s11 = int_to_ptr.vmem [resolvable:$true] %s233_s11 }
  0x27   : > { %s3064_s17 = scalar_lea.hbm %s4926_s0, 16 }
  0x28   : > { %p3065_p12 = scmp.ne.s32.totalorder %s4926_s0, %s3064_s17  ;;  %p3071_p5 = scmp.lt.u32.totalorder %s3064_s17, %s4926_s0 }
  0x2a   : > { %p3067_p0 = pnand %p3394_p13, %p3065_p12 }
  0x2c   : > { %p3068_p3 = pneg %p3067_p0 }
  0x2e   : > { %p3073_p7 = pnand %p3071_p5, %p3068_p3 }
  0x30   : > { %3076 = shalt.err (!%p3073_p7)
}
  0x31   : > { %s3266_s10 = smov [#allocation3]   ;;  %s3077_s16 = scalar_lea.vmem %s223_s8, 16 }
  0x32   : > { %2960 = dma.hbm_to_smem (!%p3378_p11), %s4926_s0, 16, %s3266_s10, [#allocation6]  }
  0x33   : > { %p3078_p10 = scmp.ne.s32.totalorder %s223_s8, %s3077_s16  ;;  %p3085_p0 = scmp.lt.s32.totalorder %s223_s8, %s223_s8 }
  0x34   : > { %p3086_p6 = scmp.lt.s32.totalorder %s3077_s16, %s3077_s16 }
  0x35   : > { %p3080_p9 = pnand %p3078_p10, %p3394_p13 }
  0x36   : > { %p3087_p4 = por %p3086_p6, %p3085_p0 }
  0x37   : > { %p3081_p12 = pneg %p3080_p9 }
  0x39   : > { %p3088_p1 = pnand %p3087_p4, %p3081_p12 }
  0x3b   : > { %3091 = shalt.err (!%p3088_p1)
}
  0x3c   : > { %s3267_s17 = smov [#allocation8]   ;;  %s3092_s24 = scalar_lea.vmem %s3382_s11, 16 }
  0x3d   : > { %2963 = dma.vmem_to_smem (!%p3378_p11), %s223_s8, 16, %s3267_s17, [#allocation7]  }
  0x3e   : > { %p3093_p3 = scmp.ne.s32.totalorder %s3382_s11, %s3092_s24  ;;  %p3100_p9 = scmp.lt.s32.totalorder %s3382_s11, %s3382_s11 }
  0x3f   : > { %p3101_p10 = scmp.lt.s32.totalorder %s3092_s24, %s3092_s24 }
  0x40   : > { %p3095_p5 = pnand %p3093_p3, %p3394_p13 }
  0x41   : > { %p3102_p8 = por %p3101_p10, %p3100_p9 }
  0x42   : > { %p3096_p7 = pneg %p3095_p5 }
  0x44   : > { %p3103_p6 = pnand %p3102_p8, %p3096_p7 }
  0x46   : > { %3106 = shalt.err (!%p3103_p6)
}
  0x47   : > { %s3268_s25 = smov [#allocation9]   ;;  %s4928_s3 = sld [smem:[#allocation47_spill]] }
  0x48   : > { %2966 = dma.vmem_to_smem (!%p3378_p11), %s3382_s11, 16, %s3268_s25, [#allocation10]  }
  0x4d   : > { %s3107_s9 = scalar_lea.hbm %s4928_s3, 256 }
  0x4e   : > { %p3108_p1 = scmp.ne.s32.totalorder %s4928_s3, %s3107_s9  ;;  %p3114_p12 = scmp.lt.u32.totalorder %s3107_s9, %s4928_s3 }
  0x50   : > { %p3110_p4 = pnand %p3108_p1, %p3394_p13 }
  0x52   : > { %p3111_p8 = pneg %p3110_p4 }
  0x54   : > { %p3116_p0 = pnand %p3114_p12, %p3111_p8 }
  0x56   : > { %3119 = shalt.err (!%p3116_p0)
}
  0x57   : > { %s3120_s17 = scalar_lea.vmem %s245_s14, 256  ;;  %p3128_p9 = scmp.lt.s32.totalorder %s245_s14, %s245_s14 }
  0x58   : > { %p3121_p3 = scmp.ne.s32.totalorder %s245_s14, %s3120_s17  ;;  %p3129_p10 = scmp.lt.s32.totalorder %s3120_s17, %s3120_s17 }
  0x5a   : > { %p3123_p5 = pnand %p3121_p3, %p3394_p13  ;;  %p3130_p6 = por %p3129_p10, %p3128_p9 }
  0x5c   : > { %p3124_p7 = pneg %p3123_p5 }
  0x5e   : > { %p3131_p2 = pnand %p3130_p6, %p3124_p7 }
  0x60   : > { %3134 = shalt.err (!%p3131_p2)
}
  0x61   : > { %2969 = dma.hbm_to_vmem [thread:$0]  (!%p3378_p11), %s4928_s3, 256, %s245_s14, [#allocation4]  }
  0x62   : > { %s51_s6 = sadd.s32 1, %s3259_s22  ;;  %s146_s25 = sadd.s32 1, %s3251_s20 }
  0x63   : > { %p53_p2 = scmp.ge.s32.totalorder %s51_s6, 2  ;;  %p153_p13 = scmp.ne.s32.totalorder %s3251_s20, %s3247_s19 }
  0x64   : > { %p154_p1 = scmp.eq.s32.totalorder %s3263_s23, 0  ;;  %p2982_p4 = scmp.lt.s32.totalorder %s3263_s23, 2 }
  0x65   : > { %s5047_s6 = smov (%p53_p2, %s51_s6), 0  ;;  %p4930_p12 = scmp.ne.s32.totalorder %s4918_s27, 0 }
  0x66   : > { %4929 = sst [smem:[#allocation28_spill]] %s5047_s6  ;;  %p155_p8 = por %p154_p1, %p153_p13 }
  0x67   : > { %p3450_p0 = por %p4930_p12, %p153_p13  ;;  %s139_s8 = ssub.s32 %s3259_s22, %s5047_s6 }
  0x68   : > { %s255_s7 = sand.u32 1, %s3251_s20   ;;  %p144_p3 = scmp.eq.s32.totalorder %s139_s8, 0 }
  0x69   : > { %s4931_s12 = scalar_select %p3450_p0, 1, 0 }
  0x6a   : > { %s2860_s14 = sshll.u32 %s255_s7, 7  ;;  %s2902_s9 = sshll.u32 %s3259_s22, 11 }
  0x6b   : > { %4932 = sst [smem:[#allocation29_spill]] %s4931_s12  ;;  %s4934_s4 = sld [smem:[#allocation48_spill]] }
  0x6c   : > { %s3459_s10 = scalar_select %p144_p3, %s3251_s20, %s146_s25  }
  0x6d   : > { %s259_s27 = scalar_lea.vmem [#allocation12], %s2860_s14  ;;  %p3468_p11 = pnand %p2982_p4, %p155_p8 }
  0x6e   : > { %4933 = sst [smem:[#allocation30_spill]] %s3459_s10  ;;  %s269_s17 = sshll.u32 %s259_s27, 4  ;;  %s3472_s17 = int_to_ptr.vmem [resolvable:$true] %s269_s17 }
  0x6f   : > { %s3474_s24 = scalar_lea.sflag [#allocation13], %s255_s7  ;;  %p3137_p7 = pneg %p3468_p11 }
  0x71   : > { %s3464_s16 = scalar_lea.hbm %s4934_s4, %s2902_s9  ;;  %s3140_s9 = scalar_lea.hbm %s4934_s4, 4096 }
  0x72   : > { %s3135_s25 = scalar_lea.hbm %s3464_s16, 2048  ;;  %p3141_p6 = scmp.lt.u32.totalorder %s3464_s16, %s4934_s4 }
  0x73   : > { %p3136_p5 = scmp.ne.s32.totalorder %s3464_s16, %s3135_s25  ;;  %p3142_p2 = scmp.lt.u32.totalorder %s3140_s9, %s3135_s25 }
  0x74   : > { %p3144_p1 = scmp.lt.u32.totalorder %s3135_s25, %s3464_s16 }
  0x75   : > { %p3138_p9 = pnand %p3137_p7, %p3136_p5  ;;  %p3143_p13 = por %p3142_p2, %p3141_p6 }
  0x77   : > { %p3139_p10 = pneg %p3138_p9  ;;  %p3145_p4 = por %p3144_p1, %p3143_p13 }
  0x79   : > { %p3146_p8 = pnand %p3145_p4, %p3139_p10 }
  0x7b   : > { %3149 = shalt.err (!%p3146_p8)
}
  0x7c   : > { %s3150_s7 = scalar_lea.vmem %s3472_s17, 2048  ;;  %s3269_s27 = smov [#allocation12]  }
  0x7d   : > { %p3151_p12 = scmp.ne.s32.totalorder %s3472_s17, %s3150_s7  ;;  %s3155_s8 = sshll.u32 %s3269_s27, 4  ;;  %s3156_s8 = int_to_ptr.vmem [resolvable:$false] %s3155_s8 }
  0x7e   : > { %s3157_s14 = scalar_lea.vmem %s3156_s8, 4096  ;;  %p3158_p9 = scmp.lt.s32.totalorder %s3472_s17, %s3156_s8 }
  0x7f   : > { %p3153_p3 = pnand %p3151_p12, %p3137_p7  ;;  %p3159_p6 = scmp.lt.s32.totalorder %s3157_s14, %s3150_s7 }
  0x81   : > { %p3154_p5 = pneg %p3153_p3  ;;  %p3160_p2 = por %p3159_p6, %p3158_p9 }
  0x83   : > { %p3161_p13 = pnand %p3160_p2, %p3154_p5 }
  0x85   : > { %3164 = shalt.err (!%p3161_p13)
}
  0x86   : > { %s3270_s25 = smov 64   ;;  %s3271_s9 = smov 4  }
  0x87   : > { %2973 = dma.hbm_to_vmem [thread:$0]  (!%p3468_p11), %s3464_s16, 2048, %s3472_s17, %s3474_s24, %s3270_s25, %s3270_s25, %s3271_s9  }
  0x88   : > { %p4936_p7 = scmp.ne.s32.totalorder %s4922_s30, 0 }
  0x8a   : > { %281 = sbr.rel (%p4936_p7) target bundleno = 872 (0x368), region = 40 }
  0x91   : > { %p4937_p10 = scmp.ne.s32.totalorder %s4917_s26, 0 }
  0x93   : > { %3218 = dma.done.wait (%p4937_p10), [#allocation6], 16  }
  0x94   : > { %3220 = vsyncadd (%p4937_p10), [#allocation6], 4294967280 }
  0x95   : > { %3222 = dma.done.wait (%p4937_p10), [#allocation7], 16  }
  0x96   : > { %3224 = vsyncadd (%p4937_p10), [#allocation7], 4294967280 }
  0x97   : > { %3226 = dma.done.wait (%p4937_p10), [#allocation10], 16  }
  0x98   : > { %3228 = vsyncadd (%p4937_p10), [#allocation10], 4294967280 }
  0x99   : > { %3230 = dma.done.wait (%p4937_p10), [#allocation4], 256  }
  0x9a   : > { %3232 = vsyncadd (%p4937_p10), [#allocation4], 4294967040  ;;  %s3521_s30 = sand.u32 1, %s3247_s19   ;;  %p4940_p11 = scmp.ne.s32.totalorder %s4919_s28, 0 }
  0x9b   : > { %4938 = sst [smem:[#allocation31_spill]] %s3521_s30  ;;  %s2868_s16 = sshll.u32 %s3521_s30, 7 }
  0x9c   : > { %s300_s17 = scalar_lea.sflag [#allocation13], %s3521_s30  ;;  %s3525_s11 = scalar_lea.vmem [#allocation12], %s2868_s16 }
  0x9d   : > { %4939 = sst [smem:[#allocation32_spill]] %s3525_s11 }
  0x9e   : > { %3234 = dma.done.wait (%p4940_p11), %s300_s17, 2048  }
  0x9f   : > { %3236 = vsyncadd (%p4940_p11), %s300_s17, 4294965248 }
  0xa0   : > { %308 = sfence }
  0xa1   : > { %s2936_s26 = smul.u32 392, %s3521_s30  ;;  %s3533_s24 = sld [smem:[#allocation9 + %s3255_s21]]  ;;  %v3272_v0 = vmov 0.0  }
  0xa2   : > { %339 = vst [vmem:[#allocation2] sm:$0xff] %v3272_v0  ;;  %340 = vst [vmem:[#allocation2 + $0x8] sm:$0xff] %v3272_v0  ;;  %s392_s28 = sld [smem:[#allocation8 + %s3255_s21]] }
  0xa3   : > { %341 = vst [vmem:[#allocation2 + $0x10] sm:$0xff] %v3272_v0  ;;  %342 = vst [vmem:[#allocation2 + $0x18] sm:$0xff] %v3272_v0  ;;  %s3539_s13 = scalar_lea.vmem [#allocation14], %s2936_s26 }
  0xa4   : > { %343 = vst [vmem:[#allocation2 + $0x20] sm:$0xff] %v3272_v0  ;;  %344 = vst [vmem:[#allocation2 + $0x28] sm:$0xff] %v3272_v0  ;;  %4941 = sst [smem:[#allocation33_spill]] %s3539_s13 }
  0xa5   : > { %345 = vst [vmem:[#allocation2 + $0x30] sm:$0xff] %v3272_v0  ;;  %346 = vst [vmem:[#allocation2 + $0x38] sm:$0xff] %v3272_v0 }
  0xa6   : > { %347 = vst [vmem:[#allocation2 + $0x40] sm:$0xff] %v3272_v0  ;;  %348 = vst [vmem:[#allocation2 + $0x48] sm:$0xff] %v3272_v0 }
  0xa7   : > { %349 = vst [vmem:[#allocation2 + $0x50] sm:$0xff] %v3272_v0  ;;  %350 = vst [vmem:[#allocation2 + $0x58] sm:$0xff] %v3272_v0  ;;  %p391_p1 = scmp.ge.s32.totalorder %s3533_s24, 0 }
  0xa8   : > { %351 = vst [vmem:[#allocation2 + $0x60] sm:$0xff] %v3272_v0  ;;  %352 = vst [vmem:[#allocation2 + $0x68] sm:$0xff] %v3272_v0  ;;  %p394_p4 = scmp.lt.s32.totalorder %s392_s28, 16 }
  0xa9   : > { %353 = vst [vmem:[#allocation2 + $0x70] sm:$0xff] %v3272_v0  ;;  %354 = vst [vmem:[#allocation2 + $0x78] sm:$0xff] %v3272_v0 }
  0xaa   : > { %355 = vst [vmem:[#allocation2 + $0x80] sm:$0xff] %v3272_v0  ;;  %356 = vst [vmem:[#allocation2 + $0x88] sm:$0xff] %v3272_v0  ;;  %p395_p8 = pnand %p394_p4, %p391_p1 }
  0xab   : > { %357 = vst [vmem:[#allocation2 + $0x90] sm:$0xff] %v3272_v0  ;;  %358 = vst [vmem:[#allocation2 + $0x98] sm:$0xff] %v3272_v0 }
  0xac   : > { %359 = vst [vmem:[#allocation2 + $0xa0] sm:$0xff] %v3272_v0  ;;  %360 = vst [vmem:[#allocation2 + $0xa8] sm:$0xff] %v3272_v0 }
  0xad   : > { %361 = vst [vmem:[#allocation2 + $0xb0] sm:$0xff] %v3272_v0  ;;  %362 = vst [vmem:[#allocation2 + $0xb8] sm:$0xff] %v3272_v0 }
  0xae   : > { %363 = vst [vmem:[#allocation2 + $0xc0] sm:$0xff] %v3272_v0  ;;  %364 = vst [vmem:[#allocation2 + $0xc8] sm:$0xff] %v3272_v0 }
  0xaf   : > { %365 = vst [vmem:[#allocation2 + $0xd0] sm:$0xff] %v3272_v0  ;;  %366 = vst [vmem:[#allocation2 + $0xd8] sm:$0xff] %v3272_v0 }
  0xb0   : > { %367 = vst [vmem:[#allocation2 + $0xe0] sm:$0xff] %v3272_v0  ;;  %368 = vst [vmem:[#allocation2 + $0xe8] sm:$0xff] %v3272_v0 }
  0xb1   : > { %369 = vst [vmem:[#allocation2 + $0xf0] sm:$0xff] %v3272_v0  ;;  %370 = vst [vmem:[#allocation2 + $0xf8] sm:$0xff] %v3272_v0 }
  0xb2   : > { %371 = vst [vmem:[#allocation2 + $0x100] sm:$0xff] %v3272_v0  ;;  %372 = vst [vmem:[#allocation2 + $0x108] sm:$0xff] %v3272_v0 }
  0xb3   : > { %373 = vst [vmem:[#allocation2 + $0x110] sm:$0xff] %v3272_v0  ;;  %374 = vst [vmem:[#allocation2 + $0x118] sm:$0xff] %v3272_v0 }
  0xb4   : > { %375 = vst [vmem:[#allocation2 + $0x120] sm:$0xff] %v3272_v0  ;;  %376 = vst [vmem:[#allocation2 + $0x128] sm:$0xff] %v3272_v0  ;;  %398 = sbr.rel (%p395_p8) target bundleno = 827 (0x33b), region = 68 }
  0xb5   : > { %377 = vst [vmem:[#allocation2 + $0x130] sm:$0xff] %v3272_v0  ;;  %378 = vst [vmem:[#allocation2 + $0x138] sm:$0xff] %v3272_v0 }
  0xb6   : > { %379 = vst [vmem:[#allocation2 + $0x140] sm:$0xff] %v3272_v0  ;;  %380 = vst [vmem:[#allocation2 + $0x148] sm:$0xff] %v3272_v0 }
  0xb7   : > { %381 = vst [vmem:[#allocation2 + $0x150] sm:$0xff] %v3272_v0  ;;  %382 = vst [vmem:[#allocation2 + $0x158] sm:$0xff] %v3272_v0 }
  0xb8   : > { %383 = vst [vmem:[#allocation2 + $0x160] sm:$0xff] %v3272_v0  ;;  %384 = vst [vmem:[#allocation2 + $0x168] sm:$0xff] %v3272_v0 }
  0xb9   : > { %385 = vst [vmem:[#allocation2 + $0x170] sm:$0xff] %v3272_v0  ;;  %386 = vst [vmem:[#allocation2 + $0x178] sm:$0xff] %v3272_v0 }
  0xba   : > { %387 = vst [vmem:[#allocation2 + $0x180] sm:$0xff] %v3272_v0 }
  0xbb   : > { %s2870_s15 = smul.u32 40, %s3255_s21  ;;  %s3543_s7 = sshll.u32 %s3255_s21, 3  ;;  %v3273_v1 = vmov 0   ;;  %v3654_v2 = vld [vmem:[#allocation11] ss:$4 sm:$0xf] }
  0xbc   : > { %2265 = vmatprep.subr.bf16.mxu0 %v3273_v1  ;;  %2904 = vmatprep.subr.bf16.mxu1 %v3273_v1  ;;  %s439_s24 = sadd.s32 1, %s3543_s7  ;;  %s472_s0 = sadd.s32 2, %s3543_s7  ;;  %vm426_vm0 = vcmp.eq.f32.partialorder %v3654_v2, 0.0  ;;  %vm459_vm1 = vcmp.eq.f32.partialorder %v3654_v2, 1.0  ;;  %vm492_vm2 = vcmp.eq.f32.partialorder %v3654_v2, 2.0  ;;  %vm525_vm3 = vcmp.eq.f32.partialorder %v3654_v2, 3.0 }
  0xbd   : > { %s408_s27 = sadd.s32 1, %s2870_s15  ;;  %s411_s8 = sadd.s32 2, %s2870_s15  ;;  %vm558_vm4 = vcmp.eq.f32.partialorder %v3654_v2, 4.0  ;;  %vm591_vm5 = vcmp.eq.f32.partialorder %v3654_v2, 5.0  ;;  %vm624_vm6 = vcmp.eq.f32.partialorder %v3654_v2, 6.0  ;;  %vm657_vm7 = vcmp.eq.f32.partialorder %v3654_v2, 7.0 }
  0xbe   : > { %s3547_s14 = sld [smem:[#allocation3 + %s408_s27]]  ;;  %s414_s9 = sadd.s32 3, %s2870_s15 }
  0xbf   : > { %s3549_s25 = sld [smem:[#allocation3 + %s411_s8]]  ;;  %s417_s16 = sadd.s32 4, %s2870_s15 }
  0xc0   : > { %s415_s17 = sld [smem:[#allocation3 + %s414_s9]]  ;;  %s440_s28 = smul.u32 5, %s439_s24 }
  0xc1   : > { %s418_s26 = sld [smem:[#allocation3 + %s417_s16]]  ;;  %s3553_s1 = smul.u32 5, %s472_s0 }
  0xc2   : > { %s441_s3 = sadd.s32 1, %s440_s28  ;;  %s444_s6 = sadd.s32 2, %s440_s28 }
  0xc3   : > { %s3557_s27 = sld [smem:[#allocation3 + %s441_s3]]  ;;  %s447_s9 = sadd.s32 3, %s440_s28 }
  0xc4   : > { %s4869_s2 = smul.f32 0.25, %s3547_s14  ;;  %s3559_s10 = sld [smem:[#allocation3 + %s444_s6]] }
  0xc5   : > { %s4871_s4 = smul.f32 0.25, %s3549_s25  ;;  %s448_s16 = sld [smem:[#allocation3 + %s447_s9]] }
  0xc6   : > { %s416_s8 = smul.f32 0.25, %s415_s17  ;;  %s4886_s24 = smov 1.0  }
  0xc7   : > { %s419_s22 = smul.f32 0.25, %s418_s26  ;;  %s450_s17 = sadd.s32 4, %s440_s28 }
  0xc8   : > { %s420_s15 = ssub.f32 %s416_s8, %s4869_s2  ;;  %s451_s2 = sld [smem:[#allocation3 + %s450_s17]] }
  0xc9   : > { %s423_s0 = ssub.f32 %s419_s22, %s4871_s4  ;;  %s4880_s20 = smul.f32 0.25, %s3557_s27 }
  0xca   : > { %s3566_s3 = smax.f32 %s4886_s24, %s420_s15  ;;  %s474_s22 = sadd.s32 1, %s3553_s1 }
  0xcb   : > { %s3570_s6 = smax.f32 %s4886_s24, %s423_s0  ;;  %s3576_s9 = sld [smem:[#allocation3 + %s474_s22]] }
  0xcc   : > { %s449_s19 = smul.f32 0.25, %s448_s16  ;;  %s477_s15 = sadd.s32 2, %s3553_s1 }
  0xcd   : > { %s3579_s23 = sld [smem:[#allocation3 + %s477_s15]]  ;;  %s480_s28 = sadd.s32 3, %s3553_s1 }
  0xce   : > { %s453_s0 = ssub.f32 %s449_s19, %s4880_s20  ;;  %s481_s8 = sld [smem:[#allocation3 + %s480_s28]] }
  0xcf   : > { %s452_s17 = smul.f32 0.25, %s451_s2  ;;  %s483_s26 = sadd.s32 4, %s3553_s1 }
  0xd0   : > { %s3586_s4 = smax.f32 %s4886_s24, %s453_s0  ;;  %s484_s22 = sld [smem:[#allocation3 + %s483_s26]] }
  0xd1   : > { %4942 = sst [smem:[#allocation34_spill]] %s3576_s9  ;;  %s4944_s29 = smul.f32 0.25, %s3559_s10 }
  0xd2   : > { %s4885_s15 = smul.f32 0.25, %s3576_s9  ;;  %s505_s20 = sadd.s32 3, %s3543_s7 }
  0xd3   : > { %4943 = sst [smem:[#allocation35_spill]] %s3579_s23  ;;  %s4884_s5 = smul.f32 0.25, %s3579_s23 }
  0xd4   : > { %s456_s18 = ssub.f32 %s452_s17, %s4944_s29  ;;  %s482_s28 = smul.f32 0.25, %s481_s8 }
  0xd5   : > { %s538_s2 = sadd.s32 4, %s3543_s7  ;;  %s506_s0 = smul.u32 5, %s505_s20 }
  0xd6   : > { %s3593_s12 = smax.f32 %s4886_s24, %s456_s18  ;;  %s485_s30 = smul.f32 0.25, %s484_s22 }
  0xd7   : > { %4945 = sst [smem:[#allocation36_spill]] %s3593_s12  ;;  %s539_s26 = smul.u32 5, %s538_s2 }
  0xd8   : > { %s486_s1 = ssub.f32 %s482_s28, %s4885_s15  ;;  %s507_s29 = sadd.s32 1, %s506_s0 }
  0xd9   : > { %s489_s21 = ssub.f32 %s485_s30, %s4884_s5  ;;  %s3611_s8 = sld [smem:[#allocation3 + %s507_s29]] }
  0xda   : > { %s3604_s16 = smax.f32 %s4886_s24, %s486_s1  ;;  %s510_s22 = sadd.s32 2, %s506_s0 }
  0xdb   : > { %4946 = sst [smem:[#allocation37_spill]] %s3604_s16  ;;  %s3608_s17 = smax.f32 %s4886_s24, %s489_s21 }
  0xdc   : > { %4947 = sst [smem:[#allocation38_spill]] %s3608_s17  ;;  %s513_s28 = sadd.s32 3, %s506_s0 }
  0xdd   : > { %s3613_s20 = sld [smem:[#allocation3 + %s510_s22]]  ;;  %s516_s2 = sadd.s32 4, %s506_s0 }
  0xde   : > { %s514_s30 = sld [smem:[#allocation3 + %s513_s28]]  ;;  %s540_s1 = sadd.s32 1, %s539_s26 }
  0xdf   : > { %4948 = sst [smem:[#allocation39_spill]] %s3611_s8  ;;  %s543_s19 = sadd.s32 2, %s539_s26 }
  0xe0   : > { %s517_s5 = sld [smem:[#allocation3 + %s516_s2]]  ;;  %s546_s29 = sadd.s32 3, %s539_s26 }
  0xe1   : > { %s3615_s21 = sld [smem:[#allocation3 + %s540_s1]]  ;;  %s509_s18 = smul.f32 0.25, %s3611_s8 }
  0xe2   : > { %s3618_s15 = sld [smem:[#allocation3 + %s543_s19]]  ;;  %s549_s22 = sadd.s32 4, %s539_s26 }
  0xe3   : > { %s547_s24 = sld [smem:[#allocation3 + %s546_s29]]  ;;  %s4896_s13 = smul.f32 0.25, %s3613_s20  ;;  %v529_v27 = vstv %s509_s18 }
  0xe4   : > { %s550_s28 = sld [smem:[#allocation3 + %s549_s22]]  ;;  %s515_s0 = smul.f32 0.25, %s514_s30  ;;  %v530_v36 = vsel %vm525_vm3, %v529_v27, 0.0 }
  0xe5   : > { %s571_s11 = sadd.s32 5, %s3543_s7  ;;  %s4949_s19 = smov 1.0  }
  0xe6   : > { %s518_s17 = smul.f32 0.25, %s517_s5  ;;  %s519_s1 = ssub.f32 %s515_s0, %s509_s18 }
  0xe7   : > { %s4897_s23 = smul.f32 0.25, %s3615_s21  ;;  %s637_s8 = sadd.s32 7, %s3543_s7 }
  0xe8   : > { %s522_s16 = ssub.f32 %s518_s17, %s4896_s13  ;;  %s4898_s9 = smul.f32 0.25, %s3618_s15 }
  0xe9   : > { %s3630_s12 = smax.f32 %s4949_s19, %s519_s1  ;;  %s548_s26 = smul.f32 0.25, %s547_s24 }
  0xea   : > { %s3634_s22 = smax.f32 %s4949_s19, %s522_s16  ;;  %s551_s2 = smul.f32 0.25, %s550_s28 }
  0xeb   : > { %s552_s5 = ssub.f32 %s548_s26, %s4897_s23  ;;  %s572_s17 = smul.u32 5, %s571_s11 }
  0xec   : > { %s555_s24 = ssub.f32 %s551_s2, %s4898_s9  ;;  %s4951_s1 = smul.f32 0.14285715, %s3566_s3 }
  0xed   : > { %s3641_s0 = smax.f32 %s4949_s19, %s552_s5  ;;  %s573_s16 = sadd.s32 1, %s572_s17 }
  0xee   : > { %s576_s13 = sadd.s32 2, %s572_s17  ;;  %s3647_s30 = smax.f32 %s4949_s19, %s555_s24  ;;  %v436_v4 = vstv %s4951_s1 }
  0xef   : > { %s3649_s28 = sld [smem:[#allocation3 + %s573_s16]]  ;;  %s579_s11 = sadd.s32 3, %s572_s17  ;;  %v437_v10 = vsel %vm426_vm0, %v436_v4, 0.0 }
  0xf0   : > { %s3652_s5 = sld [smem:[#allocation3 + %s576_s13]]  ;;  %s582_s23 = sadd.s32 4, %s572_s17 }
  0xf1   : > { %s3656_s2 = sld [smem:[#allocation3 + %s579_s11]]  ;;  %s4950_s24 = smul.f32 0.25, %s3547_s14 }
  0xf2   : > { %s3658_s9 = sld [smem:[#allocation3 + %s582_s23]]  ;;  %s4952_s16 = sadd.s32 6, %s3543_s7 }
  0xf3   : > { %v430_v3 = vstv %s4950_s24  ;;  %s3666_s26 = smul.u32 5, %s4952_s16  ;;  %s4954_s29 = sld [smem:[#allocation36_spill]] }
  0xf4   : > { %s4953_s13 = smul.f32 0.25, %s3557_s27  ;;  %s4956_s23 = sld [smem:[#allocation34_spill]]  ;;  %v431_v8 = vsel %vm426_vm0, %v430_v3, 0.0 }
  0xf5   : > { %s4955_s17 = smul.f32 0.14285715, %s3586_s4  ;;  %s4957_s14 = sld [smem:[#allocation37_spill]] }
  0xf6   : > { %v463_v5 = vstv %s4953_s13  ;;  %s3672_s11 = smul.u32 5, %s637_s8  ;;  %s606_s7 = sadd.s32 1, %s3666_s26 }
  0xf7   : > { %v469_v6 = vstv %s4955_s17  ;;  %s575_s3 = smul.f32 0.25, %s3649_s28  ;;  %s3687_s8 = sld [smem:[#allocation3 + %s606_s7]]  ;;  %v464_v12 = vsel %vm459_vm1, %v463_v5, 0.0 }
  0xf8   : > { %s4958_s1 = smul.f32 0.25, %s3549_s25  ;;  %v470_v14 = vsel %vm459_vm1, %v469_v6, 0.0  ;;  %s609_s25 = sadd.s32 2, %s3666_s26  ;;  %v465_v20 = vadd.f32 %v464_v12, %v431_v8 }
  0xf9   : > { %s4959_s4 = smul.f32 0.14285715, %s3570_s6  ;;  %s612_s6 = sadd.s32 3, %s3666_s26  ;;  %v471_v22 = vadd.f32 %v470_v14, %v437_v10  ;;  %v595_v51 = vstv %s575_s3 }
  0xfa   : > { %v427_v7 = vstv %s4958_s1  ;;  %s578_s27 = smul.f32 0.25, %s3652_s5  ;;  %s4963_s17 = sld [smem:[#allocation35_spill]]  ;;  %v596_v60 = vsel %vm591_vm5, %v595_v51, 0.0 }
  0xfb   : > { %v433_v9 = vstv %s4959_s4  ;;  %s4960_s24 = smul.f32 0.25, %s3559_s10  ;;  %s4965_s7 = sld [smem:[#allocation38_spill]]  ;;  %v428_v17 = vsel %vm426_vm0, %v427_v7, 0.0 }
  0xfc   : > { %s4961_s16 = smul.f32 0.14285715, %s4954_s29  ;;  %s3704_s4 = sld [smem:[#allocation3 + %s609_s25]]  ;;  %v434_v18 = vsel %vm426_vm0, %v433_v9, 0.0  ;;  %v592_v59 = vstv %s578_s27 }
  0xfd   : > { %v460_v11 = vstv %s4960_s24  ;;  %s4962_s13 = smul.f32 0.25, %s4956_s23  ;;  %s3712_s24 = sld [smem:[#allocation3 + %s612_s6]]  ;;  %v593_v5 = vsel %vm591_vm5, %v592_v59, 0.0 }
  0xfe   : > { %v466_v13 = vstv %s4961_s16  ;;  %s4964_s1 = smul.f32 0.14285715, %s4957_s14  ;;  %v461_v19 = vsel %vm459_vm1, %v460_v11, 0.0  ;;  %s615_s14 = sadd.s32 4, %s3666_s26 }
  0xff   : > { %v496_v15 = vstv %s4962_s13  ;;  %s581_s10 = smul.f32 0.25, %s3656_s2  ;;  %v467_v21 = vsel %vm459_vm1, %v466_v13, 0.0  ;;  %s3731_s6 = sld [smem:[#allocation3 + %s615_s14]]  ;;  %v462_v29 = vadd.f32 %v461_v19, %v428_v17 }
 0x100   : > { %v502_v16 = vstv %s4964_s1  ;;  %s584_s23 = smul.f32 0.25, %s3658_s9  ;;  %v497_v24 = vsel %vm492_vm2, %v496_v15, 0.0  ;;  %v468_v30 = vadd.f32 %v467_v21, %v434_v18  ;;  %s639_s18 = sadd.s32 1, %s3672_s11 }
 0x101   : > { %s585_s2 = ssub.f32 %s581_s10, %s575_s3  ;;  %s4967_s16 = smul.f32 0.25, %s4963_s17  ;;  %v503_v26 = vsel %vm492_vm2, %v502_v16, 0.0  ;;  %v498_v32 = vadd.f32 %v497_v24, %v465_v20 }
 0x102   : > { %s4968_s9 = smul.f32 0.14285715, %s4965_s7  ;;  %s588_s25 = ssub.f32 %s584_s23, %s578_s27  ;;  %v504_v34 = vadd.f32 %v503_v26, %v471_v22  ;;  %v674_v22 = vlaneseq }
 0x103   : > { %v493_v23 = vstv %s4967_s16  ;;  %s4969_s13 = smul.f32 0.14285715, %s3630_s12  ;;  %s3738_s26 = smax.f32 %s4949_s19, %s585_s2  ;;  %v531_v44 = vadd.f32 %v530_v36, %v498_v32 }
 0x104   : > { %v499_v25 = vstv %s4968_s9  ;;  %s608_s17 = smul.f32 0.25, %s3687_s8  ;;  %s3744_s7 = smax.f32 %s4949_s19, %s588_s25  ;;  %v494_v31 = vsel %vm492_vm2, %v493_v23, 0.0  ;;  %v406_v23 = vld [vmem:[#allocation11 + $0x2] ss:$4 sm:$0xf]  ;;  %v675_v32 = vshrl.u32 %v674_v22, 7 }
 0x105   : > { %v535_v28 = vstv %s4969_s13  ;;  %s587_s1 = smul.f32 0.14285715, %s3738_s26  ;;  %v500_v33 = vsel %vm492_vm2, %v499_v25, 0.0  ;;  %s3761_s2 = sld [smem:[#allocation3 + %s639_s18]]  ;;  %v495_v41 = vadd.f32 %v494_v31, %v462_v29 }
 0x106   : > { %s590_s12 = smul.f32 0.14285715, %s3744_s7  ;;  %v536_v38 = vsel %vm525_vm3, %v535_v28, 0.0  ;;  %s642_s9 = sadd.s32 2, %s3672_s11  ;;  %v501_v42 = vadd.f32 %v500_v33, %v468_v30  ;;  %v628_v63 = vstv %s608_s17  ;;  %v3848_v51 = vsub.s32 0, %v675_v32 }
 0x107   : > { %s4970_s10 = smul.f32 0.25, %s3613_s20  ;;  %s3771_s25 = sld [smem:[#allocation3 + %s642_s9]]  ;;  %v537_v46 = vadd.f32 %v536_v38, %v504_v34  ;;  %v601_v52 = vstv %s587_s1  ;;  %v629_v10 = vsel %vm624_vm6, %v628_v63, 0.0  ;;  %v404_v33 = vld [vmem:[#allocation11 + $0x1] ss:$4 sm:$0xf] }
 0x108   : > { %s4971_s29 = smul.f32 0.14285715, %s3634_s22  ;;  %v598_v61 = vstv %s590_s12  ;;  %v602_v62 = vsel %vm591_vm5, %v601_v52, 0.0  ;;  %v3852_v52 = vsub.s32 1, %v675_v32 }
 0x109   : > { %v526_v35 = vstv %s4970_s10  ;;  %s611_s23 = smul.f32 0.25, %s3704_s4  ;;  %s648_s10 = sadd.s32 4, %s3672_s11  ;;  %v599_v7 = vsel %vm591_vm5, %v598_v61, 0.0 }
 0x10a   : > { %v532_v37 = vstv %s4971_s29  ;;  %s4972_s14 = smul.f32 0.25, %s3615_s21  ;;  %v527_v43 = vsel %vm525_vm3, %v526_v35, 0.0 }
 0x10b   : > { %s4973_s16 = smul.f32 0.14285715, %s3641_s0  ;;  %v533_v45 = vsel %vm525_vm3, %v532_v37, 0.0  ;;  %s645_s0 = sadd.s32 3, %s3672_s11  ;;  %v528_v53 = vadd.f32 %v527_v43, %v495_v41  ;;  %v625_v9 = vstv %s611_s23  ;;  %v3275_v37 = vmov 1966171168  }
 0x10c   : > { %v562_v39 = vstv %s4972_s14  ;;  %s614_s20 = smul.f32 0.25, %s3712_s24  ;;  %s3790_s18 = sld [smem:[#allocation3 + %s645_s0]]  ;;  %v534_v54 = vadd.f32 %v533_v45, %v501_v42  ;;  %v626_v16 = vsel %vm624_vm6, %v625_v9, 0.0  ;;  %v1097_v38 = vunpack.c.l.s4 %v3275_v37 }
 0x10d   : > { %v568_v40 = vstv %s4973_s16  ;;  %s617_s22 = smul.f32 0.25, %s3731_s6  ;;  %v563_v48 = vsel %vm558_vm4, %v562_v39, 0.0  ;;  %s3804_s11 = sld [smem:[#allocation3 + %s648_s10]] }
 0x10e   : > { %s618_s21 = ssub.f32 %s614_s20, %s608_s17  ;;  %s4974_s24 = smul.f32 0.25, %s3618_s15  ;;  %v569_v50 = vsel %vm558_vm4, %v568_v40, 0.0  ;;  %v564_v56 = vadd.f32 %v563_v48, %v531_v44  ;;  %v676_v44 = vadd.s32 8, %v675_v32  ;;  %v1098_v48 = vunpack.c.0.s8 %v1097_v38 }
 0x10f   : > { %s4975_s6 = smul.f32 0.14285715, %s3647_s30  ;;  %s621_s13 = ssub.f32 %s617_s22, %s611_s23  ;;  %v570_v58 = vadd.f32 %v569_v50, %v537_v46  ;;  %v3846_v50 = vcvt.s32.f32 %v675_v32 }
 0x110   : > { %v559_v47 = vstv %s4974_s24  ;;  %s619_s15 = smax.f32 %s4949_s19, %s618_s21  ;;  %s641_s3 = smul.f32 0.25, %s3761_s2  ;;  %v597_v6 = vadd.f32 %v596_v60, %v564_v56  ;;  %v3856_v56 = vsub.s32 2, %v675_v32  ;;  %v3865_v61 = vsub.s32 %v1098_v48, %v675_v32 }
 0x111   : > { %v565_v49 = vstv %s4975_s6  ;;  %s620_s30 = smul.f32 0.14285715, %s619_s15  ;;  %s622_s29 = smax.f32 %s4949_s19, %s621_s13  ;;  %v560_v55 = vsel %vm558_vm4, %v559_v47, 0.0  ;;  %v603_v8 = vadd.f32 %v602_v62, %v570_v58 }
 0x112   : > { %v566_v57 = vsel %vm558_vm4, %v565_v49, 0.0  ;;  %s623_s28 = smul.f32 0.14285715, %s622_s29  ;;  %v561_v3 = vadd.f32 %v560_v55, %v528_v53  ;;  %v661_v13 = vstv %s641_s3  ;;  %v630_v17 = vadd.f32 %v629_v10, %v597_v6 }
 0x113   : > { %v634_v0 = vstv %s620_s30  ;;  %v567_v4 = vadd.f32 %v566_v57, %v534_v54  ;;  %s647_s5 = smul.f32 0.25, %s3790_s18  ;;  %v662_v21 = vsel %vm657_vm7, %v661_v13, 0.0  ;;  %v3854_v54 = vcvt.s32.f32 %v676_v44 }
 0x114   : > { %s644_s27 = smul.f32 0.25, %s3771_s25  ;;  %v631_v11 = vstv %s623_s28  ;;  %v635_v12 = vsel %vm624_vm6, %v634_v0, 0.0  ;;  %v594_v14 = vadd.f32 %v593_v5, %v561_v3  ;;  %v663_v29 = vadd.f32 %v662_v21, %v630_v17 }
 0x115   : > { %s651_s8 = ssub.f32 %s647_s5, %s641_s3  ;;  %s650_s26 = smul.f32 0.25, %s3804_s11  ;;  %v600_v15 = vadd.f32 %v599_v7, %v567_v4  ;;  %v632_v18 = vsel %vm624_vm6, %v631_v11, 0.0  ;;  %v636_v19 = vadd.f32 %v635_v12, %v603_v8  ;;  %v3858_v57 = vsub.s32 3, %v675_v32 }
 0x116   : > { %v658_v20 = vstv %s644_s27  ;;  %v627_v25 = vadd.f32 %v626_v16, %v594_v14 }
 0x117   : > { %s652_s17 = smax.f32 %s4949_s19, %s651_s8  ;;  %s654_s1 = ssub.f32 %s650_s26, %s644_s27  ;;  %v633_v26 = vadd.f32 %v632_v18, %v600_v15  ;;  %v659_v28 = vsel %vm657_vm7, %v658_v20, 0.0  ;;  %4976 = vst [vmem:[#allocation40_spill] sm:$0xff] %v3858_v57 }
 0x118   : > { %s653_s4 = smul.f32 0.14285715, %s652_s17  ;;  %v660_v39 = vadd.f32 %v659_v28, %v627_v25 }
 0x119   : > { %s655_s7 = smax.f32 %s4949_s19, %s654_s1  ;;  %s4977_s19 = sld [smem:[#allocation32_spill]] }
 0x11a   : > { %v667_v24 = vstv %s653_s4  ;;  %s656_s12 = smul.f32 0.14285715, %s655_s7 }
 0x11b   : > { %v668_v27 = vsel %vm657_vm7, %v667_v24, 0.0 }
 0x11c   : > { %v669_v30 = vadd.f32 %v668_v27, %v636_v19  ;;  %v664_v31 = vstv %s656_s12 }
 0x11d   : > { %v665_v34 = vsel %vm657_vm7, %v664_v31, 0.0 }
 0x11e   : > { %v672_v35 = vmul.f32 %v669_v30, %v406_v23  ;;  %v781_v36 = vmul.f32 0.25, %v669_v30  ;;  %v666_v40 = vadd.f32 %v665_v34, %v633_v26  ;;  %v975_v41 = vmul.f32 0.75, %v669_v30 }
 0x11f   : > { %v3048_v26 = vld [vmem:[%s4977_s19] sm:$0xff]  }
 0x120   : > { %v673_v42 = vadd.f32 %v672_v35, %v663_v29  ;;  %v670_v43 = vmul.f32 %v666_v40, %v404_v33  ;;  %v684_v45 = vmul.f32 0.25, %v666_v40  ;;  %v878_v47 = vmul.f32 0.75, %v666_v40  ;;  %2266 = vmatpush1.bf16.msra.mxu0 %v3048_v26  ;;  %2920 = vmatpush1.bf16.msra.mxu1 %v3048_v26  ;;  %v3054_v26 = vld [vmem:[%s4977_s19 + $0x30] sm:$0xff]  }
 0x121   : > { %2267 = vmatprep.subr.bf16.mxu0 %v3273_v1  ;;  %2905 = vmatprep.subr.bf16.mxu1 %v3273_v1 }
 0x122   : > { %v782_v46 = vadd.f32 %v781_v36, %v673_v42  ;;  %v671_v49 = vadd.f32 %v670_v43, %v660_v39  ;;  %v3850_v2 = vadd.f32 %v975_v41, %v673_v42  ;;  %v3049_v43 = vld [vmem:[%s4977_s19 + $0x8] sm:$0xff]  }
 0x124   : > { %vm783_vm8 = vcmp.ge.f32.partialorder %v782_v46, -1.0  ;;  %vm784_vm9 = vcmp.le.f32.partialorder %v782_v46, 16.0  ;;  %v786_v53 = vmax.f32 %v782_v46, 0.0  ;;  %v685_v55 = vadd.f32 %v684_v45, %v671_v49  ;;  %2268 = vmatpush1.bf16.msra.mxu0 %v3049_v43  ;;  %2921 = vmatpush1.bf16.msra.mxu1 %v3049_v43 }
 0x125   : > { %vm785_vm10 = vmand %vm783_vm8, %vm784_vm9  ;;  %v3863_v60 = vadd.f32 %v878_v47, %v671_v49  ;;  %v980_v63 = vmax.f32 %v3850_v2, 0.0  ;;  %vm977_vm1 = vcmp.ge.f32.partialorder %v3850_v2, -1.0  ;;  %vm978_vm2 = vcmp.le.f32.partialorder %v3850_v2, 16.0  ;;  %2269 = vmatprep.subr.bf16.mxu0 %v3273_v1  ;;  %2906 = vmatprep.subr.bf16.mxu1 %v3273_v1 }
 0x126   : > { %v787_v58 = vmin.f32 %v786_v53, 15.0  ;;  %v3861_v59 = vsel %vm785_vm10, 1, %v3273_v1  ;;  %vm686_vm11 = vcmp.ge.f32.partialorder %v685_v55, -1.0  ;;  %vm687_vm12 = vcmp.le.f32.partialorder %v685_v55, 16.0  ;;  %vm4005_vm7 = vmand %vm977_vm1, %vm978_vm2 }
 0x127   : > { %v689_v62 = vmax.f32 %v685_v55, 0.0  ;;  %vm688_vm13 = vmand %vm686_vm11, %vm687_vm12  ;;  %v849_v5 = vrot.slane %v3861_v59, %v3852_v52  ;;  %v853_v9 = vrot.slane %v3861_v59, %v3856_v56  ;;  %v857_v13 = vrot.slane %v3861_v59, %v3858_v57 }
 0x128   : > { %v792_v0 = vrot.slane %v787_v58, %v3848_v51  ;;  %v796_v3 = vrot.slane %v787_v58, %v3852_v52  ;;  %v3871_v4 = vrot.slane %v787_v58, %v3856_v56  ;;  %v744_v7 = vsel %vm688_vm13, 1, %v3273_v1 }
 0x129   : > { %v690_v6 = vmin.f32 %v689_v62, 15.0  ;;  %v3877_v8 = vrot.slane %v787_v58, %v3858_v57  ;;  %v748_v10 = vrot.slane %v744_v7, %v3848_v51  ;;  %v752_v11 = vrot.slane %v744_v7, %v3852_v52 }
 0x12a   : > { %v756_v12 = vrot.slane %v744_v7, %v3856_v56  ;;  %v760_v18 = vrot.slane %v744_v7, %v3858_v57  ;;  %v809_v27 = vsub.f32 %v792_v0, %v3846_v50  ;;  %v810_v28 = vsub.f32 %v796_v3, %v3846_v50 }
 0x12b   : > { %v3887_v14 = vrot.slane %v690_v6, %v3848_v51  ;;  %v3890_v15 = vrot.slane %v690_v6, %v3852_v52  ;;  %v3893_v16 = vrot.slane %v690_v6, %v3856_v56  ;;  %v3896_v17 = vrot.slane %v690_v6, %v3858_v57 }
 0x12c   : > { %vm3899_vm14 = vcmp.eq.s32.totalorder %v748_v10, 1  ;;  %vm3903_vm15 = vcmp.eq.s32.totalorder %v752_v11, 1  ;;  %vm3907_vm0 = vcmp.eq.s32.totalorder %v756_v12, 1  ;;  %v811_v29 = vsub.f32 %v3871_v4, %v3846_v50  ;;  %v3050_v10 = vld [vmem:[%s4977_s19 + $0x10] sm:$0xff]  }
 0x12d   : > { %v716_v22 = vsub.f32 %v3887_v14, %v3854_v54  ;;  %v717_v23 = vsub.f32 %v3890_v15, %v3854_v54  ;;  %v718_v24 = vsub.f32 %v3893_v16, %v3854_v54  ;;  %v719_v25 = vsub.f32 %v3896_v17, %v3854_v54  ;;  %2270 = vmatpush1.bf16.msra.mxu0 %v3050_v10 }
 0x12e   : > { %v812_v30 = vsub.f32 %v3877_v8, %v3846_v50  ;;  %v813_v34 = vsub.f32 %v792_v0, %v3854_v54  ;;  %v814_v36 = vsub.f32 %v796_v3, %v3854_v54  ;;  %v815_v37 = vsub.f32 %v3871_v4, %v3854_v54  ;;  %2922 = vmatpush1.bf16.msra.mxu1 %v3050_v10 }
 0x12f   : > { %v724_v31 = vand.u32 2147483647, %v716_v22  ;;  %v725_v32 = vand.u32 2147483647, %v717_v23  ;;  %v726_v33 = vand.u32 2147483647, %v718_v24  ;;  %v816_v38 = vsub.f32 %v3877_v8, %v3854_v54  ;;  %2271 = vmatprep.subr.bf16.mxu0 %v3273_v1  ;;  %2907 = vmatprep.subr.bf16.mxu1 %v3273_v1 }
 0x130   : > { %v727_v35 = vand.u32 2147483647, %v719_v25  ;;  %v817_v42 = vand.u32 2147483647, %v809_v27  ;;  %vm3937_vm3 = vcmp.eq.s32.totalorder %v760_v18, 1  ;;  %vm3949_vm4 = vcmp.eq.s32.totalorder %v849_v5, 1 }
 0x131   : > { %v732_v39 = vsub.f32 1.0, %v724_v31  ;;  %v733_v40 = vsub.f32 1.0, %v725_v32  ;;  %v734_v41 = vsub.f32 1.0, %v726_v33  ;;  %v818_v46 = vand.u32 2147483647, %v810_v28 }
 0x132   : > { %v735_v44 = vsub.f32 1.0, %v727_v35  ;;  %v819_v47 = vand.u32 2147483647, %v811_v29  ;;  %v820_v55 = vand.u32 2147483647, %v812_v30  ;;  %v825_v8 = vsub.f32 1.0, %v817_v42 }
 0x133   : > { %v3941_v48 = vmax.f32 %v732_v39, 0.0  ;;  %v3943_v49 = vmax.f32 %v733_v40, 0.0  ;;  %v3945_v53 = vmax.f32 %v734_v41, 0.0  ;;  %v821_v62 = vand.u32 2147483647, %v813_v34  ;;  %v3051_v34 = vld [vmem:[%s4977_s19 + $0x18] sm:$0xff]  }
 0x134   : > { %v3947_v58 = vmax.f32 %v735_v44, 0.0  ;;  %v822_v0 = vand.u32 2147483647, %v814_v36  ;;  %v823_v7 = vand.u32 2147483647, %v815_v37  ;;  %v826_v12 = vsub.f32 1.0, %v818_v46  ;;  %2272 = vmatpush1.bf16.msra.mxu0 %v3051_v34  ;;  %2923 = vmatpush1.bf16.msra.mxu1 %v3051_v34 }
 0x135   : > { %v824_v11 = vand.u32 2147483647, %v816_v38  ;;  %v827_v18 = vsub.f32 1.0, %v819_v47  ;;  %v828_v22 = vsub.f32 1.0, %v820_v55  ;;  %v829_v23 = vsub.f32 1.0, %v821_v62  ;;  %2273 = vmatprep.subr.bf16.mxu0 %v3273_v1  ;;  %2908 = vmatprep.subr.bf16.mxu1 %v3273_v1  ;;  %v3052_v55 = vld [vmem:[%s4977_s19 + $0x20] sm:$0xff]  }
 0x136   : > { %v830_v24 = vsub.f32 1.0, %v822_v0  ;;  %v831_v25 = vsub.f32 1.0, %v823_v7  ;;  %v3968_v28 = vmax.f32 %v826_v12, 0.0  ;;  %v3974_v30 = vmax.f32 %v825_v8, 0.0  ;;  %v3053_v39 = vld [vmem:[%s4977_s19 + $0x28] sm:$0xff]  }
 0x137   : > { %v832_v27 = vsub.f32 1.0, %v824_v11  ;;  %v3970_v29 = vmax.f32 %v827_v18, 0.0  ;;  %v3976_v31 = vmax.f32 %v828_v22, 0.0  ;;  %v3983_v35 = vmax.f32 %v829_v23, 0.0 }
 0x138   : > { %v3978_v32 = vmax.f32 %v830_v24, 0.0  ;;  %v3980_v33 = vmax.f32 %v831_v25, 0.0  ;;  %vm3990_vm5 = vcmp.eq.s32.totalorder %v853_v9, 1  ;;  %vm3997_vm6 = vcmp.eq.s32.totalorder %v857_v13, 1  ;;  %2274 = vmatpush1.bf16.msra.mxu0 %v3052_v55  ;;  %2924 = vmatpush1.bf16.msra.mxu1 %v3052_v55 }
 0x139   : > { %v3985_v36 = vmax.f32 %v832_v27, 0.0  ;;  %vm880_vm8 = vcmp.ge.f32.partialorder %v3863_v60, -1.0  ;;  %vm881_vm9 = vcmp.le.f32.partialorder %v3863_v60, 16.0  ;;  %v883_v43 = vmax.f32 %v3863_v60, 0.0  ;;  %2275 = vmatprep.subr.bf16.mxu0 %v3273_v1  ;;  %2909 = vmatprep.subr.bf16.mxu1 %v3273_v1 }
 0x13a   : > { %vm882_vm10 = vmand %vm880_vm8, %vm881_vm9  ;;  %v981_v46 = vmin.f32 %v980_v63, 15.0  ;;  %v4037_v47 = vsel %vm4005_vm7, 1, %v3273_v1  ;;  %v5002_v34 = vmov 0 }
 0x13b   : > { %v884_v62 = vmin.f32 %v883_v43, 15.0  ;;  %v938_v0 = vsel %vm882_vm10, 1, %v3273_v1 }
 0x13c   : > { %v942_v63 = vrot.slane %v938_v0, %v3848_v51  ;;  %v946_v8 = vrot.slane %v938_v0, %v3852_v52  ;;  %v950_v10 = vrot.slane %v938_v0, %v3856_v56  ;;  %v954_v11 = vrot.slane %v938_v0, %v3858_v57  ;;  %2276 = vmatpush1.bf16.msra.mxu0 %v3053_v39 }
 0x13d   : > { %v4052_v12 = vrot.slane %v884_v62, %v3848_v51  ;;  %v4055_v18 = vrot.slane %v884_v62, %v3852_v52  ;;  %v4058_v22 = vrot.slane %v884_v62, %v3856_v56  ;;  %v4061_v23 = vrot.slane %v884_v62, %v3858_v57  ;;  %2277 = vmatprep.subr.bf16.mxu0 %v3273_v1 }
 0x13e   : > { %vm4064_vm11 = vcmp.eq.s32.totalorder %v942_v63, 1  ;;  %vm4068_vm12 = vcmp.eq.s32.totalorder %v946_v8, 1  ;;  %vm4072_vm13 = vcmp.eq.s32.totalorder %v950_v10, 1  ;;  %vm4076_vm1 = vcmp.eq.s32.totalorder %v954_v11, 1  ;;  %2925 = vmatpush1.bf16.msra.mxu1 %v3053_v39 }
 0x13f   : > { %4994 = vst [vmem:[#allocation41_spill] sm:$0xff] %v4058_v22  ;;  %4995 = vst [vmem:[#allocation42_spill] sm:$0xff] %v4061_v23  ;;  %v5003_v34 = vsel %vm4076_vm1, 4294967295, %v5002_v34  ;;  %v910_v43 = vsub.f32 %v4052_v12, %v3854_v54  ;;  %v911_v62 = vsub.f32 %v4055_v18, %v3854_v54  ;;  %v912_v0 = vsub.f32 %v4058_v22, %v3854_v54  ;;  %v3055_v22 = vld [vmem:[%s4977_s19 + $0x38] sm:$0xff]  }
 0x140   : > { %5004 = vst [vmem:[#allocation43_spill] sm:$0xff] %v5003_v34  ;;  %v913_v63 = vsub.f32 %v4061_v23, %v3854_v54  ;;  %v986_v8 = vrot.slane %v981_v46, %v3848_v51  ;;  %v990_v10 = vrot.slane %v981_v46, %v3852_v52  ;;  %v994_v55 = vrot.slane %v981_v46, %v3856_v56 }
 0x141   : > { %v998_v11 = vrot.slane %v981_v46, %v3858_v57  ;;  %v918_v2 = vand.u32 2147483647, %v910_v43  ;;  %v919_v60 = vand.u32 2147483647, %v911_v62  ;;  %v920_v44 = vand.u32 2147483647, %v912_v0  ;;  %2910 = vmatprep.subr.bf16.mxu1 %v3273_v1  ;;  %2278 = vmatpush1.bf16.msra.mxu0 %v3054_v26 }
 0x142   : > { %v921_v41 = vand.u32 2147483647, %v913_v63  ;;  %v1003_v13 = vsub.f32 %v986_v8, %v3846_v50  ;;  %v1004_v9 = vsub.f32 %v990_v10, %v3846_v50  ;;  %v1005_v40 = vsub.f32 %v994_v55, %v3846_v50  ;;  %2279 = vmatprep.subr.bf16.mxu0 %v3273_v1  ;;  %2926 = vmatpush1.bf16.msra.mxu1 %v3054_v26 }
 0x143   : > { %v926_v7 = vsub.f32 1.0, %v918_v2  ;;  %v927_v46 = vsub.f32 1.0, %v919_v60  ;;  %v928_v5 = vsub.f32 1.0, %v920_v44  ;;  %v1006_v43 = vsub.f32 %v998_v11, %v3846_v50  ;;  %2911 = vmatprep.subr.bf16.mxu1 %v3273_v1 }
 0x144   : > { %v929_v62 = vsub.f32 1.0, %v921_v41  ;;  %v1007_v0 = vsub.f32 %v986_v8, %v3854_v54  ;;  %v1008_v63 = vsub.f32 %v990_v10, %v3854_v54  ;;  %v1009_v42 = vsub.f32 %v994_v55, %v3854_v54 }
 0x145   : > { %v934_v6 = vmax.f32 %v926_v7, 0.0  ;;  %v935_v4 = vmax.f32 %v927_v46, 0.0  ;;  %v936_v23 = vmax.f32 %v928_v5, 0.0  ;;  %v1010_v2 = vsub.f32 %v998_v11, %v3854_v54  ;;  %2280 = vmatpush1.bf16.msra.mxu0 %v3055_v22 }
 0x146   : > { %v937_v44 = vmax.f32 %v929_v62, 0.0  ;;  %v1011_v60 = vand.u32 2147483647, %v1003_v13  ;;  %v1012_v39 = vand.u32 2147483647, %v1004_v9  ;;  %v1047_v41 = vrot.slane %v4037_v47, %v3856_v56  ;;  %2281 = vmatprep.subr.bf16.mxu0 %v3273_v1  ;;  %2927 = vmatpush1.bf16.msra.mxu1 %v3055_v22 }
 0x147   : > { %v963_v8 = vsel %vm4064_vm11, %v934_v6, 0.0  ;;  %v964_v7 = vsel %vm4068_vm12, %v935_v4, 0.0  ;;  %v965_v5 = vsel %vm4072_vm13, %v936_v23, 0.0  ;;  %v1013_v54 = vand.u32 2147483647, %v1005_v40  ;;  %2912 = vmatprep.subr.bf16.mxu1 %v3273_v1 }
 0x148   : > { %v966_v9 = vsel %vm4076_vm1, %v937_v44, 0.0  ;;  %v5005_v13 = vsel %vm3899_vm14, %v3941_v48, 0.0  ;;  %v5006_v6 = vsel %vm3903_vm15, %v3943_v49, 0.0  ;;  %v1051_v4 = vrot.slane %v4037_v47, %v3858_v57 }
 0x149   : > { %v971_v26 = vadd.f32 %v963_v8, %v5005_v13  ;;  %v972_v10 = vadd.f32 %v964_v7, %v5006_v6  ;;  %v5007_v40 = vsel %vm3907_vm0, %v3945_v53, 0.0  ;;  %v1014_v55 = vand.u32 2147483647, %v1006_v43 }
 0x14a   : > { %v973_v23 = vadd.f32 %v965_v5, %v5007_v40  ;;  %v1015_v11 = vand.u32 2147483647, %v1007_v0  ;;  %v1016_v46 = vand.u32 2147483647, %v1008_v63  ;;  %v1017_v48 = vand.u32 2147483647, %v1009_v42 }
 0x14b   : > { %v1018_v62 = vand.u32 2147483647, %v1010_v2  ;;  %v1019_v44 = vsub.f32 1.0, %v1011_v60  ;;  %v1020_v49 = vsub.f32 1.0, %v1012_v39  ;;  %v1021_v8 = vsub.f32 1.0, %v1013_v54  ;;  %v3056_v42 = vld [vmem:[%s4977_s19 + $0x40] sm:$0xff]  }
 0x14c   : > { %v1022_v7 = vsub.f32 1.0, %v1014_v55  ;;  %v1023_v13 = vsub.f32 1.0, %v1015_v11  ;;  %v1024_v6 = vsub.f32 1.0, %v1016_v46  ;;  %v1025_v57 = vsub.f32 1.0, %v1017_v48  ;;  %2282 = vmatpush1.bf16.msra.mxu0 %v3056_v42  ;;  %2928 = vmatpush1.bf16.msra.mxu1 %v3056_v42 }
 0x14d   : > { %v1026_v53 = vsub.f32 1.0, %v1018_v62  ;;  %v1027_v5 = vmax.f32 %v1019_v44, 0.0  ;;  %v1028_v43 = vmax.f32 %v1020_v49, 0.0  ;;  %v1029_v0 = vmax.f32 %v1021_v8, 0.0  ;;  %2283 = vmatprep.subr.bf16.mxu0 %v3273_v1  ;;  %2913 = vmatprep.subr.bf16.mxu1 %v3273_v1 }
 0x14e   : > { %v1030_v63 = vmax.f32 %v1022_v7, 0.0  ;;  %v1031_v40 = vmax.f32 %v1023_v13, 0.0  ;;  %v1032_v34 = vmax.f32 %v1024_v6, 0.0  ;;  %v1033_v2 = vmax.f32 %v1025_v57, 0.0  ;;  %v3057_v13 = vld [vmem:[%s4977_s19 + $0x48] sm:$0xff]  }
 0x14f   : > { %v1034_v60 = vmax.f32 %v1026_v53, 0.0  ;;  %v5008_v22 = vrot.slane %v4037_v47, %v3848_v51  ;;  %v5011_v54 = vrot.slane %v4037_v47, %v3852_v52  ;;  %v5014_v11 = vsel %vm3937_vm3, %v3947_v58, 0.0 }
 0x150   : > { %v974_v57 = vadd.f32 %v966_v9, %v5014_v11  ;;  %vm4155_vm8 = vcmp.eq.s32.totalorder %v1047_v41, 1  ;;  %vm4159_vm9 = vcmp.eq.s32.totalorder %v1051_v4, 1  ;;  %v5019_v8 = vsel %vm3990_vm5, %v3970_v29, 0.0  ;;  %2284 = vmatpush1.bf16.msra.mxu0 %v3057_v13  ;;  %2929 = vmatpush1.bf16.msra.mxu1 %v3057_v13  ;;  %v5027_v13 = vld [vmem:[#allocation41_spill] sm:$0xff] }
 0x151   : > { %vm4140_vm2 = vcmp.eq.s32.totalorder %v5008_v22, 1  ;;  %vm4147_vm7 = vcmp.eq.s32.totalorder %v5011_v54, 1  ;;  %v1058_v58 = vsel %vm4155_vm8, %v1029_v0, 0.0  ;;  %v1059_v41 = vsel %vm4159_vm9, %v1030_v63, 0.0  ;;  %2285 = vmatprep.subr.bf16.mxu0 %v3273_v1  ;;  %2914 = vmatprep.subr.bf16.mxu1 %v3273_v1 }
 0x152   : > { %v1057_v47 = vsel %vm4147_vm7, %v1028_v43, 0.0  ;;  %v1056_v62 = vsel %vm4140_vm2, %v1027_v5, 0.0  ;;  %v1060_v9 = vsel %vm4140_vm2, %v1031_v40, 0.0  ;;  %v1061_v4 = vsel %vm4147_vm7, %v1032_v34, 0.0 }
 0x153   : > { %v1062_v44 = vsel %vm4155_vm8, %v1033_v2, 0.0  ;;  %v1063_v49 = vsel %vm4159_vm9, %v1034_v60, 0.0  ;;  %v1066_v7 = vadd.f32 %v1058_v58, %v5019_v8  ;;  %v5020_v6 = vsel %vm3949_vm4, %v3968_v28, 0.0 }
 0x154   : > { %v1065_v53 = vadd.f32 %v1057_v47, %v5020_v6  ;;  %v5021_v34 = vsel %vm3997_vm6, %v3976_v31, 0.0  ;;  %v5022_v43 = vsel %vm3990_vm5, %v3980_v33, 0.0  ;;  %v5023_v29 = vsel %vm3997_vm6, %v3985_v36, 0.0 }
 0x155   : > { %v1067_v5 = vadd.f32 %v1059_v41, %v5021_v34  ;;  %v1070_v0 = vadd.f32 %v1062_v44, %v5022_v43  ;;  %v1071_v63 = vadd.f32 %v1063_v49, %v5023_v29  ;;  %v1076_v40 = vmul.f32 0.25, %v971_v26  ;;  %v3060_v43 = vld [vmem:[%s4977_s19 + $0x60] sm:$0xff]  }
 0x156   : > { %v1077_v42 = vmul.f32 0.25, %v972_v10  ;;  %v1078_v28 = vmul.f32 0.25, %v973_v23  ;;  %v1079_v2 = vmul.f32 0.25, %v974_v57  ;;  %v5024_v31 = vsel %vm3949_vm4, %v3978_v32, 0.0  ;;  %v3058_v32 = vld [vmem:[%s4977_s19 + $0x50] sm:$0xff]  }
 0x157   : > { %v1069_v37 = vadd.f32 %v1061_v4, %v5024_v31  ;;  %v4206_v60 = vpack.c.bf16 %v1070_v0, %v1066_v7  ;;  %v4208_v33 = vpack.c.bf16 %v1071_v63, %v1067_v5  ;;  %v5025_v36 = vrot.slane %v3861_v59, %v3848_v51  ;;  %2286 = vmatpush1.bf16.msra.mxu0 %v3058_v32 }
 0x158   : > { %v2872_v38 = vpack.c.bf16 %v1077_v42, %v1076_v40  ;;  %v2874_v26 = vpack.c.bf16 %v1079_v2, %v1078_v28  ;;  %v713_v39 = vsub.f32 %v3890_v15, %v3846_v50  ;;  %v714_v59 = vsub.f32 %v3893_v16, %v3846_v50  ;;  %2930 = vmatpush1.bf16.msra.mxu1 %v3058_v32 }
 0x159   : > { %vm858_vm5 = vcmp.eq.s32.totalorder %v5025_v36, 1  ;;  %v715_v11 = vsub.f32 %v3896_v17, %v3846_v50  ;;  %2287 = vmatprep.subr.bf16.mxu0 %v3273_v1  ;;  %2915 = vmatprep.subr.bf16.mxu1 %v3273_v1  ;;  %v4234_v58 = vpack.c.bf16 %v1069_v37, %v1065_v53  ;;  %v906_v44 = vsub.f32 %v4052_v12, %v3846_v50 }
 0x15a   : > { %v862_v10 = vsel %vm858_vm5, %v3974_v30, 0.0  ;;  %v866_v3 = vsel %vm858_vm5, %v3983_v35, 0.0  ;;  %v1109_v54 = vrot.slane %v2872_v38, %v3865_v61  ;;  %v1123_v55 = vrot.slane %v2874_v26, %v3865_v61 }
 0x15b   : > { %v1064_v23 = vadd.f32 %v1056_v62, %v862_v10  ;;  %v1068_v22 = vadd.f32 %v1060_v9, %v866_v3  ;;  %v5026_v30 = vsub.f32 %v3887_v14, %v3846_v50  ;;  %v721_v57 = vand.u32 2147483647, %v713_v39  ;;  %v3059_v62 = vld [vmem:[%s4977_s19 + $0x58] sm:$0xff]  }
 0x15c   : > { %v722_v46 = vand.u32 2147483647, %v714_v59  ;;  %v1126_v15 = vcombine.low %v1109_v54, %v1123_v55  ;;  %v1127_v16 = vcombine.high %v1109_v54, %v1123_v55  ;;  %v4231_v48 = vand.u32 2147483647, %v715_v11  ;;  %2288 = vmatpush1.bf16.msra.mxu0 %v3059_v62  ;;  %2931 = vmatpush1.bf16.msra.mxu1 %v3059_v62  ;;  %v3061_v55 = vld [vmem:[%s4977_s19 + $0x68] sm:$0xff]  }
 0x15d   : > { %v720_v35 = vand.u32 2147483647, %v5026_v30  ;;  %v4236_v17 = vpack.c.bf16 %v1068_v22, %v1064_v23  ;;  %v729_v14 = vsub.f32 1.0, %v721_v57  ;;  %v907_v7 = vsub.f32 %v4055_v18, %v3846_v50  ;;  %2289 = vmatprep.subr.bf16.mxu0 %v3273_v1  ;;  %2916 = vmatprep.subr.bf16.mxu1 %v3273_v1 }
 0x15e   : > { %v730_v41 = vsub.f32 1.0, %v722_v46  ;;  %v1141_v9 = vrot.slane %v1126_v15, %v3865_v61  ;;  %v1155_v4 = vrot.slane %v1127_v16, %v3865_v61  ;;  %v731_v49 = vsub.f32 1.0, %v4231_v48 }
 0x15f   : > { %v728_v47 = vsub.f32 1.0, %v720_v35  ;;  %v908_v6 = vsub.f32 %v5027_v13, %v3846_v50  ;;  %v4256_v63 = vmax.f32 %v729_v14, 0.0 }
 0x160   : > { %v4251_v53 = vpack.i.b16 %v1141_v9, %v1141_v9  ;;  %v1169_v34 = vunpack.i.h.s16 %v1141_v9  ;;  %v4253_v12 = vpack.i.b16 %v1155_v4, %v1155_v4  ;;  %v1171_v5 = vunpack.i.h.s16 %v1155_v4  ;;  %2290 = vmatpush1.bf16.msra.mxu0 %v3060_v43  ;;  %2932 = vmatpush1.bf16.msra.mxu1 %v3060_v43  ;;  %v5028_v43 = vld [vmem:[#allocation42_spill] sm:$0xff] }
 0x161   : > { %v4243_v8 = vmax.f32 %v728_v47, 0.0  ;;  %v1157_v0 = vcombine.high %v1141_v9, %v1141_v9  ;;  %v1159_v29 = vcombine.high %v1155_v4, %v1155_v4  ;;  %v4258_v40 = vmax.f32 %v730_v41, 0.0  ;;  %2291 = vmatprep.subr.bf16.mxu0 %v3273_v1  ;;  %2917 = vmatprep.subr.bf16.mxu1 %v3273_v1  ;;  %v3062_v4 = vld [vmem:[%s4977_s19 + $0x70] sm:$0xff]  }
 0x162   : > { %v1327_v42 = vrot.slane %v4251_v53, %v3852_v52  ;;  %v1323_v28 = vrot.slane %v4251_v53, %v3848_v51  ;;  %v4264_v2 = vpack.i.b16 %v1169_v34, %v1169_v34  ;;  %v1359_v31 = vrot.slane %v4253_v12, %v3852_v52 }
 0x163   : > { %v1355_v37 = vrot.slane %v4253_v12, %v3848_v51  ;;  %v4270_v36 = vpack.i.b16 %v1171_v5, %v1171_v5  ;;  %v4272_v38 = vpack.i.b16 %v1157_v0, %v1157_v0  ;;  %v1173_v26 = vunpack.i.h.s16 %v1157_v0 }
 0x164   : > { %v1680_v10 = vpack.i.b16 %v1327_v42, %v1327_v42  ;;  %v1673_v3 = vpack.i.b16 %v1323_v28, %v1323_v28  ;;  %v1343_v32 = vrot.slane %v4264_v2, %v3852_v52  ;;  %v1339_v23 = vrot.slane %v4264_v2, %v3848_v51  ;;  %2292 = vmatpush1.bf16.msra.mxu0 %v3061_v55 }
 0x165   : > { %v1736_v22 = vpack.i.b16 %v1359_v31, %v1359_v31  ;;  %v1729_v39 = vpack.i.b16 %v1355_v37, %v1355_v37  ;;  %v1375_v59 = vrot.slane %v4270_v36, %v3852_v52  ;;  %v1371_v54 = vrot.slane %v4270_v36, %v3848_v51  ;;  %2293 = vmatprep.subr.bf16.mxu0 %v3273_v1 }
 0x166   : > { %v1685_v11 = vrot.slane %v1680_v10, %v3848_v51  ;;  %v1678_v30 = vrot.slane %v1673_v3, %v3848_v51  ;;  %v1708_v35 = vpack.i.b16 %v1343_v32, %v1343_v32  ;;  %v1701_v57 = vpack.i.b16 %v1339_v23, %v1339_v23  ;;  %2933 = vmatpush1.bf16.msra.mxu1 %v3061_v55  ;;  %v3063_v55 = vld [vmem:[%s4977_s19 + $0x78] sm:$0xff]  }
 0x167   : > { %v1741_v46 = vrot.slane %v1736_v22, %v3848_v51  ;;  %v1734_v15 = vrot.slane %v1729_v39, %v3848_v51  ;;  %v1764_v16 = vpack.i.b16 %v1375_v59, %v1375_v59  ;;  %v1757_v47 = vpack.i.b16 %v1371_v54, %v1371_v54  ;;  %2918 = vmatprep.subr.bf16.mxu1 %v3273_v1 }
 0x168   : > { %v1929_v62 = vmul.bf16 %v1685_v11, %v4234_v58  ;;  %v1928_v14 = vmul.bf16 %v1678_v30, %v4236_v17  ;;  %v1713_v41 = vrot.slane %v1708_v35, %v3848_v51  ;;  %v1706_v9 = vrot.slane %v1701_v57, %v3848_v51  ;;  %2294 = vmatpush1.bf16.msra.mxu0 %v3062_v4 }
 0x169   : > { %v1937_v34 = vmul.bf16 %v1741_v46, %v4234_v58  ;;  %v4297_v5 = vrot.slane %v1764_v16, %v3848_v51  ;;  %v909_v0 = vsub.f32 %v5028_v43, %v3846_v50  ;;  %v4301_v42 = vand.u32 2147483647, %v906_v44  ;;  %2295 = vmatprep.subr.bf16.mxu0 %v3273_v1 }
 0x16a   : > { %2121 = vxpose.xlu1.c.b16.start [1/8] %v1929_v62, 128  ;;  %2105 = vxpose.xlu0.c.b16.start [1/8] %v1928_v14, 128  ;;  %v1933_v28 = vmul.bf16 %v1713_v41, %v4234_v58  ;;  %v1932_v31 = vmul.bf16 %v1706_v9, %v4236_v17  ;;  %v1391_v37 = vrot.slane %v4272_v38, %v3852_v52  ;;  %v1175_v10 = vunpack.i.h.s16 %v1159_v29 }
 0x16b   : > { %v1936_v3 = vmul.bf16 %v1734_v15, %v4236_v17  ;;  %v1762_v32 = vrot.slane %v1757_v47, %v3848_v51  ;;  %v1387_v44 = vrot.slane %v4272_v38, %v3848_v51  ;;  %v4311_v23 = vpack.i.b16 %v1173_v26, %v1173_v26  ;;  %2934 = vmatpush1.bf16.msra.mxu1 %v3062_v4 }
 0x16c   : > { %v1792_v22 = vpack.i.b16 %v1391_v37, %v1391_v37  ;;  %v4313_v39 = vpack.i.b16 %v1159_v29, %v1159_v29  ;;  %v4315_v59 = vpack.i.b16 %v1175_v10, %v1175_v10  ;;  %v4319_v54 = vmax.f32 %v731_v49, 0.0  ;;  %2296 = vmatpush1.bf16.msra.mxu0 %v3063_v55  ;;  %2919 = vmatprep.subr.bf16.mxu1 %v3273_v1 }
 0x16d   : > { %v1941_v11 = vmul.bf16 %v4297_v5, %v4234_v58  ;;  %v1785_v26 = vpack.i.b16 %v1387_v44, %v1387_v44  ;;  %v1407_v30 = vrot.slane %v4311_v23, %v3852_v52  ;;  %v1403_v29 = vrot.slane %v4311_v23, %v3848_v51 }
 0x16e   : > { %2122 = vxpose.xlu1.c.b16.cont [2/8] %v1933_v28, 128  ;;  %2106 = vxpose.xlu0.c.b16.cont [2/8] %v1932_v31, 128  ;;  %v1797_v48 = vrot.slane %v1792_v22, %v3848_v51  ;;  %v1423_v49 = vrot.slane %v4313_v39, %v3852_v52  ;;  %v1419_v35 = vrot.slane %v4313_v39, %v3848_v51  ;;  %v765_v57 = vsel %vm3899_vm14, %v4243_v8, 0.0 }
 0x16f   : > { %v1790_v46 = vrot.slane %v1785_v26, %v3848_v51  ;;  %v1820_v15 = vpack.i.b16 %v1407_v30, %v1407_v30  ;;  %v1813_v16 = vpack.i.b16 %v1403_v29, %v1403_v29  ;;  %v1439_v47 = vrot.slane %v4315_v59, %v3852_v52  ;;  %2935 = vmatpush1.bf16.msra.mxu1 %v3063_v55 }
 0x170   : > { %v1940_v62 = vmul.bf16 %v1762_v32, %v4236_v17  ;;  %v1848_v14 = vpack.i.b16 %v1423_v49, %v1423_v49  ;;  %v1841_v41 = vpack.i.b16 %v1419_v35, %v1419_v35  ;;  %v1435_v9 = vrot.slane %v4315_v59, %v3848_v51 }
 0x171   : > { %v1825_v19 = vrot.slane %v1820_v15, %v3848_v51  ;;  %v1818_v8 = vrot.slane %v1813_v16, %v3848_v51  ;;  %v1876_v4 = vpack.i.b16 %v1439_v47, %v1439_v47  ;;  %v766_v5 = vsel %vm3903_vm15, %v4256_v63, 0.0 }
 0x172   : > { %2123 = vxpose.xlu1.c.b16.cont [3/8] %v1937_v34, 128  ;;  %2107 = vxpose.xlu0.c.b16.cont [3/8] %v1936_v3, 128  ;;  %v4351_v43 = vrot.slane %v1848_v14, %v3848_v51  ;;  %v767_v28 = vsel %vm3907_vm0, %v4258_v40, 0.0  ;;  %v768_v1 = vsel %vm3937_vm3, %v4319_v54, 0.0  ;;  %v915_v31 = vand.u32 2147483647, %v907_v7 }
 0x173   : > { %v1945_v20 = vmul.bf16 %v1797_v48, %v4234_v58  ;;  %v1944_v63 = vmul.bf16 %v1790_v46, %v4236_v17  ;;  %v4365_v34 = vrot.slane %v1841_v41, %v3848_v51  ;;  %v916_v21 = vand.u32 2147483647, %v908_v6 }
 0x174   : > { %v1949_v40 = vmul.bf16 %v1825_v19, %v4234_v58  ;;  %v1948_v45 = vmul.bf16 %v1818_v8, %v4236_v17  ;;  %v1869_v37 = vpack.i.b16 %v1435_v9, %v1435_v9  ;;  %v917_v10 = vand.u32 2147483647, %v909_v0 }
 0x175   : > { %v4373_v18 = vrot.slane %v1876_v4, %v3848_v51  ;;  %v922_v7 = vsub.f32 1.0, %v4301_v42  ;;  %v923_v3 = vsub.f32 1.0, %v915_v31  ;;  %v924_v32 = vsub.f32 1.0, %v916_v21 }
 0x176   : > { %2124 = vxpose.xlu1.c.b16.cont [4/8] %v1941_v11, 128  ;;  %2108 = vxpose.xlu0.c.b16.cont [4/8] %v1940_v62, 128  ;;  %v1953_v44 = vmul.bf16 %v4351_v43, %v4234_v58  ;;  %v925_v50 = vsub.f32 1.0, %v917_v10  ;;  %v1331_v13 = vrot.slane %v4251_v53, %v3856_v56  ;;  %v1347_v6 = vrot.slane %v4264_v2, %v3856_v56  ;;  %v5030_v10 = vld [vmem:[#allocation40_spill] sm:$0xff] }
 0x177   : > { %v930_v0 = vmax.f32 %v922_v7, 0.0  ;;  %v931_v22 = vmax.f32 %v923_v3, 0.0  ;;  %v932_v54 = vmax.f32 %v924_v32, 0.0  ;;  %v1363_v42 = vrot.slane %v4253_v12, %v3856_v56 }
 0x178   : > { %v1952_v55 = vmul.bf16 %v4365_v34, %v4236_v17  ;;  %v933_v11 = vmax.f32 %v925_v50, 0.0  ;;  %v1687_v26 = vpack.i.b16 %v1331_v13, %v1331_v13  ;;  %v1715_v30 = vpack.i.b16 %v1347_v6, %v1347_v6 }
 0x179   : > { %v959_v29 = vsel %vm4064_vm11, %v930_v0, 0.0  ;;  %v960_v48 = vsel %vm4068_vm12, %v931_v22, 0.0  ;;  %v961_v49 = vsel %vm4072_vm13, %v932_v54, 0.0  ;;  %v1743_v35 = vpack.i.b16 %v1363_v42, %v1363_v42 }
 0x17a   : > { %2125 = vxpose.xlu1.c.b16.cont [5/8] %v1945_v20, 128  ;;  %2109 = vxpose.xlu0.c.b16.cont [5/8] %v1944_v63, 128  ;;  %v962_v15 = vsel %vm4076_vm1, %v933_v11, 0.0  ;;  %v967_v16 = vadd.f32 %v959_v29, %v765_v57  ;;  %v968_v47 = vadd.f32 %v960_v48, %v766_v5  ;;  %v969_v62 = vadd.f32 %v961_v49, %v767_v28 }
 0x17b   : > { %v970_v14 = vadd.f32 %v962_v15, %v768_v1  ;;  %v4395_v41 = vrot.slane %v1687_v26, %v3848_v51  ;;  %v4398_v24 = vrot.slane %v1715_v30, %v3848_v51  ;;  %v4401_v25 = vrot.slane %v1743_v35, %v3848_v51 }
 0x17c   : > { %v1874_v27 = vrot.slane %v1869_v37, %v3848_v51  ;;  %v1072_v9 = vmul.f32 0.25, %v967_v16  ;;  %v1073_v19 = vmul.f32 0.25, %v968_v47  ;;  %v1074_v8 = vmul.f32 0.25, %v969_v62 }
 0x17d   : > { %v1075_v4 = vmul.f32 0.25, %v970_v14  ;;  %v1930_v57 = vmul.bf16 %v4395_v41, %v4206_v60  ;;  %v1934_v5 = vmul.bf16 %v4398_v24, %v4206_v60  ;;  %v1938_v43 = vmul.bf16 %v4401_v25, %v4206_v60 }
 0x17e   : > { %2126 = vxpose.xlu1.c.b16.cont [6/8] %v1949_v40, 128  ;;  %2110 = vxpose.xlu0.c.b16.cont [6/8] %v1948_v45, 128  ;;  %v1957_v28 = vmul.bf16 %v4373_v18, %v4234_v58  ;;  %v2871_v1 = vpack.c.bf16 %v1073_v19, %v1072_v9  ;;  %v1395_v31 = vrot.slane %v4272_v38, %v3856_v56 }
 0x17f   : > { %v2873_v20 = vpack.c.bf16 %v1075_v4, %v1074_v8  ;;  %v1411_v63 = vrot.slane %v4311_v23, %v3856_v56  ;;  %v1427_v34 = vrot.slane %v4313_v39, %v3856_v56  ;;  %v1443_v21 = vrot.slane %v4315_v59, %v3856_v56 }
 0x180   : > { %v1956_v40 = vmul.bf16 %v1874_v27, %v4236_v17  ;;  %v1102_v45 = vrot.slane %v2871_v1, %v3865_v61  ;;  %v1799_v37 = vpack.i.b16 %v1395_v31, %v1395_v31  ;;  %v1335_v18 = vrot.slane %v4251_v53, %v5030_v10 }
 0x181   : > { %v1116_v7 = vrot.slane %v2873_v20, %v3865_v61  ;;  %v1827_v3 = vpack.i.b16 %v1411_v63, %v1411_v63  ;;  %v1855_v32 = vpack.i.b16 %v1427_v34, %v1427_v34  ;;  %v1883_v50 = vpack.i.b16 %v1443_v21, %v1443_v21 }
 0x182   : > { %2127 = vxpose.xlu1.c.b16.cont [7/8] %v1953_v44, 128  ;;  %2111 = vxpose.xlu0.c.b16.cont [7/8] %v1952_v55, 128  ;;  %v4426_v13 = vrot.slane %v1799_v37, %v3848_v51  ;;  %v1694_v6 = vpack.i.b16 %v1335_v18, %v1335_v18  ;;  %v1351_v0 = vrot.slane %v4264_v2, %v5030_v10 }
 0x183   : > { %v1124_v22 = vcombine.low %v1102_v45, %v1116_v7  ;;  %v1125_v54 = vcombine.high %v1102_v45, %v1116_v7  ;;  %v4431_v42 = vrot.slane %v1827_v3, %v3848_v51  ;;  %v4434_v53 = vrot.slane %v1855_v32, %v3848_v51 }
 0x184   : > { %v1946_v11 = vmul.bf16 %v4426_v13, %v4206_v60  ;;  %v4439_v44 = vrot.slane %v1883_v50, %v3848_v51  ;;  %v4442_v55 = vrot.slane %v1694_v6, %v3848_v51  ;;  %v1722_v26 = vpack.i.b16 %v1351_v0, %v1351_v0 }
 0x185   : > { %v1134_v2 = vrot.slane %v1124_v22, %v3865_v61  ;;  %v1148_v30 = vrot.slane %v1125_v54, %v3865_v61  ;;  %v1950_v29 = vmul.bf16 %v4431_v42, %v4206_v60  ;;  %v1954_v48 = vmul.bf16 %v4434_v53, %v4206_v60 }
 0x186   : > { %2128 = vxpose.xlu1.c.b16.end [8/8] %v1957_v28, 128  ;;  %2112 = vxpose.xlu0.c.b16.end [8/8] %v1956_v40, 128  ;;  %v1958_v49 = vmul.bf16 %v4439_v44, %v4206_v60  ;;  %v1931_v35 = vmul.bf16 %v4442_v55, %v4208_v33  ;;  %v4455_v46 = vrot.slane %v1722_v26, %v3848_v51 }
 0x187   : > { %v4457_v15 = vpack.i.b16 %v1134_v2, %v1134_v2  ;;  %v1161_v61 = vunpack.i.h.s16 %v1134_v2  ;;  %v4459_v16 = vpack.i.b16 %v1148_v30, %v1148_v30  ;;  %v1163_v47 = vunpack.i.h.s16 %v1148_v30 }
 0x188   : > { %v1156_v62 = vcombine.high %v1134_v2, %v1134_v2  ;;  %v1935_v14 = vmul.bf16 %v4455_v46, %v4208_v33  ;;  %v1158_v0 = vcombine.high %v1148_v30, %v1148_v30  ;;  %v1383_v42 = vrot.slane %v4270_v36, %v5030_v10 }
 0x189   : > { %v1199_v27 = vrot.slane %v4457_v15, %v3852_v52  ;;  %v1195_v9 = vrot.slane %v4457_v15, %v3848_v51  ;;  %v4467_v19 = vpack.i.b16 %v1161_v61, %v1161_v61  ;;  %v1231_v8 = vrot.slane %v4459_v16, %v3852_v52 }
 0x18a   : > { %v1227_v4 = vrot.slane %v4459_v16, %v3848_v51  ;;  %v4473_v28 = vpack.i.b16 %v1163_v47, %v1163_v47  ;;  %v4475_v1 = vpack.i.b16 %v1156_v62, %v1156_v62  ;;  %v1165_v6 = vunpack.i.h.s16 %v1156_v62 }
 0x18b   : > { %v1456_v31 = vpack.i.b16 %v1199_v27, %v1199_v27  ;;  %v1449_v20 = vpack.i.b16 %v1195_v9, %v1195_v9  ;;  %v1215_v63 = vrot.slane %v4467_v19, %v3852_v52  ;;  %v1211_v34 = vrot.slane %v4467_v19, %v3848_v51 }
 0x18c   : > { %v1512_v21 = vpack.i.b16 %v1231_v8, %v1231_v8  ;;  %v1505_v40 = vpack.i.b16 %v1227_v4, %v1227_v4  ;;  %v1247_v45 = vrot.slane %v4473_v28, %v3852_v52  ;;  %v1243_v37 = vrot.slane %v4473_v28, %v3848_v51 }
 0x18d   : > { %v1461_v18 = vrot.slane %v1456_v31, %v3848_v51  ;;  %v1454_v7 = vrot.slane %v1449_v20, %v3848_v51  ;;  %v1484_v3 = vpack.i.b16 %v1215_v63, %v1215_v63  ;;  %v1477_v32 = vpack.i.b16 %v1211_v34, %v1211_v34 }
 0x18e   : > { %v1517_v50 = vrot.slane %v1512_v21, %v3848_v51  ;;  %v1510_v61 = vrot.slane %v1505_v40, %v3848_v51  ;;  %v1540_v47 = vpack.i.b16 %v1247_v45, %v1247_v45  ;;  %v1533_v27 = vpack.i.b16 %v1243_v37, %v1243_v37 }
 0x18f   : > { %v1897_v22 = vmul.bf16 %v1461_v18, %v4234_v58  ;;  %v1896_v54 = vmul.bf16 %v1454_v7, %v4236_v17  ;;  %v1489_v26 = vrot.slane %v1484_v3, %v3848_v51  ;;  %v1482_v2 = vrot.slane %v1477_v32, %v3848_v51 }
 0x190   : > { %v1263_v30 = vrot.slane %v4475_v1, %v3852_v52  ;;  %v1167_v62 = vunpack.i.h.s16 %v1158_v0  ;;  %v1259_v4 = vrot.slane %v4475_v1, %v3848_v51  ;;  %v4499_v31 = vpack.i.b16 %v1165_v6, %v1165_v6 }
 0x191   : > { %2057 = vxpose.xlu1.c.b16.start [1/8] %v1897_v22, 128  ;;  %2041 = vxpose.xlu0.c.b16.start [1/8] %v1896_v54, 128  ;;  %v1901_v9 = vmul.bf16 %v1489_v26, %v4234_v58  ;;  %v1900_v8 = vmul.bf16 %v1482_v2, %v4236_v17  ;;  %v1905_v20 = vmul.bf16 %v1517_v50, %v4234_v58 }
 0x192   : > { %v4502_v63 = vpack.i.b16 %v1158_v0, %v1158_v0  ;;  %v4504_v34 = vpack.i.b16 %v1167_v62, %v1167_v62  ;;  %v1545_v21 = vrot.slane %v1540_v47, %v3848_v51  ;;  %v1538_v40 = vrot.slane %v1533_v27, %v3848_v51 }
 0x193   : > { %v1568_v45 = vpack.i.b16 %v1263_v30, %v1263_v30  ;;  %v1561_v37 = vpack.i.b16 %v1259_v4, %v1259_v4  ;;  %v1904_v18 = vmul.bf16 %v1510_v61, %v4236_v17  ;;  %v1279_v7 = vrot.slane %v4499_v31, %v3852_v52 }
 0x194   : > { %v1275_v3 = vrot.slane %v4499_v31, %v3848_v51  ;;  %v1295_v32 = vrot.slane %v4502_v63, %v3852_v52  ;;  %v1291_v50 = vrot.slane %v4502_v63, %v3848_v51  ;;  %v1311_v6 = vrot.slane %v4504_v34, %v3852_v52 }
 0x195   : > { %2058 = vxpose.xlu1.c.b16.cont [2/8] %v1901_v9, 128  ;;  %2042 = vxpose.xlu0.c.b16.cont [2/8] %v1900_v8, 128  ;;  %v1909_v0 = vmul.bf16 %v1545_v21, %v4234_v58  ;;  %v1908_v22 = vmul.bf16 %v1538_v40, %v4236_v17  ;;  %v1573_v54 = vrot.slane %v1568_v45, %v3848_v51 }
 0x196   : > { %v1566_v26 = vrot.slane %v1561_v37, %v3848_v51  ;;  %v1596_v2 = vpack.i.b16 %v1279_v7, %v1279_v7  ;;  %v1589_v61 = vpack.i.b16 %v1275_v3, %v1275_v3  ;;  %v1307_v47 = vrot.slane %v4504_v34, %v3848_v51 }
 0x197   : > { %v1624_v27 = vpack.i.b16 %v1295_v32, %v1295_v32  ;;  %v1617_v9 = vpack.i.b16 %v1291_v50, %v1291_v50  ;;  %v1652_v8 = vpack.i.b16 %v1311_v6, %v1311_v6  ;;  %v1203_v52 = vrot.slane %v4457_v15, %v3856_v56 }
 0x198   : > { %v1913_v30 = vmul.bf16 %v1573_v54, %v4234_v58  ;;  %v1912_v62 = vmul.bf16 %v1566_v26, %v4236_v17  ;;  %v1601_v4 = vrot.slane %v1596_v2, %v3848_v51  ;;  %v1645_v21 = vpack.i.b16 %v1307_v47, %v1307_v47 }
 0x199   : > { %2059 = vxpose.xlu1.c.b16.cont [3/8] %v1905_v20, 128  ;;  %2043 = vxpose.xlu0.c.b16.cont [3/8] %v1904_v18, 128  ;;  %v1594_v20 = vrot.slane %v1589_v61, %v3848_v51  ;;  %v1629_v40 = vrot.slane %v1624_v27, %v3848_v51  ;;  %v1219_v45 = vrot.slane %v4467_v19, %v3856_v56 }
 0x19a   : > { %v4536_v37 = vrot.slane %v4270_v36, %v3856_v56  ;;  %v1622_v18 = vrot.slane %v1617_v9, %v3848_v51  ;;  %v1657_v7 = vrot.slane %v1652_v8, %v3848_v51  ;;  %v1463_v3 = vpack.i.b16 %v1203_v52, %v1203_v52 }
 0x19b   : > { %v1207_v32 = vrot.slane %v4457_v15, %v5030_v10  ;;  %v1367_v50 = vrot.slane %v4253_v12, %v5030_v10  ;;  %v1917_v6 = vmul.bf16 %v1601_v4, %v4234_v58  ;;  %v1921_v54 = vmul.bf16 %v1629_v40, %v4234_v58 }
 0x19c   : > { %v1491_v26 = vpack.i.b16 %v1219_v45, %v1219_v45  ;;  %v1771_v2 = vpack.i.b16 %v4536_v37, %v4536_v37  ;;  %v1920_v15 = vmul.bf16 %v1622_v18, %v4236_v17  ;;  %v1925_v47 = vmul.bf16 %v1657_v7, %v4234_v58 }
 0x19d   : > { %2060 = vxpose.xlu1.c.b16.cont [4/8] %v1909_v0, 128  ;;  %2044 = vxpose.xlu0.c.b16.cont [4/8] %v1908_v22, 128  ;;  %v1916_v0 = vmul.bf16 %v1594_v20, %v4236_v17  ;;  %v1650_v22 = vrot.slane %v1645_v21, %v3848_v51  ;;  %v1470_v61 = vpack.i.b16 %v1207_v32, %v1207_v32 }
 0x19e   : > { %v1468_v12 = vrot.slane %v1463_v3, %v3848_v51  ;;  %v1223_v27 = vrot.slane %v4467_v19, %v5030_v10  ;;  %v1235_v9 = vrot.slane %v4459_v16, %v3856_v56  ;;  %v1750_v52 = vpack.i.b16 %v1367_v50, %v1367_v50 }
 0x19f   : > { %v4558_v8 = vrot.slane %v1470_v61, %v3848_v51  ;;  %v1251_v58 = vrot.slane %v4473_v28, %v3856_v56  ;;  %v1496_v19 = vrot.slane %v1491_v26, %v3848_v51  ;;  %v1271_v18 = vrot.slane %v4475_v1, %v5030_v10 }
 0x1a0   : > { %v1498_v4 = vpack.i.b16 %v1223_v27, %v1223_v27  ;;  %v4569_v21 = vrot.slane %v1750_v52, %v3848_v51  ;;  %v1267_v7 = vrot.slane %v4475_v1, %v3856_v56  ;;  %v1415_v50 = vrot.slane %v4311_v23, %v5030_v10 }
 0x1a1   : > { %2061 = vxpose.xlu1.c.b16.cont [5/8] %v1913_v30, 128  ;;  %2045 = vxpose.xlu0.c.b16.cont [5/8] %v1912_v62, 128  ;;  %v1239_v30 = vrot.slane %v4459_v16, %v5030_v10  ;;  %v1924_v62 = vmul.bf16 %v1650_v22, %v4236_v17  ;;  %v1899_v20 = vmul.bf16 %v4558_v8, %v4208_v33 }
 0x1a2   : > { %v4572_v45 = vrot.slane %v1498_v4, %v3848_v51  ;;  %v1255_v16 = vrot.slane %v4473_v28, %v5030_v10  ;;  %v1399_v17 = vrot.slane %v4272_v38, %v5030_v10  ;;  %v1939_v3 = vmul.bf16 %v4569_v21, %v4208_v33 }
 0x1a3   : > { %v1526_v40 = vpack.i.b16 %v1239_v30, %v1239_v30  ;;  %v1582_v22 = vpack.i.b16 %v1271_v18, %v1271_v18  ;;  %v1834_v26 = vpack.i.b16 %v1415_v50, %v1415_v50  ;;  %v1287_v23 = vrot.slane %v4499_v31, %v5030_v10 }
 0x1a4   : > { %v1903_v38 = vmul.bf16 %v4572_v45, %v4208_v33  ;;  %v1554_v28 = vpack.i.b16 %v1255_v16, %v1255_v16  ;;  %v1303_v30 = vrot.slane %v4502_v63, %v5030_v10  ;;  %v1547_v50 = vpack.i.b16 %v1251_v58, %v1251_v58 }
 0x1a5   : > { %2062 = vxpose.xlu1.c.b16.cont [6/8] %v1917_v6, 128  ;;  %2046 = vxpose.xlu0.c.b16.cont [6/8] %v1916_v0, 128  ;;  %v4585_v32 = vrot.slane %v1526_v40, %v3848_v51  ;;  %v1806_v6 = vpack.i.b16 %v1399_v17, %v1399_v17  ;;  %v1898_v0 = vmul.bf16 %v1468_v12, %v4206_v60 }
 0x1a6   : > { %v4595_v61 = vrot.slane %v1554_v28, %v3848_v51  ;;  %v4605_v12 = vrot.slane %v1582_v22, %v3848_v51  ;;  %v4608_v52 = vrot.slane %v1834_v26, %v3848_v51  ;;  %v1610_v16 = vpack.i.b16 %v1287_v23, %v1287_v23 }
 0x1a7   : > { %v1907_v1 = vmul.bf16 %v4585_v32, %v4208_v33  ;;  %v4598_v27 = vrot.slane %v1806_v6, %v3848_v51  ;;  %v1638_v18 = vpack.i.b16 %v1303_v30, %v1303_v30  ;;  %v1902_v6 = vmul.bf16 %v1496_v19, %v4206_v60 }
 0x1a8   : > { %v1911_v4 = vmul.bf16 %v4595_v61, %v4208_v33  ;;  %v4621_v28 = vrot.slane %v1610_v16, %v3848_v51  ;;  %v1776_v41 = vrot.slane %v1771_v2, %v3848_v51  ;;  %v1778_v53 = vpack.i.b16 %v1383_v42, %v1383_v42  ;;  %v1995_v42 = vld [vmem:[#allocation2 + $0x18] sm:$0xff] }
 0x1a9   : > { %2063 = vxpose.xlu1.c.b16.cont [7/8] %v1921_v54, 128  ;;  %2047 = vxpose.xlu0.c.b16.cont [7/8] %v1920_v15, 128  ;;  %v1431_v54 = vrot.slane %v4313_v39, %v5030_v10  ;;  %v1519_v15 = vpack.i.b16 %v1235_v9, %v1235_v9  ;;  %v1947_v40 = vmul.bf16 %v4598_v27, %v4208_v33 }
 0x1aa   : > { %v1915_v39 = vmul.bf16 %v4605_v12, %v4208_v33  ;;  %v1951_v9 = vmul.bf16 %v4608_v52, %v4208_v33  ;;  %v4633_v23 = vrot.slane %v1638_v18, %v3848_v51  ;;  %v1942_v2 = vmul.bf16 %v1776_v41, %v4206_v60 }
 0x1ab   : > { %v1862_v17 = vpack.i.b16 %v1431_v54, %v1431_v54  ;;  %v1524_v22 = vrot.slane %v1519_v15, %v3848_v51  ;;  %v1783_v36 = vrot.slane %v1778_v53, %v3848_v51 }
 0x1ac   : > { %v1923_v15 = vmul.bf16 %v4633_v23, %v4208_v33 }
 0x1ad   : > { %2064 = vxpose.xlu1.c.b16.end [8/8] %v1925_v47, 128  ;;  %2048 = vxpose.xlu0.c.b16.end [8/8] %v1924_v62, 128  ;;  %v1447_v47 = vrot.slane %v4315_v59, %v5030_v10  ;;  %v1319_v62 = vrot.slane %v4504_v34, %v5030_v10  ;;  %v4630_v26 = vrot.slane %v1862_v17, %v3848_v51 }
 0x1ae   : > { %v1919_v59 = vmul.bf16 %v4621_v28, %v4208_v33  ;;  %v1283_v17 = vrot.slane %v4499_v31, %v3856_v56  ;;  %v1906_v18 = vmul.bf16 %v1524_v22, %v4206_v60  ;;  %v1943_v55 = vmul.bf16 %v1783_v36, %v4208_v33  ;;  %v1996_v36 = vld [vmem:[#allocation2 + $0x20] sm:$0xff] }
 0x1af   : > { %v1890_v58 = vpack.i.b16 %v1447_v47, %v1447_v47  ;;  %v1666_v54 = vpack.i.b16 %v1319_v62, %v1319_v62  ;;  %v1955_v19 = vmul.bf16 %v4630_v26, %v4208_v33 }
 0x1b0   : > { %v1603_v31 = vpack.i.b16 %v1283_v17, %v1283_v17 }
 0x1b1   : > { %2137 = vxpose.xlu0.c.b16.start [1/8] %v1930_v57, 128  ;;  %2073 = vxpose.xlu1.c.b16.start [1/8] %v1898_v0, 128  ;;  %v4645_v30 = vrot.slane %v1890_v58, %v3848_v51  ;;  %v4648_v16 = vrot.slane %v1666_v54, %v3848_v51  ;;  %v1552_v57 = vrot.slane %v1547_v50, %v3848_v51 }
 0x1b2   : > { %v1575_v0 = vpack.i.b16 %v1267_v7, %v1267_v7  ;;  %v1299_v7 = vrot.slane %v4502_v63, %v3856_v56  ;;  %v1315_v50 = vrot.slane %v4504_v34, %v3856_v56 }
 0x1b3   : > { %v1959_v47 = vmul.bf16 %v4645_v30, %v4208_v33  ;;  %v1927_v37 = vmul.bf16 %v4648_v16, %v4208_v33  ;;  %v1910_v24 = vmul.bf16 %v1552_v57, %v4206_v60 }
 0x1b4   : > { %v1631_v63 = vpack.i.b16 %v1299_v7, %v1299_v7  ;;  %v1659_v22 = vpack.i.b16 %v1315_v50, %v1315_v50  ;;  %v1992_v50 = vld [vmem:[#allocation2] sm:$0xff] }
 0x1b5   : > { %2138 = vxpose.xlu0.c.b16.cont [2/8] %v1934_v5, 128  ;;  %2074 = vxpose.xlu1.c.b16.cont [2/8] %v1902_v6, 128  ;;  %v1580_v5 = vrot.slane %v1575_v0, %v3848_v51  ;;  %v1608_v6 = vrot.slane %v1603_v31, %v3848_v51 }
 0x1b6   : > { %v1664_v34 = vrot.slane %v1659_v22, %v3848_v51 }
 0x1b7   : > { %v1914_v62 = vmul.bf16 %v1580_v5, %v4206_v60  ;;  %v1918_v25 = vmul.bf16 %v1608_v6, %v4206_v60  ;;  %v1993_v6 = vld [vmem:[#allocation2 + $0x8] sm:$0xff] }
 0x1b8   : > { %v1926_v13 = vmul.bf16 %v1664_v34, %v4206_v60  ;;  %v1994_v34 = vld [vmem:[#allocation2 + $0x10] sm:$0xff] }
 0x1b9   : > { %2139 = vxpose.xlu0.c.b16.cont [3/8] %v1938_v43, 128  ;;  %2075 = vxpose.xlu1.c.b16.cont [3/8] %v1906_v18, 128  ;;  %v1636_v43 = vrot.slane %v1631_v63, %v3848_v51 }
 0x1bb   : > { %v1922_v56 = vmul.bf16 %v1636_v43, %v4206_v60 }
 0x1bd   : > { %2140 = vxpose.xlu0.c.b16.cont [4/8] %v1942_v2, 128  ;;  %2076 = vxpose.xlu1.c.b16.cont [4/8] %v1910_v24, 128 }
 0x1c1   : > { %2141 = vxpose.xlu0.c.b16.cont [5/8] %v1946_v11, 128  ;;  %2077 = vxpose.xlu1.c.b16.cont [5/8] %v1914_v62, 128 }
 0x1c5   : > { %2142 = vxpose.xlu0.c.b16.cont [6/8] %v1950_v29, 128  ;;  %2078 = vxpose.xlu1.c.b16.cont [6/8] %v1918_v25, 128 }
 0x1c9   : > { %2143 = vxpose.xlu0.c.b16.cont [7/8] %v1954_v48, 128  ;;  %2079 = vxpose.xlu1.c.b16.cont [7/8] %v1922_v56, 128 }
 0x1cd   : > { %2144 = vxpose.xlu0.c.b16.end [8/8] %v1958_v49, 128  ;;  %2080 = vxpose.xlu1.c.b16.end [8/8] %v1926_v13, 128 }
 0x1d0   : > { %v4696_v11 = vpop.trf.xlu1  ;;  %v2113_v29 = vpop.trf.xlu0 }
 0x1d1   : > { %2297 = vmatprep.mubr.bf16.mxu0 %v2113_v29  ;;  %2153 = vxpose.xlu0.c.b16.start [1/8] (narrow) %v1931_v35, 16 }
 0x1d2   : > { %2089 = vxpose.xlu1.c.b16.start [1/8] (narrow) %v1899_v20, 16 }
 0x1d4   : > { %v4704_v48 = vpop.trf.xlu1  ;;  %v2114_v60 = vpop.trf.xlu0 }
 0x1d5   : > { %2154 = vxpose.xlu0.c.b16.cont [2/8] (narrow) %v1935_v14, 16 }
 0x1d6   : > { %2090 = vxpose.xlu1.c.b16.cont [2/8] (narrow) %v1903_v38, 16 }
 0x1d8   : > { %v4713_v10 = vpop.trf.xlu1  ;;  %v2115_v44 = vpop.trf.xlu0 }
 0x1d9   : > { %2155 = vxpose.xlu0.c.b16.cont [3/8] (narrow) %v1939_v3, 16 }
 0x1da   : > { %2091 = vxpose.xlu1.c.b16.cont [3/8] (narrow) %v1907_v1, 16 }
 0x1dc   : > { %v4722_v49 = vpop.trf.xlu1  ;;  %v2116_v51 = vpop.trf.xlu0 }
 0x1dd   : > { %2156 = vxpose.xlu0.c.b16.cont [4/8] (narrow) %v1943_v55, 16 }
 0x1de   : > { %2092 = vxpose.xlu1.c.b16.cont [4/8] (narrow) %v1911_v4, 16 }
 0x1e0   : > { %v4727_v35 = vpop.trf.xlu1  ;;  %v2117_v46 = vpop.trf.xlu0 }
 0x1e1   : > { %2157 = vxpose.xlu0.c.b16.cont [5/8] (narrow) %v1947_v40, 16 }
 0x1e2   : > { %2093 = vxpose.xlu1.c.b16.cont [5/8] (narrow) %v1915_v39, 16 }
 0x1e4   : > { %v2134_v14 = vpop.trf.xlu1  ;;  %v2118_v8 = vpop.trf.xlu0 }
 0x1e5   : > { %2401 = vmatprep.mubr.bf16.mxu1 %v2134_v14  ;;  %2158 = vxpose.xlu0.c.b16.cont [6/8] (narrow) %v1951_v9, 16 }
 0x1e6   : > { %2094 = vxpose.xlu1.c.b16.cont [6/8] (narrow) %v1919_v59, 16 }
 0x1e8   : > { %v2135_v20 = vpop.trf.xlu1  ;;  %v2119_v21 = vpop.trf.xlu0 }
 0x1e9   : > { %2159 = vxpose.xlu0.c.b16.cont [7/8] (narrow) %v1955_v19, 16 }
 0x1ea   : > { %2095 = vxpose.xlu1.c.b16.cont [7/8] (narrow) %v1923_v15, 16 }
 0x1ec   : > { %v2136_v45 = vpop.trf.xlu1  ;;  %v2120_v3 = vpop.trf.xlu0 }
 0x1ed   : > { %2160 = vxpose.xlu0.c.b16.end [8/8] (narrow) %v1959_v47, 16 }
 0x1ee   : > { %2096 = vxpose.xlu1.c.b16.end [8/8] (narrow) %v1927_v37, 16 }
 0x1f7   : > { %v2065_v32 = vpop.trf.xlu1  ;;  %v2049_v38 = vpop.trf.xlu0 }
 0x1f8   : > { %2298 = vmatmul.mubr.bf16.vlgmr.msra.gmra.mrb[0].mxu0 %v2049_v38 }
 0x1f9   : > { %2305 = vmatprep.mubr.bf16.mxu0 %v2114_v60 }
 0x1fb   : > { %v2066_v1 = vpop.trf.xlu1  ;;  %v2050_v61 = vpop.trf.xlu0 }
 0x1ff   : > { %v2067_v27 = vpop.trf.xlu1  ;;  %v2051_v12 = vpop.trf.xlu0 }
 0x200   : > { %2306 = vmatmul.mubr.bf16.gmra.mrb[4].mxu0 %v2050_v61 }
 0x201   : > { %2313 = vmatprep.mubr.bf16.mxu0 %v2115_v44  ;;  %v1997_v44 = vld [vmem:[#allocation2 + $0x28] sm:$0xff] }
 0x203   : > { %v2068_v52 = vpop.trf.xlu1  ;;  %v2052_v4 = vpop.trf.xlu0 }
 0x207   : > { %v2069_v33 = vpop.trf.xlu1  ;;  %v2053_v40 = vpop.trf.xlu0 }
 0x208   : > { %2314 = vmatmul.mubr.bf16.gmra.mrb[8].mxu0 %v2051_v12 }
 0x209   : > { %2321 = vmatprep.mubr.bf16.mxu0 %v2116_v51 }
 0x20b   : > { %v2070_v39 = vpop.trf.xlu1  ;;  %v2054_v9 = vpop.trf.xlu0 }
 0x20c   : > { %2402 = vmatmul.mubr.bf16.vlgmr.msra.gmra.mrb[0].mxu1 %v2070_v39 }
 0x20d   : > { %2409 = vmatprep.mubr.bf16.mxu1 %v2135_v20  ;;  %v2019_v20 = vld [vmem:[#allocation2 + $0xd8] sm:$0xff] }
 0x20f   : > { %v2055_v28 = vpop.trf.xlu0  ;;  %v2071_v26 = vpop.trf.xlu1 }
 0x210   : > { %2322 = vmatmul.mubr.bf16.gmra.mrb[12].mxu0 %v2052_v4 }
 0x211   : > { %2329 = vmatprep.mubr.bf16.mxu0 %v2117_v46 }
 0x213   : > { %v2056_v23 = vpop.trf.xlu0  ;;  %v2072_v59 = vpop.trf.xlu1 }
 0x214   : > { %2410 = vmatmul.mubr.bf16.gmra.mrb[4].mxu1 %v2071_v26 }
 0x215   : > { %2417 = vmatprep.mubr.bf16.mxu1 %v2136_v45 }
 0x217   : > { %v2145_v58 = vpop.trf.xlu0  ;;  %v2081_v54 = vpop.trf.xlu1 }
 0x218   : > { %2330 = vmatmul.mubr.bf16.gmra.mrb[16].mxu0 %v2053_v40 }
 0x219   : > { %2337 = vmatprep.mubr.bf16.mxu0 %v2118_v8 }
 0x21b   : > { %v2146_v19 = vpop.trf.xlu0  ;;  %v2082_v15 = vpop.trf.xlu1 }
 0x21c   : > { %2418 = vmatmul.mubr.bf16.gmra.mrb[8].mxu1 %v2072_v59 }
 0x21d   : > { %2425 = vmatprep.mubr.bf16.mxu1 %v2145_v58  ;;  %v2000_v58 = vld [vmem:[#allocation2 + $0x40] sm:$0xff] }
 0x21f   : > { %v2147_v30 = vpop.trf.xlu0  ;;  %v2083_v16 = vpop.trf.xlu1 }
 0x220   : > { %2338 = vmatmul.mubr.bf16.gmra.mrb[20].mxu0 %v2054_v9 }
 0x221   : > { %2345 = vmatprep.mubr.bf16.mxu0 %v2119_v21 }
 0x223   : > { %v2148_v41 = vpop.trf.xlu0  ;;  %v2084_v57 = vpop.trf.xlu1 }
 0x224   : > { %2426 = vmatmul.mubr.bf16.gmra.mrb[12].mxu1 %v2081_v54 }
 0x225   : > { %2433 = vmatprep.mubr.bf16.mxu1 %v2146_v19 }
 0x227   : > { %v2149_v0 = vpop.trf.xlu0  ;;  %v2085_v17 = vpop.trf.xlu1 }
 0x228   : > { %2346 = vmatmul.mubr.bf16.gmra.mrb[24].mxu0 %v2055_v28  ;;  %v2021_v28 = vld [vmem:[#allocation2 + $0xe8] sm:$0xff] }
 0x229   : > { %2353 = vmatprep.mubr.bf16.mxu0 %v2120_v3 }
 0x22b   : > { %v2150_v18 = vpop.trf.xlu0  ;;  %v2086_v47 = vpop.trf.xlu1 }
 0x22c   : > { %2434 = vmatmul.mubr.bf16.gmra.mrb[16].mxu1 %v2082_v15 }
 0x22d   : > { %2441 = vmatprep.mubr.bf16.mxu1 %v2147_v30  ;;  %v2001_v30 = vld [vmem:[#allocation2 + $0x48] sm:$0xff] }
 0x22f   : > { %v2151_v37 = vpop.trf.xlu0  ;;  %v2087_v2 = vpop.trf.xlu1 }
 0x230   : > { %2354 = vmatmul.mubr.bf16.gmra.mrb[28].mxu0 %v2056_v23 }
 0x231   : > { %2361 = vmatprep.mubr.bf16.mxu0 %v4696_v11 }
 0x233   : > { %v2152_v7 = vpop.trf.xlu0  ;;  %v2088_v24 = vpop.trf.xlu1 }
 0x234   : > { %2442 = vmatmul.mubr.bf16.gmra.mrb[20].mxu1 %v2083_v16 }
 0x235   : > { %2449 = vmatprep.mubr.bf16.mxu1 %v2148_v41 }
 0x237   : > { %v2161_v5 = vpop.trf.xlu0 }
 0x238   : > { %2362 = vmatmul.mubr.bf16.gmra.mrb[32].mxu0 %v2065_v32  ;;  %v2097_v31 = vpop.trf.xlu1  ;;  %v1998_v32 = vld [vmem:[#allocation2 + $0x30] sm:$0xff] }
 0x239   : > { %2369 = vmatprep.mubr.bf16.mxu0 %v4704_v48 }
 0x23c   : > { %2450 = vmatmul.mubr.bf16.gmra.mrb[24].mxu1 %v2084_v57 }
 0x23d   : > { %2457 = vmatprep.mubr.bf16.mxu1 %v2149_v0  ;;  %v2022_v0 = vld [vmem:[#allocation2 + $0xf0] sm:$0xff] }
 0x240   : > { %2370 = vmatmul.mubr.bf16.gmra.mrb[36].mxu0 %v2066_v1 }
 0x241   : > { %2377 = vmatprep.mubr.bf16.mxu0 %v4713_v10 }
 0x244   : > { %2458 = vmatmul.mubr.bf16.gmra.mrb[28].mxu1 %v2085_v17 }
 0x245   : > { %2465 = vmatprep.mubr.bf16.mxu1 %v2150_v18 }
 0x248   : > { %2378 = vmatmul.mubr.bf16.gmra.mrb[40].mxu0 %v2067_v27  ;;  %v1999_v27 = vld [vmem:[#allocation2 + $0x38] sm:$0xff] }
 0x249   : > { %2385 = vmatprep.mubr.bf16.mxu0 %v4722_v49 }
 0x24c   : > { %2466 = vmatmul.mubr.bf16.gmra.mrb[32].mxu1 %v2086_v47 }
 0x24d   : > { %2473 = vmatprep.mubr.bf16.mxu1 %v2151_v37  ;;  %v2023_v37 = vld [vmem:[#allocation2 + $0xf8] sm:$0xff] }
 0x250   : > { %2386 = vmatmul.mubr.bf16.gmra.mrb[44].mxu0 %v2068_v52 }
 0x251   : > { %2393 = vmatprep.mubr.bf16.mxu0 %v4727_v35  ;;  %v2018_v35 = vld [vmem:[#allocation2 + $0xd0] sm:$0xff] }
 0x254   : > { %2474 = vmatmul.mubr.bf16.gmra.mrb[36].mxu1 %v2087_v2 }
 0x255   : > { %2481 = vmatprep.mubr.bf16.mxu1 %v2152_v7 }
 0x258   : > { %2394 = vmatmul.mubr.bf16.gmra.mrb[48].mxu0 %v2069_v33  ;;  %v2020_v33 = vld [vmem:[#allocation2 + $0xe0] sm:$0xff] }
 0x25c   : > { %2482 = vmatmul.mubr.bf16.gmra.mrb[40].mxu1 %v2088_v24 }
 0x25d   : > { %2489 = vmatprep.mubr.bf16.mxu1 %v2161_v5  ;;  %v2002_v5 = vld [vmem:[#allocation2 + $0x50] sm:$0xff] }
 0x264   : > { %2490 = vmatmul.mubr.bf16.gmra.mrb[44].mxu1 %v2097_v31 }
 0x2cb   : > { %v2299_v62 = vpop.f32.mrb[0].mxu0 }
 0x2cc   : > { %v2497_v63 = vadd.f32 %v2299_v62, %v1992_v50  ;;  %v2301_v25 = vpop.f32.mrb[1].mxu0 }
 0x2cd   : > { %v2302_v43 = vpop.f32.mrb[2].mxu0 }
 0x2ce   : > { %2546 = vst [vmem:[#allocation2] sm:$0xff] %v2497_v63  ;;  %v2498_v22 = vadd.f32 %v2302_v43, %v1993_v6  ;;  %v2304_v56 = vpop.f32.mrb[3].mxu0  ;;  %v2003_v6 = vld [vmem:[#allocation2 + $0x58] sm:$0xff] }
 0x2d0   : > { %2547 = vst [vmem:[#allocation2 + $0x8] sm:$0xff] %v2498_v22  ;;  %v2024_v22 = vld [vmem:[#allocation2 + $0x100] sm:$0xff] }
 0x2d3   : > { %v2307_v13 = vpop.f32.mrb[4].mxu0 }
 0x2d4   : > { %v2499_v11 = vadd.f32 %v2307_v13, %v1994_v34  ;;  %v2309_v29 = vpop.f32.mrb[5].mxu0 }
 0x2d5   : > { %v2310_v53 = vpop.f32.mrb[6].mxu0 }
 0x2d6   : > { %2548 = vst [vmem:[#allocation2 + $0x10] sm:$0xff] %v2499_v11  ;;  %v2500_v48 = vadd.f32 %v2310_v53, %v1995_v42  ;;  %v2312_v60 = vpop.f32.mrb[7].mxu0  ;;  %v2025_v42 = vld [vmem:[#allocation2 + $0x108] sm:$0xff] }
 0x2d8   : > { %2549 = vst [vmem:[#allocation2 + $0x18] sm:$0xff] %v2500_v48  ;;  %v2004_v48 = vld [vmem:[#allocation2 + $0x60] sm:$0xff] }
 0x2db   : > { %v2315_v10 = vpop.f32.mrb[8].mxu0 }
 0x2dc   : > { %v2501_v55 = vadd.f32 %v2315_v10, %v1996_v36  ;;  %v2317_v49 = vpop.f32.mrb[9].mxu0 }
 0x2dd   : > { %v2318_v51 = vpop.f32.mrb[10].mxu0 }
 0x2de   : > { %2550 = vst [vmem:[#allocation2 + $0x20] sm:$0xff] %v2501_v55  ;;  %v2502_v46 = vadd.f32 %v2318_v51, %v1997_v44  ;;  %v2320_v14 = vpop.f32.mrb[11].mxu0  ;;  %v2005_v44 = vld [vmem:[#allocation2 + $0x68] sm:$0xff] }
 0x2df   : > { %v2403_v8 = vpop.f32.mrb[0].mxu1 }
 0x2e0   : > { %2551 = vst [vmem:[#allocation2 + $0x28] sm:$0xff] %v2502_v46  ;;  %v2523_v21 = vadd.f32 %v2403_v8, %v2018_v35  ;;  %v2405_v45 = vpop.f32.mrb[1].mxu1  ;;  %v2026_v35 = vld [vmem:[#allocation2 + $0x110] sm:$0xff] }
 0x2e1   : > { %v2406_v3 = vpop.f32.mrb[2].mxu1 }
 0x2e2   : > { %2572 = vst [vmem:[#allocation2 + $0xd0] sm:$0xff] %v2523_v21  ;;  %v2524_v38 = vadd.f32 %v2406_v3, %v2019_v20  ;;  %v2408_v1 = vpop.f32.mrb[3].mxu1  ;;  %v2027_v20 = vld [vmem:[#allocation2 + $0x118] sm:$0xff] }
 0x2e3   : > { %v2323_v61 = vpop.f32.mrb[12].mxu0 }
 0x2e4   : > { %2573 = vst [vmem:[#allocation2 + $0xd8] sm:$0xff] %v2524_v38  ;;  %v2503_v12 = vadd.f32 %v2323_v61, %v1998_v32  ;;  %v2325_v52 = vpop.f32.mrb[13].mxu0  ;;  %v2006_v32 = vld [vmem:[#allocation2 + $0x70] sm:$0xff] }
 0x2e5   : > { %v2326_v4 = vpop.f32.mrb[14].mxu0 }
 0x2e6   : > { %2552 = vst [vmem:[#allocation2 + $0x30] sm:$0xff] %v2503_v12  ;;  %v2504_v40 = vadd.f32 %v2326_v4, %v1999_v27  ;;  %v2328_v39 = vpop.f32.mrb[15].mxu0  ;;  %v2007_v27 = vld [vmem:[#allocation2 + $0x78] sm:$0xff] }
 0x2e7   : > { %v2411_v9 = vpop.f32.mrb[4].mxu1 }
 0x2e8   : > { %2553 = vst [vmem:[#allocation2 + $0x38] sm:$0xff] %v2504_v40  ;;  %v2525_v26 = vadd.f32 %v2411_v9, %v2020_v33  ;;  %v2413_v23 = vpop.f32.mrb[5].mxu1  ;;  %v2028_v33 = vld [vmem:[#allocation2 + $0x120] sm:$0xff] }
 0x2e9   : > { %v2414_v59 = vpop.f32.mrb[6].mxu1 }
 0x2ea   : > { %2574 = vst [vmem:[#allocation2 + $0xe0] sm:$0xff] %v2525_v26  ;;  %v2526_v54 = vadd.f32 %v2414_v59, %v2021_v28  ;;  %v2416_v19 = vpop.f32.mrb[7].mxu1  ;;  %v2029_v28 = vld [vmem:[#allocation2 + $0x128] sm:$0xff] }
 0x2eb   : > { %v2331_v15 = vpop.f32.mrb[16].mxu0 }
 0x2ec   : > { %2575 = vst [vmem:[#allocation2 + $0xe8] sm:$0xff] %v2526_v54  ;;  %v2505_v16 = vadd.f32 %v2331_v15, %v2000_v58  ;;  %v2333_v41 = vpop.f32.mrb[17].mxu0  ;;  %v2008_v58 = vld [vmem:[#allocation2 + $0x80] sm:$0xff] }
 0x2ed   : > { %v2334_v57 = vpop.f32.mrb[18].mxu0 }
 0x2ee   : > { %2554 = vst [vmem:[#allocation2 + $0x40] sm:$0xff] %v2505_v16  ;;  %v2506_v17 = vadd.f32 %v2334_v57, %v2001_v30  ;;  %v2336_v18 = vpop.f32.mrb[19].mxu0  ;;  %v2009_v30 = vld [vmem:[#allocation2 + $0x88] sm:$0xff] }
 0x2ef   : > { %v2419_v47 = vpop.f32.mrb[8].mxu1 }
 0x2f0   : > { %2555 = vst [vmem:[#allocation2 + $0x48] sm:$0xff] %v2506_v17  ;;  %v2527_v2 = vadd.f32 %v2419_v47, %v2022_v0  ;;  %v2421_v7 = vpop.f32.mrb[9].mxu1  ;;  %v2030_v0 = vld [vmem:[#allocation2 + $0x130] sm:$0xff] }
 0x2f1   : > { %v2422_v24 = vpop.f32.mrb[10].mxu1 }
 0x2f2   : > { %2576 = vst [vmem:[#allocation2 + $0xf0] sm:$0xff] %v2527_v2  ;;  %v2528_v31 = vadd.f32 %v2422_v24, %v2023_v37  ;;  %v2424_v50 = vpop.f32.mrb[11].mxu1  ;;  %v2031_v37 = vld [vmem:[#allocation2 + $0x138] sm:$0xff] }
 0x2f3   : > { %v2339_v62 = vpop.f32.mrb[20].mxu0 }
 0x2f4   : > { %2577 = vst [vmem:[#allocation2 + $0xf8] sm:$0xff] %v2528_v31  ;;  %v2507_v63 = vadd.f32 %v2339_v62, %v2002_v5  ;;  %v2341_v25 = vpop.f32.mrb[21].mxu0  ;;  %v2010_v5 = vld [vmem:[#allocation2 + $0x90] sm:$0xff] }
 0x2f5   : > { %v2342_v43 = vpop.f32.mrb[22].mxu0 }
 0x2f6   : > { %2556 = vst [vmem:[#allocation2 + $0x50] sm:$0xff] %v2507_v63  ;;  %v2508_v56 = vadd.f32 %v2342_v43, %v2003_v6  ;;  %v2344_v34 = vpop.f32.mrb[23].mxu0  ;;  %v2011_v6 = vld [vmem:[#allocation2 + $0x98] sm:$0xff] }
 0x2f7   : > { %v2427_v13 = vpop.f32.mrb[12].mxu1 }
 0x2f8   : > { %2557 = vst [vmem:[#allocation2 + $0x58] sm:$0xff] %v2508_v56  ;;  %v2529_v11 = vadd.f32 %v2427_v13, %v2024_v22  ;;  %v2429_v29 = vpop.f32.mrb[13].mxu1  ;;  %v2032_v22 = vld [vmem:[#allocation2 + $0x140] sm:$0xff] }
 0x2f9   : > { %v2430_v53 = vpop.f32.mrb[14].mxu1 }
 0x2fa   : > { %2578 = vst [vmem:[#allocation2 + $0x100] sm:$0xff] %v2529_v11  ;;  %v2530_v60 = vadd.f32 %v2430_v53, %v2025_v42  ;;  %v2432_v36 = vpop.f32.mrb[15].mxu1  ;;  %v2033_v42 = vld [vmem:[#allocation2 + $0x148] sm:$0xff] }
 0x2fb   : > { %v2347_v10 = vpop.f32.mrb[24].mxu0 }
 0x2fc   : > { %2579 = vst [vmem:[#allocation2 + $0x108] sm:$0xff] %v2530_v60  ;;  %v2509_v55 = vadd.f32 %v2347_v10, %v2004_v48  ;;  %v2349_v49 = vpop.f32.mrb[25].mxu0  ;;  %v2012_v48 = vld [vmem:[#allocation2 + $0xa0] sm:$0xff] }
 0x2fd   : > { %v2350_v51 = vpop.f32.mrb[26].mxu0 }
 0x2fe   : > { %2558 = vst [vmem:[#allocation2 + $0x60] sm:$0xff] %v2509_v55  ;;  %v2510_v46 = vadd.f32 %v2350_v51, %v2005_v44  ;;  %v2352_v14 = vpop.f32.mrb[27].mxu0  ;;  %v2013_v44 = vld [vmem:[#allocation2 + $0xa8] sm:$0xff] }
 0x2ff   : > { %v2435_v8 = vpop.f32.mrb[16].mxu1 }
 0x300   : > { %2559 = vst [vmem:[#allocation2 + $0x68] sm:$0xff] %v2510_v46  ;;  %v2531_v21 = vadd.f32 %v2435_v8, %v2026_v35  ;;  %v2437_v45 = vpop.f32.mrb[17].mxu1  ;;  %v2034_v35 = vld [vmem:[#allocation2 + $0x150] sm:$0xff] }
 0x301   : > { %v2438_v3 = vpop.f32.mrb[18].mxu1 }
 0x302   : > { %2580 = vst [vmem:[#allocation2 + $0x110] sm:$0xff] %v2531_v21  ;;  %v2532_v38 = vadd.f32 %v2438_v3, %v2027_v20  ;;  %v2440_v1 = vpop.f32.mrb[19].mxu1  ;;  %v2035_v20 = vld [vmem:[#allocation2 + $0x158] sm:$0xff] }
 0x303   : > { %v2355_v61 = vpop.f32.mrb[28].mxu0 }
 0x304   : > { %2581 = vst [vmem:[#allocation2 + $0x118] sm:$0xff] %v2532_v38  ;;  %v2511_v12 = vadd.f32 %v2355_v61, %v2006_v32  ;;  %v2357_v52 = vpop.f32.mrb[29].mxu0  ;;  %v2014_v32 = vld [vmem:[#allocation2 + $0xb0] sm:$0xff] }
 0x305   : > { %v2358_v4 = vpop.f32.mrb[30].mxu0 }
 0x306   : > { %2560 = vst [vmem:[#allocation2 + $0x70] sm:$0xff] %v2511_v12  ;;  %v2512_v40 = vadd.f32 %v2358_v4, %v2007_v27  ;;  %v2360_v39 = vpop.f32.mrb[31].mxu0  ;;  %v2015_v27 = vld [vmem:[#allocation2 + $0xb8] sm:$0xff] }
 0x307   : > { %v2443_v9 = vpop.f32.mrb[20].mxu1 }
 0x308   : > { %2561 = vst [vmem:[#allocation2 + $0x78] sm:$0xff] %v2512_v40  ;;  %v2533_v26 = vadd.f32 %v2443_v9, %v2028_v33  ;;  %v2445_v23 = vpop.f32.mrb[21].mxu1  ;;  %v2036_v33 = vld [vmem:[#allocation2 + $0x160] sm:$0xff] }
 0x309   : > { %v2446_v59 = vpop.f32.mrb[22].mxu1 }
 0x30a   : > { %2582 = vst [vmem:[#allocation2 + $0x120] sm:$0xff] %v2533_v26  ;;  %v2534_v54 = vadd.f32 %v2446_v59, %v2029_v28  ;;  %v2448_v19 = vpop.f32.mrb[23].mxu1  ;;  %v2037_v28 = vld [vmem:[#allocation2 + $0x168] sm:$0xff] }
 0x30b   : > { %v2363_v15 = vpop.f32.mrb[32].mxu0 }
 0x30c   : > { %2583 = vst [vmem:[#allocation2 + $0x128] sm:$0xff] %v2534_v54  ;;  %v2513_v16 = vadd.f32 %v2363_v15, %v2008_v58  ;;  %v2365_v41 = vpop.f32.mrb[33].mxu0  ;;  %v2016_v58 = vld [vmem:[#allocation2 + $0xc0] sm:$0xff] }
 0x30d   : > { %v2366_v57 = vpop.f32.mrb[34].mxu0 }
 0x30e   : > { %2562 = vst [vmem:[#allocation2 + $0x80] sm:$0xff] %v2513_v16  ;;  %v2514_v17 = vadd.f32 %v2366_v57, %v2009_v30  ;;  %v2368_v18 = vpop.f32.mrb[35].mxu0  ;;  %v2017_v30 = vld [vmem:[#allocation2 + $0xc8] sm:$0xff] }
 0x30f   : > { %v2451_v47 = vpop.f32.mrb[24].mxu1 }
 0x310   : > { %2563 = vst [vmem:[#allocation2 + $0x88] sm:$0xff] %v2514_v17  ;;  %v2535_v2 = vadd.f32 %v2451_v47, %v2030_v0  ;;  %v2453_v7 = vpop.f32.mrb[25].mxu1  ;;  %v2038_v0 = vld [vmem:[#allocation2 + $0x170] sm:$0xff] }
 0x311   : > { %v2454_v24 = vpop.f32.mrb[26].mxu1 }
 0x312   : > { %2584 = vst [vmem:[#allocation2 + $0x130] sm:$0xff] %v2535_v2  ;;  %v2536_v31 = vadd.f32 %v2454_v24, %v2031_v37  ;;  %v2456_v50 = vpop.f32.mrb[27].mxu1  ;;  %v2039_v37 = vld [vmem:[#allocation2 + $0x178] sm:$0xff] }
 0x313   : > { %v2371_v62 = vpop.f32.mrb[36].mxu0  ;;  %v2040_v50 = vld [vmem:[#allocation2 + $0x180] sm:$0xff] }
 0x314   : > { %2585 = vst [vmem:[#allocation2 + $0x138] sm:$0xff] %v2536_v31  ;;  %v2515_v63 = vadd.f32 %v2371_v62, %v2010_v5  ;;  %v2373_v25 = vpop.f32.mrb[37].mxu0 }
 0x315   : > { %v2374_v43 = vpop.f32.mrb[38].mxu0 }
 0x316   : > { %2564 = vst [vmem:[#allocation2 + $0x90] sm:$0xff] %v2515_v63  ;;  %v2516_v56 = vadd.f32 %v2374_v43, %v2011_v6  ;;  %v2376_v34 = vpop.f32.mrb[39].mxu0 }
 0x317   : > { %v2459_v13 = vpop.f32.mrb[28].mxu1 }
 0x318   : > { %2565 = vst [vmem:[#allocation2 + $0x98] sm:$0xff] %v2516_v56  ;;  %v2537_v11 = vadd.f32 %v2459_v13, %v2032_v22  ;;  %v2461_v29 = vpop.f32.mrb[29].mxu1 }
 0x319   : > { %v2462_v53 = vpop.f32.mrb[30].mxu1 }
 0x31a   : > { %2586 = vst [vmem:[#allocation2 + $0x140] sm:$0xff] %v2537_v11  ;;  %v2538_v60 = vadd.f32 %v2462_v53, %v2033_v42  ;;  %v2464_v36 = vpop.f32.mrb[31].mxu1 }
 0x31b   : > { %v2379_v10 = vpop.f32.mrb[40].mxu0 }
 0x31c   : > { %2587 = vst [vmem:[#allocation2 + $0x148] sm:$0xff] %v2538_v60  ;;  %v2517_v55 = vadd.f32 %v2379_v10, %v2012_v48  ;;  %v2381_v49 = vpop.f32.mrb[41].mxu0 }
 0x31d   : > { %v2382_v51 = vpop.f32.mrb[42].mxu0 }
 0x31e   : > { %2566 = vst [vmem:[#allocation2 + $0xa0] sm:$0xff] %v2517_v55  ;;  %v2518_v46 = vadd.f32 %v2382_v51, %v2013_v44  ;;  %v2384_v14 = vpop.f32.mrb[43].mxu0 }
 0x31f   : > { %v2467_v8 = vpop.f32.mrb[32].mxu1 }
 0x320   : > { %2567 = vst [vmem:[#allocation2 + $0xa8] sm:$0xff] %v2518_v46  ;;  %v2539_v21 = vadd.f32 %v2467_v8, %v2034_v35  ;;  %v2469_v45 = vpop.f32.mrb[33].mxu1 }
 0x321   : > { %v2470_v3 = vpop.f32.mrb[34].mxu1 }
 0x322   : > { %2588 = vst [vmem:[#allocation2 + $0x150] sm:$0xff] %v2539_v21  ;;  %v2540_v38 = vadd.f32 %v2470_v3, %v2035_v20  ;;  %v2472_v1 = vpop.f32.mrb[35].mxu1 }
 0x323   : > { %v2387_v61 = vpop.f32.mrb[44].mxu0 }
 0x324   : > { %2589 = vst [vmem:[#allocation2 + $0x158] sm:$0xff] %v2540_v38  ;;  %v2519_v12 = vadd.f32 %v2387_v61, %v2014_v32  ;;  %v2389_v52 = vpop.f32.mrb[45].mxu0 }
 0x325   : > { %v2390_v4 = vpop.f32.mrb[46].mxu0 }
 0x326   : > { %2568 = vst [vmem:[#allocation2 + $0xb0] sm:$0xff] %v2519_v12  ;;  %v2520_v40 = vadd.f32 %v2390_v4, %v2015_v27  ;;  %v2392_v39 = vpop.f32.mrb[47].mxu0 }
 0x327   : > { %v2475_v9 = vpop.f32.mrb[36].mxu1 }
 0x328   : > { %2569 = vst [vmem:[#allocation2 + $0xb8] sm:$0xff] %v2520_v40  ;;  %v2541_v26 = vadd.f32 %v2475_v9, %v2036_v33  ;;  %v2477_v23 = vpop.f32.mrb[37].mxu1 }
 0x329   : > { %v2478_v59 = vpop.f32.mrb[38].mxu1 }
 0x32a   : > { %2590 = vst [vmem:[#allocation2 + $0x160] sm:$0xff] %v2541_v26  ;;  %v2542_v54 = vadd.f32 %v2478_v59, %v2037_v28  ;;  %v2480_v19 = vpop.f32.mrb[39].mxu1 }
 0x32b   : > { %v2395_v15 = vpop.f32.mrb[48].mxu0 }
 0x32c   : > { %2591 = vst [vmem:[#allocation2 + $0x168] sm:$0xff] %v2542_v54  ;;  %v2521_v16 = vadd.f32 %v2395_v15, %v2016_v58  ;;  %v2397_v41 = vpop.f32.mrb[49].mxu0 }
 0x32d   : > { %v2398_v57 = vpop.f32.mrb[50].mxu0 }
 0x32e   : > { %2570 = vst [vmem:[#allocation2 + $0xc0] sm:$0xff] %v2521_v16  ;;  %v2522_v17 = vadd.f32 %v2398_v57, %v2017_v30  ;;  %v2400_v18 = vpop.f32.mrb[51].mxu0 }
 0x32f   : > { %v2483_v47 = vpop.f32.mrb[40].mxu1 }
 0x330   : > { %2571 = vst [vmem:[#allocation2 + $0xc8] sm:$0xff] %v2522_v17  ;;  %v2543_v2 = vadd.f32 %v2483_v47, %v2038_v0  ;;  %v2485_v7 = vpop.f32.mrb[41].mxu1 }
 0x331   : > { %v2486_v24 = vpop.f32.mrb[42].mxu1 }
 0x332   : > { %2592 = vst [vmem:[#allocation2 + $0x170] sm:$0xff] %v2543_v2  ;;  %v2544_v5 = vadd.f32 %v2486_v24, %v2039_v37  ;;  %v2488_v31 = vpop.f32.mrb[43].mxu1 }
 0x334   : > { %2593 = vst [vmem:[#allocation2 + $0x178] sm:$0xff] %v2544_v5 }
 0x337   : > { %v2491_v62 = vpop.f32.mrb[44].mxu1 }
 0x338   : > { %v2545_v6 = vadd.f32 %v2491_v62, %v2040_v50  ;;  %v2493_v63 = vpop.f32.mrb[45].mxu1 }
 0x339   : > { %v2494_v25 = vpop.f32.mrb[46].mxu1 }
 0x33a   : > { %2594 = vst [vmem:[#allocation2 + $0x180] sm:$0xff] %v2545_v6  ;;  %v2495_v43 = vpop.f32.mrb[47].mxu1 }
 0x33b PF: > { %v2598_v22 = vld [vmem:[#allocation2] sm:$0xff]  ;;  %s5031_s23 = sld [smem:[#allocation33_spill]]  ;;  %v2599_v56 = vld [vmem:[#allocation2 + $0x8] sm:$0xff]  ;;  %v2600_v34 = vld [vmem:[#allocation2 + $0x10] sm:$0xff]  ;;  %s5032_s2 = sld [smem:[#allocation24_spill]] }
 0x33c   : > { %v2601_v13 = vld [vmem:[#allocation2 + $0x18] sm:$0xff]  ;;  %v2602_v42 = vld [vmem:[#allocation2 + $0x20] sm:$0xff]  ;;  %v2603_v11 = vld [vmem:[#allocation2 + $0x28] sm:$0xff]  ;;  %s5033_s20 = sld [smem:[#allocation31_spill]]  ;;  %s5034_s25 = sld [smem:[#allocation49_spill]] }
 0x33d   : > { %v2604_v29 = vld [vmem:[#allocation2 + $0x30] sm:$0xff]  ;;  %v2605_v53 = vld [vmem:[#allocation2 + $0x38] sm:$0xff]  ;;  %v2606_v48 = vld [vmem:[#allocation2 + $0x40] sm:$0xff]  ;;  %s3276_s13 = smov [#allocation14]  }
 0x33e   : > { %v2607_v60 = vld [vmem:[#allocation2 + $0x48] sm:$0xff]  ;;  %v2608_v36 = vld [vmem:[#allocation2 + $0x50] sm:$0xff]  ;;  %v2609_v10 = vld [vmem:[#allocation2 + $0x58] sm:$0xff]  ;;  %s3169_s18 = sshll.u32 %s3276_s13, 4  ;;  %s3170_s18 = int_to_ptr.vmem [resolvable:$false] %s3169_s18 }
 0x33f   : > { %v2610_v44 = vld [vmem:[#allocation2 + $0x60] sm:$0xff]  ;;  %v2611_v55 = vld [vmem:[#allocation2 + $0x68] sm:$0xff]  ;;  %v2612_v49 = vld [vmem:[#allocation2 + $0x70] sm:$0xff]  ;;  %s3171_s15 = scalar_lea.vmem %s3170_s18, 12544 }
 0x340   : > { %v2613_v51 = vld [vmem:[#allocation2 + $0x78] sm:$0xff]  ;;  %v2614_v35 = vld [vmem:[#allocation2 + $0x80] sm:$0xff]  ;;  %v2615_v46 = vld [vmem:[#allocation2 + $0x88] sm:$0xff] }
 0x341   : > { %2647 = vst [vmem:[%s5031_s23] sm:$0xff] %v2598_v22  ;;  %2648 = vst [vmem:[%s5031_s23 + $0x8] sm:$0xff] %v2599_v56  ;;  %v2616_v14 = vld [vmem:[#allocation2 + $0x90] sm:$0xff]  ;;  %v2617_v8 = vld [vmem:[#allocation2 + $0x98] sm:$0xff]  ;;  %s2903_s14 = smul.u32 6272, %s5032_s2  ;;  %s2712_s16 = sshll.u32 %s5031_s23, 4  ;;  %s4804_s16 = int_to_ptr.vmem [resolvable:$true] %s2712_s16 }
 0x342   : > { %2649 = vst [vmem:[%s5031_s23 + $0x10] sm:$0xff] %v2600_v34  ;;  %2650 = vst [vmem:[%s5031_s23 + $0x18] sm:$0xff] %v2601_v13  ;;  %v2618_v20 = vld [vmem:[#allocation2 + $0xa0] sm:$0xff]  ;;  %v2619_v21 = vld [vmem:[#allocation2 + $0xa8] sm:$0xff]  ;;  %s2697_s24 = scalar_lea.sflag [#allocation5], %s5033_s20  ;;  %s3165_s6 = scalar_lea.vmem %s4804_s16, 6272 }
 0x343   : > { %2651 = vst [vmem:[%s5031_s23 + $0x20] sm:$0xff] %v2602_v42  ;;  %2652 = vst [vmem:[%s5031_s23 + $0x28] sm:$0xff] %v2603_v11  ;;  %v2620_v45 = vld [vmem:[#allocation2 + $0xb0] sm:$0xff]  ;;  %v2621_v3 = vld [vmem:[#allocation2 + $0xb8] sm:$0xff]  ;;  %s4799_s21 = scalar_lea.hbm %s5034_s25, %s2903_s14  ;;  %p3166_p12 = scmp.ne.s32.totalorder %s4804_s16, %s3165_s6 }
 0x344   : > { %2653 = vst [vmem:[%s5031_s23 + $0x30] sm:$0xff] %v2604_v29  ;;  %2654 = vst [vmem:[%s5031_s23 + $0x38] sm:$0xff] %v2605_v53  ;;  %v2622_v32 = vld [vmem:[#allocation2 + $0xc0] sm:$0xff]  ;;  %v2623_v38 = vld [vmem:[#allocation2 + $0xc8] sm:$0xff]  ;;  %p3172_p9 = scmp.lt.s32.totalorder %s4804_s16, %s3170_s18  ;;  %p3173_p6 = scmp.lt.s32.totalorder %s3171_s15, %s3165_s6 }
 0x345   : > { %2655 = vst [vmem:[%s5031_s23 + $0x40] sm:$0xff] %v2606_v48  ;;  %2656 = vst [vmem:[%s5031_s23 + $0x48] sm:$0xff] %v2607_v60  ;;  %v2624_v1 = vld [vmem:[#allocation2 + $0xd0] sm:$0xff]  ;;  %v2625_v61 = vld [vmem:[#allocation2 + $0xd8] sm:$0xff]  ;;  %p3167_p3 = pnand %p3166_p12, %p3450_p0 }
 0x346   : > { %2657 = vst [vmem:[%s5031_s23 + $0x50] sm:$0xff] %v2608_v36  ;;  %2658 = vst [vmem:[%s5031_s23 + $0x58] sm:$0xff] %v2609_v10  ;;  %v2626_v27 = vld [vmem:[#allocation2 + $0xe0] sm:$0xff]  ;;  %v2627_v12 = vld [vmem:[#allocation2 + $0xe8] sm:$0xff]  ;;  %p3174_p2 = por %p3173_p6, %p3172_p9 }
 0x347   : > { %2659 = vst [vmem:[%s5031_s23 + $0x60] sm:$0xff] %v2610_v44  ;;  %2660 = vst [vmem:[%s5031_s23 + $0x68] sm:$0xff] %v2611_v55  ;;  %v2628_v52 = vld [vmem:[#allocation2 + $0xf0] sm:$0xff]  ;;  %v2629_v4 = vld [vmem:[#allocation2 + $0xf8] sm:$0xff]  ;;  %p3168_p5 = pneg %p3167_p3 }
 0x348   : > { %2661 = vst [vmem:[%s5031_s23 + $0x70] sm:$0xff] %v2612_v49  ;;  %2662 = vst [vmem:[%s5031_s23 + $0x78] sm:$0xff] %v2613_v51  ;;  %v2630_v33 = vld [vmem:[#allocation2 + $0x100] sm:$0xff]  ;;  %v2631_v40 = vld [vmem:[#allocation2 + $0x108] sm:$0xff] }
 0x349   : > { %2663 = vst [vmem:[%s5031_s23 + $0x80] sm:$0xff] %v2614_v35  ;;  %2664 = vst [vmem:[%s5031_s23 + $0x88] sm:$0xff] %v2615_v46  ;;  %v2632_v39 = vld [vmem:[#allocation2 + $0x110] sm:$0xff]  ;;  %v2633_v9 = vld [vmem:[#allocation2 + $0x118] sm:$0xff]  ;;  %p3175_p13 = pnand %p3174_p2, %p3168_p5 }
 0x34a   : > { %2665 = vst [vmem:[%s5031_s23 + $0x90] sm:$0xff] %v2616_v14  ;;  %2666 = vst [vmem:[%s5031_s23 + $0x98] sm:$0xff] %v2617_v8  ;;  %v2634_v28 = vld [vmem:[#allocation2 + $0x120] sm:$0xff]  ;;  %v2635_v26 = vld [vmem:[#allocation2 + $0x128] sm:$0xff] }
 0x34b   : > { %2667 = vst [vmem:[%s5031_s23 + $0xa0] sm:$0xff] %v2618_v20  ;;  %2668 = vst [vmem:[%s5031_s23 + $0xa8] sm:$0xff] %v2619_v21  ;;  %v2636_v23 = vld [vmem:[#allocation2 + $0x130] sm:$0xff]  ;;  %v2637_v59 = vld [vmem:[#allocation2 + $0x138] sm:$0xff] }
 0x34c   : > { %2669 = vst [vmem:[%s5031_s23 + $0xb0] sm:$0xff] %v2620_v45  ;;  %2670 = vst [vmem:[%s5031_s23 + $0xb8] sm:$0xff] %v2621_v3  ;;  %v2638_v58 = vld [vmem:[#allocation2 + $0x140] sm:$0xff]  ;;  %v2639_v54 = vld [vmem:[#allocation2 + $0x148] sm:$0xff] }
 0x34d   : > { %2671 = vst [vmem:[%s5031_s23 + $0xc0] sm:$0xff] %v2622_v32  ;;  %2672 = vst [vmem:[%s5031_s23 + $0xc8] sm:$0xff] %v2623_v38  ;;  %v2640_v19 = vld [vmem:[#allocation2 + $0x150] sm:$0xff]  ;;  %v2641_v15 = vld [vmem:[#allocation2 + $0x158] sm:$0xff] }
 0x34e   : > { %2673 = vst [vmem:[%s5031_s23 + $0xd0] sm:$0xff] %v2624_v1  ;;  %2674 = vst [vmem:[%s5031_s23 + $0xd8] sm:$0xff] %v2625_v61  ;;  %v2642_v30 = vld [vmem:[#allocation2 + $0x160] sm:$0xff]  ;;  %v2643_v16 = vld [vmem:[#allocation2 + $0x168] sm:$0xff] }
 0x34f   : > { %2675 = vst [vmem:[%s5031_s23 + $0xe0] sm:$0xff] %v2626_v27  ;;  %2676 = vst [vmem:[%s5031_s23 + $0xe8] sm:$0xff] %v2627_v12  ;;  %v2644_v41 = vld [vmem:[#allocation2 + $0x170] sm:$0xff]  ;;  %v2645_v57 = vld [vmem:[#allocation2 + $0x178] sm:$0xff] }
 0x350   : > { %2677 = vst [vmem:[%s5031_s23 + $0xf0] sm:$0xff] %v2628_v52  ;;  %2678 = vst [vmem:[%s5031_s23 + $0xf8] sm:$0xff] %v2629_v4  ;;  %v2646_v0 = vld [vmem:[#allocation2 + $0x180] sm:$0xff] }
 0x351   : > { %2679 = vst [vmem:[%s5031_s23 + $0x100] sm:$0xff] %v2630_v33  ;;  %2680 = vst [vmem:[%s5031_s23 + $0x108] sm:$0xff] %v2631_v40 }
 0x352   : > { %2681 = vst [vmem:[%s5031_s23 + $0x110] sm:$0xff] %v2632_v39  ;;  %2682 = vst [vmem:[%s5031_s23 + $0x118] sm:$0xff] %v2633_v9 }
 0x353   : > { %2683 = vst [vmem:[%s5031_s23 + $0x120] sm:$0xff] %v2634_v28  ;;  %2684 = vst [vmem:[%s5031_s23 + $0x128] sm:$0xff] %v2635_v26 }
 0x354   : > { %2685 = vst [vmem:[%s5031_s23 + $0x130] sm:$0xff] %v2636_v23  ;;  %2686 = vst [vmem:[%s5031_s23 + $0x138] sm:$0xff] %v2637_v59 }
 0x355   : > { %2687 = vst [vmem:[%s5031_s23 + $0x140] sm:$0xff] %v2638_v58  ;;  %2688 = vst [vmem:[%s5031_s23 + $0x148] sm:$0xff] %v2639_v54 }
 0x356   : > { %2689 = vst [vmem:[%s5031_s23 + $0x150] sm:$0xff] %v2640_v19  ;;  %2690 = vst [vmem:[%s5031_s23 + $0x158] sm:$0xff] %v2641_v15 }
 0x357   : > { %2691 = vst [vmem:[%s5031_s23 + $0x160] sm:$0xff] %v2642_v30  ;;  %2692 = vst [vmem:[%s5031_s23 + $0x168] sm:$0xff] %v2643_v16 }
 0x358   : > { %2693 = vst [vmem:[%s5031_s23 + $0x170] sm:$0xff] %v2644_v41  ;;  %2694 = vst [vmem:[%s5031_s23 + $0x178] sm:$0xff] %v2645_v57 }
 0x359   : > { %2695 = vst [vmem:[%s5031_s23 + $0x180] sm:$0xff] %v2646_v0 }
 0x35a   : > { %3178 = shalt.err (!%p3175_p13)
}
 0x35b   : > { %s3179_s10 = scalar_lea.hbm %s4799_s21, 6272  ;;  %s3183_s28 = scalar_lea.hbm %s5034_s25, 12544 }
 0x35c   : > { %p3180_p7 = scmp.ne.s32.totalorder %s4799_s21, %s3179_s10  ;;  %p3184_p1 = scmp.lt.u32.totalorder %s4799_s21, %s5034_s25 }
 0x35d   : > { %p3185_p4 = scmp.lt.u32.totalorder %s3183_s28, %s3179_s10  ;;  %p3187_p12 = scmp.lt.u32.totalorder %s3179_s10, %s4799_s21 }
 0x35e   : > { %p3181_p10 = pnand %p3180_p7, %p3450_p0 }
 0x35f   : > { %p3186_p8 = por %p3185_p4, %p3184_p1 }
 0x360   : > { %p3182_p11 = pneg %p3181_p10 }
 0x361   : > { %p3188_p3 = por %p3187_p12, %p3186_p8 }
 0x363   : > { %p3189_p5 = pnand %p3188_p3, %p3182_p11 }
 0x365   : > { %3192 = shalt.err (!%p3189_p5)
}
 0x366   : > { %s3277_s5 = smov 128   ;;  %s3278_s27 = smov 8  }
 0x367   : > { %2955 = dma.vmem_to_hbm [thread:$0]  (%p3450_p0), %s4804_s16, 6272, %s4799_s21, %s2697_s24, %s3277_s5, %s3277_s5, %s3278_s27  }
 0x368 PF: > { %s5036_s8 = sld [smem:[#allocation21_spill]]  ;;  %s5037_s26 = sld [smem:[#allocation27_spill]] }
 0x369   : > { %s5038_s17 = sld [smem:[#allocation26_spill]] }
 0x36e   : > { %s2727_s4 = sand.u32 1, %s5036_s8   ;;  %p5039_p9 = scmp.ne.s32.totalorder %s5037_s26, 0 }
 0x36f   : > { %p5040_p6 = scmp.ge.s32.totalorder %s5038_s17, 2  ;;  %s2728_s1 = scalar_lea.sflag [#allocation5], %s2727_s4 }
 0x371   : > { %p2975_p2 = pnand %p5040_p6, %p5039_p9 }
 0x373   : > { %3238 = dma.done.wait (!%p2975_p2), %s2728_s1, 6272  }
 0x374   : > { %3240 = vsyncadd (!%p2975_p2), %s2728_s1, 4294961024  ;;  %s25_s23 = sadd.s32 1, %s5038_s17   ;;  %s5041_s18 = sld [smem:[#allocation22_spill]] }
 0x375   : > { %p22_p13 = scmp.ge.s32.totalorder %s25_s23, 4   ;;  %s5042_s19 = sld [smem:[#allocation23_spill]] }
 0x376   : > { %s5043_s20 = sld [smem:[#allocation30_spill]]  ;;  %s5044_s21 = sld [smem:[#allocation25_spill]] }
 0x377   : > { %s5045_s22 = sld [smem:[#allocation28_spill]]  ;;  %24 = sbr.rel (!%p22_p13) target bundleno = 17 (0x11), region = 118 }
 0x37e   :  { %2733 = vsyncpa [#allocation4], 1 }
 0x37f   :  { %2735 = vsyncpa [#allocation4 + $0x1], 1 }
 0x380   :  { %2736 = vsyncpa [#allocation13], 1 }
 0x381   :  { %2738 = vsyncpa [#allocation13 + $0x1], 1 }
 0x382   :  { %2739 = vsyncpa [#allocation5], 1 }
 0x383   :  { %2741 = vsyncpa [#allocation5 + $0x1], 1 }
 0x384   :  { %2742 = vsyncpa [#allocation6], 1 }
 0x385   :  { %2744 = vsyncpa [#allocation6 + $0x1], 1 }
 0x386   :  { %2745 = vsyncpa [#allocation7], 1 }
 0x387   :  { %2747 = vsyncpa [#allocation7 + $0x1], 1 }
 0x388   :  { %2748 = vsyncpa [#allocation10], 1 }

</bundles_post_ra>
